<compile_context>
chip_gen: v7x
topology: tpu7x:2x2x1
jax: 0.10.0
libtpu: 0.0.40
codegen_flags: <defaults>
</compile_context>

<pallas_src>
import functools

import numpy as np
import jax
import jax.numpy as jnp
from jax.experimental import pallas as pl
from jax.experimental.pallas import tpu as pltpu

EPS = 1e-5
LANE = 128

# ---------------- network config (concrete ResNetBase subclass) ----------------
INIT_DIM = 16
PLANES = (16, 32)
LAYERS = (1, 1)
STRIDES = (1, 2)
FIRST_STRIDE = 2
IN_CHANNELS = 4
OUT_CHANNELS = 10


def _round_up(x, m):
    return (x + m - 1) // m * m


# -------------------- static one-hot gather matrices (trace time) ---------------
def conv_gather_mats(H, W, k, stride):
    """Per-tap one-hot matrices S[t] of shape (Ho*Wo, H*W).  Row m of S[t] selects
    the flattened input position read by output position m for tap t=(di,dj) of a
    k x k, stride `stride`, centered-padding conv; all-zero rows == zero padding."""
    pad = k // 2
    Ho = (H + 2 * pad - k) // stride + 1
    Wo = (W + 2 * pad - k) // stride + 1
    mats = np.zeros((k * k, Ho * Wo, H * W), np.float32)
    for di in range(k):
        for dj in range(k):
            t = di * k + dj
            for oi in range(Ho):
                ii = oi * stride + di - pad
                if not 0 <= ii < H:
                    continue
                for oj in range(Wo):
                    jj = oj * stride + dj - pad
                    if not 0 <= jj < W:
                        continue
                    mats[t, oi * Wo + oj, ii * W + jj] = 1.0
    return mats, Ho, Wo


def pool_gather_mats(H, W):
    """One-hot gather matrices (4, Ho*Wo, H*W) for MaxPool(kernel=2, stride=2)."""
    Ho, Wo = H // 2, W // 2
    mats = np.zeros((4, Ho * Wo, H * W), np.float32)
    for t, (di, dj) in enumerate(((0, 0), (0, 1), (1, 0), (1, 1))):
        for oi in range(Ho):
            for oj in range(Wo):
                mats[t, oi * Wo + oj, (2 * oi + di) * W + (2 * oj + dj)] = 1.0
    return mats, Ho, Wo


# ------------------------------ the fused Pallas kernel -------------------------
def _conv_taps(h, s_ref, w_ref, b_ref, taps):
    """conv over the VMEM-resident activation h:(P_in, Cin):
         out = sum_t (S_t @ bf16(h)) @ W_t  + bias
    S_t rows are one-hot (or zero == padding), so S_t @ h is an exact gather and the
    whole expression equals the im2col-matmul formulation in bf16 / f32-accumulate."""
    hb = h.astype(jnp.bfloat16)
    acc = None
    for t in range(taps):
        g = jnp.dot(s_ref[t], hb, preferred_element_type=jnp.float32)
        p = jnp.dot(g.astype(jnp.bfloat16), w_ref[t],
                    preferred_element_type=jnp.float32)
        acc = p if acc is None else acc + p
    return acc + b_ref[...]


def _resnet_kernel(*refs, plan):
    """Whole-network forward for ONE sample (grid axis = batch, 'parallel').
    `plan` is a static description of the layer sequence; refs are consumed in the
    same order they were appended by the wrapper."""
    o_ref = refs[-1]
    in_refs = refs[:-1]
    pos = 0

    def take(n):
        nonlocal pos
        out = in_refs[pos:pos + n]
        pos += n
        return out

    h = None
    for op, meta in plan:
        if op == 'conv1':
            # patches (P1, K1p) bf16  @  folded weight (K1p, C) bf16  -> f32
            p_ref, w_ref, b_ref = take(3)
            h = jnp.dot(p_ref[0], w_ref[...], preferred_element_type=jnp.float32)
            h = jnp.maximum(h + b_ref[...], 0.0)
        elif op == 'maxpool':
            # exact gather (f32 one-hot matmul) of the 4 window taps, then max
            (s_ref,) = take(1)
            g = [jnp.dot(s_ref[t], h, preferred_element_type=jnp.float32)
                 for t in range(meta)]
            h = functools.reduce(jnp.maximum, g)
        elif op == 'block':
            # BasicBlock: conv-bn-relu, conv-bn, (+identity | +1x1-downsample), relu
            taps, has_ds = meta
            sa, wa, ba, sb, wb, bb = take(6)
            identity = h
            y = jnp.maximum(_conv_taps(h, sa, wa, ba, taps), 0.0)
            y = _conv_taps(y, sb, wb, bb, taps)
            if has_ds:
                sd, wd, bd = take(3)
                g = jnp.dot(sd[...], identity.astype(jnp.bfloat16),
                            preferred_element_type=jnp.float32)
                res = jnp.dot(g.astype(jnp.bfloat16), wd[...],
                              preferred_element_type=jnp.float32) + bd[...]
            else:
                res = identity
            h = jnp.maximum(y + res, 0.0)
        else:  # 'head': global average pool + final linear (lane-padded output)
            wf_ref, bf_ref = take(2)
            feat = jnp.sum(h, axis=0, keepdims=True) * meta       # mean over voxels
            y = jnp.dot(feat, wf_ref[...], preferred_element_type=jnp.float32)
            o_ref[0] = (y + bf_ref[...]).astype(o_ref.dtype)


# ------------------------------ glue (plain JAX) --------------------------------
def im2col(x, k, stride):
    """NHWC -> (N, Ho*Wo, k*k*C) patch matrix, centered padding.  Used only for
    conv1 on the raw network input."""
    N, H, W, C = x.shape
    pad = k // 2
    Ho = (H + 2 * pad - k) // stride + 1
    Wo = (W + 2 * pad - k) // stride + 1
    xp = jnp.pad(x, ((0, 0), (pad, pad), (pad, pad), (0, 0)))
    cols = []
    for di in range(k):
        for dj in range(k):
            cols.append(xp[:, di:di + stride * (Ho - 1) + 1:stride,
                           dj:dj + stride * (Wo - 1) + 1:stride, :])
    patches = jnp.stack(cols, axis=3)                 # (N, Ho, Wo, k*k, C)
    return patches.reshape(N, Ho * Wo, k * k * C), (Ho, Wo)


def fold_bn(p):
    """Fold eval-mode BN (gamma,beta,mean,var, eps=1e-5) into conv weight/bias."""
    w, b = p['w'], p['b']
    if p['bn'] is None:
        return w, b
    g, beta, mu, var = p['bn']
    scale = g * jax.lax.rsqrt(var + EPS)
    return w * scale[None, :], (b - mu) * scale + beta


# ---------------------------- parameter initialization --------------------------
def init_conv(key, k, cin, cout):
    # kaiming_normal_(mode='fan_out', nonlinearity='relu')
    fan_out = cout * k * k
    std = (2.0 / fan_out) ** 0.5
    kw, kb = jax.random.split(key)
    w = jax.random.normal(kw, (k * k * cin, cout), jnp.float32) * std
    b = jax.random.normal(kb, (cout,), jnp.float32) * 0.01
    # MinkowskiBatchNorm after weight_initialization(): gamma=1, beta=0; fresh
    # running stats (mean=0, var=1), eval-mode normalization (folded at trace time).
    bn = (jnp.ones((cout,), jnp.float32), jnp.zeros((cout,), jnp.float32),
          jnp.zeros((cout,), jnp.float32), jnp.ones((cout,), jnp.float32))
    return {'w': w, 'b': b, 'bn': bn}


def init_params(key, in_ch, out_ch):
    keys = jax.random.split(key, 32)
    ki = iter(keys)
    params = {'conv1': init_conv(next(ki), 7, in_ch, INIT_DIM)}
    inplanes = INIT_DIM
    stages = []
    for planes, layers, stride in zip(PLANES, LAYERS, STRIDES):
        blocks = []
        for li in range(layers):
            s = stride if li == 0 else 1
            blk = {
                'conv1': init_conv(next(ki), 3, inplanes, planes),
                'conv2': init_conv(next(ki), 3, planes, planes),
                'ds': (init_conv(next(ki), 1, inplanes, planes)
                       if (s != 1 or inplanes != planes) else None),
            }
            blocks.append(blk)
            inplanes = planes
        stages.append(blocks)
    params['stages'] = stages
    kf1, kf2 = jax.random.split(next(ki))
    params['final_w'] = (jax.random.normal(kf1, (inplanes, out_ch), jnp.float32)
                         * (1.0 / inplanes ** 0.5))
    params['final_b'] = jax.random.normal(kf2, (out_ch,), jnp.float32) * 0.01
    return params


# ---------------------------------- forward -------------------------------------
def forward(params, x_nchw):
    # NCHW (PyTorch convention) -> NHWC internal layout
    x = jnp.transpose(x_nchw, (0, 2, 3, 1)).astype(jnp.float32)
    B, H, W, Cin = x.shape

    inputs, in_specs, plan = [], [], []

    def add_bcast(arr):
        """Parameter / gather-matrix input: full array as one block, resident
        across the batch grid (constant index map => no per-step re-DMA)."""
        inputs.append(arr)
        nd = arr.ndim
        in_specs.append(pl.BlockSpec(arr.shape, lambda *a, _nd=nd: (0,) * _nd))

    # --- conv1 (7x7, stride 2): im2col in the wrapper on the raw input only ------
    k1 = 7
    patches, (H1, W1) = im2col(x, k1, FIRST_STRIDE)
    P1 = H1 * W1
    K1 = k1 * k1 * Cin
    K1p = _round_up(K1, LANE)
    patches = jnp.pad(patches.astype(jnp.bfloat16),          # bf16 before pad
                      ((0, 0), (0, 0), (0, K1p - K1)))
    w1, b1 = fold_bn(params['conv1'])
    w1 = jnp.pad(w1.astype(jnp.bfloat16), ((0, K1p - K1), (0, 0)))
    inputs.append(patches)
    in_specs.append(pl.BlockSpec((1, P1, K1p), lambda b: (b, 0, 0)))
    add_bcast(w1)
    add_bcast(b1.reshape(1, -1).astype(jnp.float32))
    plan.append(('conv1', None))

    # --- MinkowskiMaxPooling(kernel_size=2, stride=2) via one-hot gathers ---------
    S_pool, Hc, Wc = pool_gather_mats(H1, W1)
    add_bcast(jnp.asarray(S_pool, jnp.float32))               # exact f32 gather
    plan.append(('maxpool', S_pool.shape[0]))

    # --- residual stages (BasicBlock, expansion=1), fully in-kernel --------------
    inplanes = INIT_DIM
    for si, (planes, layers, stride) in enumerate(zip(PLANES, LAYERS, STRIDES)):
        for li, blk in enumerate(params['stages'][si]):
            s = stride if li == 0 else 1
            # conv a: 3x3, stride s
            Sa, Ha, Wa = conv_gather_mats(Hc, Wc, 3, s)
            wa, ba = fold_bn(blk['conv1'])
            add_bcast(jnp.asarray(Sa, jnp.bfloat16))
            add_bcast(wa.reshape(9, inplanes, planes).astype(jnp.bfloat16))
            add_bcast(ba.reshape(1, -1).astype(jnp.float32))
            # conv b: 3x3, stride 1
            Sb, _, _ = conv_gather_mats(Ha, Wa, 3, 1)
            wb, bb = fold_bn(blk['conv2'])
            add_bcast(jnp.asarray(Sb, jnp.bfloat16))
            add_bcast(wb.reshape(9, planes, planes).astype(jnp.bfloat16))
            add_bcast(bb.reshape(1, -1).astype(jnp.float32))
            # optional 1x1 stride-s downsample of the identity
            has_ds = blk['ds'] is not None
            if has_ds:
                Sd, _, _ = conv_gather_mats(Hc, Wc, 1, s)
                wd, bd = fold_bn(blk['ds'])
                add_bcast(jnp.asarray(Sd[0], jnp.bfloat16))
                add_bcast(wd.astype(jnp.bfloat16))
                add_bcast(bd.reshape(1, -1).astype(jnp.float32))
            plan.append(('block', (9, has_ds)))
            Hc, Wc = Ha, Wa
            inplanes = planes

    # --- global avg pool + final Linear (dropout=0.0 is a no-op) -----------------
    OUTP = _round_up(OUT_CHANNELS, LANE)                       # lane-dense output
    wf = jnp.pad(params['final_w'].astype(jnp.float32),
                 ((0, 0), (0, OUTP - OUT_CHANNELS)))
    bf = jnp.pad(params['final_b'].astype(jnp.float32),
                 (0, OUTP - OUT_CHANNELS)).reshape(1, OUTP)
    add_bcast(wf)
    add_bcast(bf)
    plan.append(('head', 1.0 / float(Hc * Wc)))

    kernel = functools.partial(_resnet_kernel, plan=tuple(plan))
    out = pl.pallas_call(
        kernel,
        grid=(B,),                                             # >=2 parallel points
        in_specs=in_specs,
        out_specs=pl.BlockSpec((1, 1, OUTP), lambda b: (b, 0, 0)),
        out_shape=jax.ShapeDtypeStruct((B, 1, OUTP), jnp.float32),
        compiler_params=pltpu.CompilerParams(
            dimension_semantics=("parallel",)),
    )(*inputs)
    return out[:, 0, :OUT_CHANNELS]


if __name__ == "__main__":
    key = jax.random.PRNGKey(0)
    kx, kp = jax.random.split(key)
    x = jax.random.normal(kx, (2, IN_CHANNELS, 16, 16), jnp.float32)   # NCHW
    params = init_params(kp, IN_CHANNELS, OUT_CHANNELS)
    fwd = jax.jit(forward)
    out = fwd(params, x)
    out = jax.block_until_ready(out)
    assert out.shape == (2, OUT_CHANNELS)
    assert bool(jnp.all(jnp.isfinite(out)))
    print("KERNEL_OK")
</pallas_src>

<mosaic_0001>
module attributes {stable_mosaic.version = 11 : i64} {
  func.func @_resnet_kernel(%arg0: i32, %arg1: memref<1x64x256xbf16, #tpu.memory_space<vmem>>, %arg2: memref<256x16xbf16, #tpu.memory_space<vmem>>, %arg3: memref<1x16xf32, #tpu.memory_space<vmem>>, %arg4: memref<4x16x64xf32, #tpu.memory_space<vmem>>, %arg5: memref<9x16x16xbf16, #tpu.memory_space<vmem>>, %arg6: memref<9x16x16xbf16, #tpu.memory_space<vmem>>, %arg7: memref<1x16xf32, #tpu.memory_space<vmem>>, %arg8: memref<9x16x16xbf16, #tpu.memory_space<vmem>>, %arg9: memref<9x16x16xbf16, #tpu.memory_space<vmem>>, %arg10: memref<1x16xf32, #tpu.memory_space<vmem>>, %arg11: memref<9x4x16xbf16, #tpu.memory_space<vmem>>, %arg12: memref<9x16x32xbf16, #tpu.memory_space<vmem>>, %arg13: memref<1x32xf32, #tpu.memory_space<vmem>>, %arg14: memref<9x4x4xbf16, #tpu.memory_space<vmem>>, %arg15: memref<9x32x32xbf16, #tpu.memory_space<vmem>>, %arg16: memref<1x32xf32, #tpu.memory_space<vmem>>, %arg17: memref<4x16xbf16, #tpu.memory_space<vmem>>, %arg18: memref<16x32xbf16, #tpu.memory_space<vmem>>, %arg19: memref<1x32xf32, #tpu.memory_space<vmem>>, %arg20: memref<32x128xf32, #tpu.memory_space<vmem>>, %arg21: memref<1x128xf32, #tpu.memory_space<vmem>>, %arg22: memref<1x1x128xf32, #tpu.memory_space<vmem>>) attributes {dimension_semantics = [#tpu.dimension_semantics<parallel>], iteration_bounds = array<i64: 2>, scalar_prefetch = 0 : i64, scratch_operands = 0 : i64, tpu.core_type = #tpu.core_type<tc>, window_params = [{transform_indices = @transform_0, window_bounds = array<i64: 1, 64, 256>}, {pipeline_mode = #tpu.pipeline_mode<synchronous>, transform_indices = @transform_1, window_bounds = array<i64: 256, 16>}, {pipeline_mode = #tpu.pipeline_mode<synchronous>, transform_indices = @transform_2, window_bounds = array<i64: 1, 16>}, {pipeline_mode = #tpu.pipeline_mode<synchronous>, transform_indices = @transform_3, window_bounds = array<i64: 4, 16, 64>}, {pipeline_mode = #tpu.pipeline_mode<synchronous>, transform_indices = @transform_4, window_bounds = array<i64: 9, 16, 16>}, {pipeline_mode = #tpu.pipeline_mode<synchronous>, transform_indices = @transform_5, window_bounds = array<i64: 9, 16, 16>}, {pipeline_mode = #tpu.pipeline_mode<synchronous>, transform_indices = @transform_6, window_bounds = array<i64: 1, 16>}, {pipeline_mode = #tpu.pipeline_mode<synchronous>, transform_indices = @transform_7, window_bounds = array<i64: 9, 16, 16>}, {pipeline_mode = #tpu.pipeline_mode<synchronous>, transform_indices = @transform_8, window_bounds = array<i64: 9, 16, 16>}, {pipeline_mode = #tpu.pipeline_mode<synchronous>, transform_indices = @transform_9, window_bounds = array<i64: 1, 16>}, {pipeline_mode = #tpu.pipeline_mode<synchronous>, transform_indices = @transform_10, window_bounds = array<i64: 9, 4, 16>}, {pipeline_mode = #tpu.pipeline_mode<synchronous>, transform_indices = @transform_11, window_bounds = array<i64: 9, 16, 32>}, {pipeline_mode = #tpu.pipeline_mode<synchronous>, transform_indices = @transform_12, window_bounds = array<i64: 1, 32>}, {pipeline_mode = #tpu.pipeline_mode<synchronous>, transform_indices = @transform_13, window_bounds = array<i64: 9, 4, 4>}, {pipeline_mode = #tpu.pipeline_mode<synchronous>, transform_indices = @transform_14, window_bounds = array<i64: 9, 32, 32>}, {pipeline_mode = #tpu.pipeline_mode<synchronous>, transform_indices = @transform_15, window_bounds = array<i64: 1, 32>}, {pipeline_mode = #tpu.pipeline_mode<synchronous>, transform_indices = @transform_16, window_bounds = array<i64: 4, 16>}, {pipeline_mode = #tpu.pipeline_mode<synchronous>, transform_indices = @transform_17, window_bounds = array<i64: 16, 32>}, {pipeline_mode = #tpu.pipeline_mode<synchronous>, transform_indices = @transform_18, window_bounds = array<i64: 1, 32>}, {pipeline_mode = #tpu.pipeline_mode<synchronous>, transform_indices = @transform_19, window_bounds = array<i64: 32, 128>}, {pipeline_mode = #tpu.pipeline_mode<synchronous>, transform_indices = @transform_20, window_bounds = array<i64: 1, 128>}, {transform_indices = @transform_21, window_bounds = array<i64: 1, 1, 128>}]} {
    %c0 = arith.constant 0 : index
    %c0_0 = arith.constant 0 : index
    %c0_1 = arith.constant 0 : index
    %0 = vector.load %arg1[%c0, %c0_0, %c0_1] : memref<1x64x256xbf16, #tpu.memory_space<vmem>>, vector<1x64x256xbf16>
    %1 = vector.shape_cast %0 : vector<1x64x256xbf16> to vector<64x256xbf16>
    %c0_2 = arith.constant 0 : index
    %c0_3 = arith.constant 0 : index
    %2 = vector.load %arg2[%c0_2, %c0_3] : memref<256x16xbf16, #tpu.memory_space<vmem>>, vector<256x16xbf16>
    %cst = arith.constant dense<0.000000e+00> : vector<64x16xf32>
    %3 = tpu.matmul %1, %2, %cst {dimension_numbers = #tpu.dot_dimension_numbers<[1], [0], [0], [1], [0, 0, 1, 1], [], []>} : vector<64x256xbf16>, vector<256x16xbf16>, vector<64x16xf32> -> vector<64x16xf32>
    %c0_4 = arith.constant 0 : index
    %c0_5 = arith.constant 0 : index
    %4 = vector.load %arg3[%c0_4, %c0_5] : memref<1x16xf32, #tpu.memory_space<vmem>>, vector<1x16xf32>
    %5 = vector.broadcast %4 : vector<1x16xf32> to vector<64x16xf32>
    %6 = arith.addf %3, %5 : vector<64x16xf32>
    %cst_6 = arith.constant 0.000000e+00 : f32
    %7 = vector.broadcast %cst_6 : f32 to vector<64x16xf32>
    %8 = arith.maximumf %6, %7 : vector<64x16xf32>
    %c0_7 = arith.constant 0 : index
    %c0_8 = arith.constant 0 : index
    %c0_9 = arith.constant 0 : index
    %9 = vector.load %arg4[%c0_7, %c0_8, %c0_9] : memref<4x16x64xf32, #tpu.memory_space<vmem>>, vector<1x16x64xf32>
    %10 = vector.shape_cast %9 : vector<1x16x64xf32> to vector<16x64xf32>
    %cst_10 = arith.constant dense<0.000000e+00> : vector<16x16xf32>
    %11 = tpu.matmul %10, %8, %cst_10 {dimension_numbers = #tpu.dot_dimension_numbers<[1], [0], [0], [1], [0, 0, 1, 1], [], []>} : vector<16x64xf32>, vector<64x16xf32>, vector<16x16xf32> -> vector<16x16xf32>
    %c1 = arith.constant 1 : index
    %c0_11 = arith.constant 0 : index
    %c0_12 = arith.constant 0 : index
    %12 = vector.load %arg4[%c1, %c0_11, %c0_12] : memref<4x16x64xf32, #tpu.memory_space<vmem>>, vector<1x16x64xf32>
    %13 = vector.shape_cast %12 : vector<1x16x64xf32> to vector<16x64xf32>
    %cst_13 = arith.constant dense<0.000000e+00> : vector<16x16xf32>
    %14 = tpu.matmul %13, %8, %cst_13 {dimension_numbers = #tpu.dot_dimension_numbers<[1], [0], [0], [1], [0, 0, 1, 1], [], []>} : vector<16x64xf32>, vector<64x16xf32>, vector<16x16xf32> -> vector<16x16xf32>
    %c2 = arith.constant 2 : index
    %c0_14 = arith.constant 0 : index
    %c0_15 = arith.constant 0 : index
    %15 = vector.load %arg4[%c2, %c0_14, %c0_15] : memref<4x16x64xf32, #tpu.memory_space<vmem>>, vector<1x16x64xf32>
    %16 = vector.shape_cast %15 : vector<1x16x64xf32> to vector<16x64xf32>
    %cst_16 = arith.constant dense<0.000000e+00> : vector<16x16xf32>
    %17 = tpu.matmul %16, %8, %cst_16 {dimension_numbers = #tpu.dot_dimension_numbers<[1], [0], [0], [1], [0, 0, 1, 1], [], []>} : vector<16x64xf32>, vector<64x16xf32>, vector<16x16xf32> -> vector<16x16xf32>
    %c3 = arith.constant 3 : index
    %c0_17 = arith.constant 0 : index
    %c0_18 = arith.constant 0 : index
    %18 = vector.load %arg4[%c3, %c0_17, %c0_18] : memref<4x16x64xf32, #tpu.memory_space<vmem>>, vector<1x16x64xf32>
    %19 = vector.shape_cast %18 : vector<1x16x64xf32> to vector<16x64xf32>
    %cst_19 = arith.constant dense<0.000000e+00> : vector<16x16xf32>
    %20 = tpu.matmul %19, %8, %cst_19 {dimension_numbers = #tpu.dot_dimension_numbers<[1], [0], [0], [1], [0, 0, 1, 1], [], []>} : vector<16x64xf32>, vector<64x16xf32>, vector<16x16xf32> -> vector<16x16xf32>
    %21 = arith.maximumf %11, %14 : vector<16x16xf32>
    %22 = arith.maximumf %21, %17 : vector<16x16xf32>
    %23 = arith.maximumf %22, %20 : vector<16x16xf32>
    %24 = arith.truncf %23 : vector<16x16xf32> to vector<16x16xbf16>
    %c0_20 = arith.constant 0 : index
    %c0_21 = arith.constant 0 : index
    %c0_22 = arith.constant 0 : index
    %25 = vector.load %arg5[%c0_20, %c0_21, %c0_22] : memref<9x16x16xbf16, #tpu.memory_space<vmem>>, vector<1x16x16xbf16>
    %26 = vector.shape_cast %25 : vector<1x16x16xbf16> to vector<16x16xbf16>
    %cst_23 = arith.constant dense<0.000000e+00> : vector<16x16xf32>
    %27 = tpu.matmul %26, %24, %cst_23 {dimension_numbers = #tpu.dot_dimension_numbers<[1], [0], [0], [1], [0, 0, 1, 1], [], []>} : vector<16x16xbf16>, vector<16x16xbf16>, vector<16x16xf32> -> vector<16x16xf32>
    %28 = arith.truncf %27 : vector<16x16xf32> to vector<16x16xbf16>
    %c0_24 = arith.constant 0 : index
    %c0_25 = arith.constant 0 : index
    %c0_26 = arith.constant 0 : index
    %29 = vector.load %arg6[%c0_24, %c0_25, %c0_26] : memref<9x16x16xbf16, #tpu.memory_space<vmem>>, vector<1x16x16xbf16>
    %30 = vector.shape_cast %29 : vector<1x16x16xbf16> to vector<16x16xbf16>
    %cst_27 = arith.constant dense<0.000000e+00> : vector<16x16xf32>
    %31 = tpu.matmul %28, %30, %cst_27 {dimension_numbers = #tpu.dot_dimension_numbers<[1], [0], [0], [1], [0, 0, 1, 1], [], []>} : vector<16x16xbf16>, vector<16x16xbf16>, vector<16x16xf32> -> vector<16x16xf32>
    %c1_28 = arith.constant 1 : index
    %c0_29 = arith.constant 0 : index
    %c0_30 = arith.constant 0 : index
    %32 = vector.load %arg5[%c1_28, %c0_29, %c0_30] : memref<9x16x16xbf16, #tpu.memory_space<vmem>>, vector<1x16x16xbf16>
    %33 = vector.shape_cast %32 : vector<1x16x16xbf16> to vector<16x16xbf16>
    %cst_31 = arith.constant dense<0.000000e+00> : vector<16x16xf32>
    %34 = tpu.matmul %33, %24, %cst_31 {dimension_numbers = #tpu.dot_dimension_numbers<[1], [0], [0], [1], [0, 0, 1, 1], [], []>} : vector<16x16xbf16>, vector<16x16xbf16>, vector<16x16xf32> -> vector<16x16xf32>
    %35 = arith.truncf %34 : vector<16x16xf32> to vector<16x16xbf16>
    %c1_32 = arith.constant 1 : index
    %c0_33 = arith.constant 0 : index
    %c0_34 = arith.constant 0 : index
    %36 = vector.load %arg6[%c1_32, %c0_33, %c0_34] : memref<9x16x16xbf16, #tpu.memory_space<vmem>>, vector<1x16x16xbf16>
    %37 = vector.shape_cast %36 : vector<1x16x16xbf16> to vector<16x16xbf16>
    %cst_35 = arith.constant dense<0.000000e+00> : vector<16x16xf32>
    %38 = tpu.matmul %35, %37, %cst_35 {dimension_numbers = #tpu.dot_dimension_numbers<[1], [0], [0], [1], [0, 0, 1, 1], [], []>} : vector<16x16xbf16>, vector<16x16xbf16>, vector<16x16xf32> -> vector<16x16xf32>
    %39 = arith.addf %31, %38 : vector<16x16xf32>
    %c2_36 = arith.constant 2 : index
    %c0_37 = arith.constant 0 : index
    %c0_38 = arith.constant 0 : index
    %40 = vector.load %arg5[%c2_36, %c0_37, %c0_38] : memref<9x16x16xbf16, #tpu.memory_space<vmem>>, vector<1x16x16xbf16>
    %41 = vector.shape_cast %40 : vector<1x16x16xbf16> to vector<16x16xbf16>
    %cst_39 = arith.constant dense<0.000000e+00> : vector<16x16xf32>
    %42 = tpu.matmul %41, %24, %cst_39 {dimension_numbers = #tpu.dot_dimension_numbers<[1], [0], [0], [1], [0, 0, 1, 1], [], []>} : vector<16x16xbf16>, vector<16x16xbf16>, vector<16x16xf32> -> vector<16x16xf32>
    %43 = arith.truncf %42 : vector<16x16xf32> to vector<16x16xbf16>
    %c2_40 = arith.constant 2 : index
    %c0_41 = arith.constant 0 : index
    %c0_42 = arith.constant 0 : index
    %44 = vector.load %arg6[%c2_40, %c0_41, %c0_42] : memref<9x16x16xbf16, #tpu.memory_space<vmem>>, vector<1x16x16xbf16>
    %45 = vector.shape_cast %44 : vector<1x16x16xbf16> to vector<16x16xbf16>
    %cst_43 = arith.constant dense<0.000000e+00> : vector<16x16xf32>
    %46 = tpu.matmul %43, %45, %cst_43 {dimension_numbers = #tpu.dot_dimension_numbers<[1], [0], [0], [1], [0, 0, 1, 1], [], []>} : vector<16x16xbf16>, vector<16x16xbf16>, vector<16x16xf32> -> vector<16x16xf32>
    %47 = arith.addf %39, %46 : vector<16x16xf32>
    %c3_44 = arith.constant 3 : index
    %c0_45 = arith.constant 0 : index
    %c0_46 = arith.constant 0 : index
    %48 = vector.load %arg5[%c3_44, %c0_45, %c0_46] : memref<9x16x16xbf16, #tpu.memory_space<vmem>>, vector<1x16x16xbf16>
    %49 = vector.shape_cast %48 : vector<1x16x16xbf16> to vector<16x16xbf16>
    %cst_47 = arith.constant dense<0.000000e+00> : vector<16x16xf32>
    %50 = tpu.matmul %49, %24, %cst_47 {dimension_numbers = #tpu.dot_dimension_numbers<[1], [0], [0], [1], [0, 0, 1, 1], [], []>} : vector<16x16xbf16>, vector<16x16xbf16>, vector<16x16xf32> -> vector<16x16xf32>
    %51 = arith.truncf %50 : vector<16x16xf32> to vector<16x16xbf16>
    %c3_48 = arith.constant 3 : index
    %c0_49 = arith.constant 0 : index
    %c0_50 = arith.constant 0 : index
    %52 = vector.load %arg6[%c3_48, %c0_49, %c0_50] : memref<9x16x16xbf16, #tpu.memory_space<vmem>>, vector<1x16x16xbf16>
    %53 = vector.shape_cast %52 : vector<1x16x16xbf16> to vector<16x16xbf16>
    %cst_51 = arith.constant dense<0.000000e+00> : vector<16x16xf32>
    %54 = tpu.matmul %51, %53, %cst_51 {dimension_numbers = #tpu.dot_dimension_numbers<[1], [0], [0], [1], [0, 0, 1, 1], [], []>} : vector<16x16xbf16>, vector<16x16xbf16>, vector<16x16xf32> -> vector<16x16xf32>
    %55 = arith.addf %47, %54 : vector<16x16xf32>
    %c4 = arith.constant 4 : index
    %c0_52 = arith.constant 0 : index
    %c0_53 = arith.constant 0 : index
    %56 = vector.load %arg5[%c4, %c0_52, %c0_53] : memref<9x16x16xbf16, #tpu.memory_space<vmem>>, vector<1x16x16xbf16>
    %57 = vector.shape_cast %56 : vector<1x16x16xbf16> to vector<16x16xbf16>
    %cst_54 = arith.constant dense<0.000000e+00> : vector<16x16xf32>
    %58 = tpu.matmul %57, %24, %cst_54 {dimension_numbers = #tpu.dot_dimension_numbers<[1], [0], [0], [1], [0, 0, 1, 1], [], []>} : vector<16x16xbf16>, vector<16x16xbf16>, vector<16x16xf32> -> vector<16x16xf32>
    %59 = arith.truncf %58 : vector<16x16xf32> to vector<16x16xbf16>
    %c4_55 = arith.constant 4 : index
    %c0_56 = arith.constant 0 : index
    %c0_57 = arith.constant 0 : index
    %60 = vector.load %arg6[%c4_55, %c0_56, %c0_57] : memref<9x16x16xbf16, #tpu.memory_space<vmem>>, vector<1x16x16xbf16>
    %61 = vector.shape_cast %60 : vector<1x16x16xbf16> to vector<16x16xbf16>
    %cst_58 = arith.constant dense<0.000000e+00> : vector<16x16xf32>
    %62 = tpu.matmul %59, %61, %cst_58 {dimension_numbers = #tpu.dot_dimension_numbers<[1], [0], [0], [1], [0, 0, 1, 1], [], []>} : vector<16x16xbf16>, vector<16x16xbf16>, vector<16x16xf32> -> vector<16x16xf32>
    %63 = arith.addf %55, %62 : vector<16x16xf32>
    %c5 = arith.constant 5 : index
    %c0_59 = arith.constant 0 : index
    %c0_60 = arith.constant 0 : index
    %64 = vector.load %arg5[%c5, %c0_59, %c0_60] : memref<9x16x16xbf16, #tpu.memory_space<vmem>>, vector<1x16x16xbf16>
    %65 = vector.shape_cast %64 : vector<1x16x16xbf16> to vector<16x16xbf16>
    %cst_61 = arith.constant dense<0.000000e+00> : vector<16x16xf32>
    %66 = tpu.matmul %65, %24, %cst_61 {dimension_numbers = #tpu.dot_dimension_numbers<[1], [0], [0], [1], [0, 0, 1, 1], [], []>} : vector<16x16xbf16>, vector<16x16xbf16>, vector<16x16xf32> -> vector<16x16xf32>
    %67 = arith.truncf %66 : vector<16x16xf32> to vector<16x16xbf16>
    %c5_62 = arith.constant 5 : index
    %c0_63 = arith.constant 0 : index
    %c0_64 = arith.constant 0 : index
    %68 = vector.load %arg6[%c5_62, %c0_63, %c0_64] : memref<9x16x16xbf16, #tpu.memory_space<vmem>>, vector<1x16x16xbf16>
    %69 = vector.shape_cast %68 : vector<1x16x16xbf16> to vector<16x16xbf16>
    %cst_65 = arith.constant dense<0.000000e+00> : vector<16x16xf32>
    %70 = tpu.matmul %67, %69, %cst_65 {dimension_numbers = #tpu.dot_dimension_numbers<[1], [0], [0], [1], [0, 0, 1, 1], [], []>} : vector<16x16xbf16>, vector<16x16xbf16>, vector<16x16xf32> -> vector<16x16xf32>
    %71 = arith.addf %63, %70 : vector<16x16xf32>
    %c6 = arith.constant 6 : index
    %c0_66 = arith.constant 0 : index
    %c0_67 = arith.constant 0 : index
    %72 = vector.load %arg5[%c6, %c0_66, %c0_67] : memref<9x16x16xbf16, #tpu.memory_space<vmem>>, vector<1x16x16xbf16>
    %73 = vector.shape_cast %72 : vector<1x16x16xbf16> to vector<16x16xbf16>
    %cst_68 = arith.constant dense<0.000000e+00> : vector<16x16xf32>
    %74 = tpu.matmul %73, %24, %cst_68 {dimension_numbers = #tpu.dot_dimension_numbers<[1], [0], [0], [1], [0, 0, 1, 1], [], []>} : vector<16x16xbf16>, vector<16x16xbf16>, vector<16x16xf32> -> vector<16x16xf32>
    %75 = arith.truncf %74 : vector<16x16xf32> to vector<16x16xbf16>
    %c6_69 = arith.constant 6 : index
    %c0_70 = arith.constant 0 : index
    %c0_71 = arith.constant 0 : index
    %76 = vector.load %arg6[%c6_69, %c0_70, %c0_71] : memref<9x16x16xbf16, #tpu.memory_space<vmem>>, vector<1x16x16xbf16>
    %77 = vector.shape_cast %76 : vector<1x16x16xbf16> to vector<16x16xbf16>
    %cst_72 = arith.constant dense<0.000000e+00> : vector<16x16xf32>
    %78 = tpu.matmul %75, %77, %cst_72 {dimension_numbers = #tpu.dot_dimension_numbers<[1], [0], [0], [1], [0, 0, 1, 1], [], []>} : vector<16x16xbf16>, vector<16x16xbf16>, vector<16x16xf32> -> vector<16x16xf32>
    %79 = arith.addf %71, %78 : vector<16x16xf32>
    %c7 = arith.constant 7 : index
    %c0_73 = arith.constant 0 : index
    %c0_74 = arith.constant 0 : index
    %80 = vector.load %arg5[%c7, %c0_73, %c0_74] : memref<9x16x16xbf16, #tpu.memory_space<vmem>>, vector<1x16x16xbf16>
    %81 = vector.shape_cast %80 : vector<1x16x16xbf16> to vector<16x16xbf16>
    %cst_75 = arith.constant dense<0.000000e+00> : vector<16x16xf32>
    %82 = tpu.matmul %81, %24, %cst_75 {dimension_numbers = #tpu.dot_dimension_numbers<[1], [0], [0], [1], [0, 0, 1, 1], [], []>} : vector<16x16xbf16>, vector<16x16xbf16>, vector<16x16xf32> -> vector<16x16xf32>
    %83 = arith.truncf %82 : vector<16x16xf32> to vector<16x16xbf16>
    %c7_76 = arith.constant 7 : index
    %c0_77 = arith.constant 0 : index
    %c0_78 = arith.constant 0 : index
    %84 = vector.load %arg6[%c7_76, %c0_77, %c0_78] : memref<9x16x16xbf16, #tpu.memory_space<vmem>>, vector<1x16x16xbf16>
    %85 = vector.shape_cast %84 : vector<1x16x16xbf16> to vector<16x16xbf16>
    %cst_79 = arith.constant dense<0.000000e+00> : vector<16x16xf32>
    %86 = tpu.matmul %83, %85, %cst_79 {dimension_numbers = #tpu.dot_dimension_numbers<[1], [0], [0], [1], [0, 0, 1, 1], [], []>} : vector<16x16xbf16>, vector<16x16xbf16>, vector<16x16xf32> -> vector<16x16xf32>
    %87 = arith.addf %79, %86 : vector<16x16xf32>
    %c8 = arith.constant 8 : index
    %c0_80 = arith.constant 0 : index
    %c0_81 = arith.constant 0 : index
    %88 = vector.load %arg5[%c8, %c0_80, %c0_81] : memref<9x16x16xbf16, #tpu.memory_space<vmem>>, vector<1x16x16xbf16>
    %89 = vector.shape_cast %88 : vector<1x16x16xbf16> to vector<16x16xbf16>
    %cst_82 = arith.constant dense<0.000000e+00> : vector<16x16xf32>
    %90 = tpu.matmul %89, %24, %cst_82 {dimension_numbers = #tpu.dot_dimension_numbers<[1], [0], [0], [1], [0, 0, 1, 1], [], []>} : vector<16x16xbf16>, vector<16x16xbf16>, vector<16x16xf32> -> vector<16x16xf32>
    %91 = arith.truncf %90 : vector<16x16xf32> to vector<16x16xbf16>
    %c8_83 = arith.constant 8 : index
    %c0_84 = arith.constant 0 : index
    %c0_85 = arith.constant 0 : index
    %92 = vector.load %arg6[%c8_83, %c0_84, %c0_85] : memref<9x16x16xbf16, #tpu.memory_space<vmem>>, vector<1x16x16xbf16>
    %93 = vector.shape_cast %92 : vector<1x16x16xbf16> to vector<16x16xbf16>
    %cst_86 = arith.constant dense<0.000000e+00> : vector<16x16xf32>
    %94 = tpu.matmul %91, %93, %cst_86 {dimension_numbers = #tpu.dot_dimension_numbers<[1], [0], [0], [1], [0, 0, 1, 1], [], []>} : vector<16x16xbf16>, vector<16x16xbf16>, vector<16x16xf32> -> vector<16x16xf32>
    %95 = arith.addf %87, %94 : vector<16x16xf32>
    %c0_87 = arith.constant 0 : index
    %c0_88 = arith.constant 0 : index
    %96 = vector.load %arg7[%c0_87, %c0_88] : memref<1x16xf32, #tpu.memory_space<vmem>>, vector<1x16xf32>
    %97 = vector.broadcast %96 : vector<1x16xf32> to vector<16x16xf32>
    %98 = arith.addf %95, %97 : vector<16x16xf32>
    %cst_89 = arith.constant 0.000000e+00 : f32
    %99 = vector.broadcast %cst_89 : f32 to vector<16x16xf32>
    %100 = arith.maximumf %98, %99 : vector<16x16xf32>
    %101 = arith.truncf %100 : vector<16x16xf32> to vector<16x16xbf16>
    %c0_90 = arith.constant 0 : index
    %c0_91 = arith.constant 0 : index
    %c0_92 = arith.constant 0 : index
    %102 = vector.load %arg8[%c0_90, %c0_91, %c0_92] : memref<9x16x16xbf16, #tpu.memory_space<vmem>>, vector<1x16x16xbf16>
    %103 = vector.shape_cast %102 : vector<1x16x16xbf16> to vector<16x16xbf16>
    %cst_93 = arith.constant dense<0.000000e+00> : vector<16x16xf32>
    %104 = tpu.matmul %103, %101, %cst_93 {dimension_numbers = #tpu.dot_dimension_numbers<[1], [0], [0], [1], [0, 0, 1, 1], [], []>} : vector<16x16xbf16>, vector<16x16xbf16>, vector<16x16xf32> -> vector<16x16xf32>
    %105 = arith.truncf %104 : vector<16x16xf32> to vector<16x16xbf16>
    %c0_94 = arith.constant 0 : index
    %c0_95 = arith.constant 0 : index
    %c0_96 = arith.constant 0 : index
    %106 = vector.load %arg9[%c0_94, %c0_95, %c0_96] : memref<9x16x16xbf16, #tpu.memory_space<vmem>>, vector<1x16x16xbf16>
    %107 = vector.shape_cast %106 : vector<1x16x16xbf16> to vector<16x16xbf16>
    %cst_97 = arith.constant dense<0.000000e+00> : vector<16x16xf32>
    %108 = tpu.matmul %105, %107, %cst_97 {dimension_numbers = #tpu.dot_dimension_numbers<[1], [0], [0], [1], [0, 0, 1, 1], [], []>} : vector<16x16xbf16>, vector<16x16xbf16>, vector<16x16xf32> -> vector<16x16xf32>
    %c1_98 = arith.constant 1 : index
    %c0_99 = arith.constant 0 : index
    %c0_100 = arith.constant 0 : index
    %109 = vector.load %arg8[%c1_98, %c0_99, %c0_100] : memref<9x16x16xbf16, #tpu.memory_space<vmem>>, vector<1x16x16xbf16>
    %110 = vector.shape_cast %109 : vector<1x16x16xbf16> to vector<16x16xbf16>
    %cst_101 = arith.constant dense<0.000000e+00> : vector<16x16xf32>
    %111 = tpu.matmul %110, %101, %cst_101 {dimension_numbers = #tpu.dot_dimension_numbers<[1], [0], [0], [1], [0, 0, 1, 1], [], []>} : vector<16x16xbf16>, vector<16x16xbf16>, vector<16x16xf32> -> vector<16x16xf32>
    %112 = arith.truncf %111 : vector<16x16xf32> to vector<16x16xbf16>
    %c1_102 = arith.constant 1 : index
    %c0_103 = arith.constant 0 : index
    %c0_104 = arith.constant 0 : index
    %113 = vector.load %arg9[%c1_102, %c0_103, %c0_104] : memref<9x16x16xbf16, #tpu.memory_space<vmem>>, vector<1x16x16xbf16>
    %114 = vector.shape_cast %113 : vector<1x16x16xbf16> to vector<16x16xbf16>
    %cst_105 = arith.constant dense<0.000000e+00> : vector<16x16xf32>
    %115 = tpu.matmul %112, %114, %cst_105 {dimension_numbers = #tpu.dot_dimension_numbers<[1], [0], [0], [1], [0, 0, 1, 1], [], []>} : vector<16x16xbf16>, vector<16x16xbf16>, vector<16x16xf32> -> vector<16x16xf32>
    %116 = arith.addf %108, %115 : vector<16x16xf32>
    %c2_106 = arith.constant 2 : index
    %c0_107 = arith.constant 0 : index
    %c0_108 = arith.constant 0 : index
    %117 = vector.load %arg8[%c2_106, %c0_107, %c0_108] : memref<9x16x16xbf16, #tpu.memory_space<vmem>>, vector<1x16x16xbf16>
    %118 = vector.shape_cast %117 : vector<1x16x16xbf16> to vector<16x16xbf16>
    %cst_109 = arith.constant dense<0.000000e+00> : vector<16x16xf32>
    %119 = tpu.matmul %118, %101, %cst_109 {dimension_numbers = #tpu.dot_dimension_numbers<[1], [0], [0], [1], [0, 0, 1, 1], [], []>} : vector<16x16xbf16>, vector<16x16xbf16>, vector<16x16xf32> -> vector<16x16xf32>
    %120 = arith.truncf %119 : vector<16x16xf32> to vector<16x16xbf16>
    %c2_110 = arith.constant 2 : index
    %c0_111 = arith.constant 0 : index
    %c0_112 = arith.constant 0 : index
    %121 = vector.load %arg9[%c2_110, %c0_111, %c0_112] : memref<9x16x16xbf16, #tpu.memory_space<vmem>>, vector<1x16x16xbf16>
    %122 = vector.shape_cast %121 : vector<1x16x16xbf16> to vector<16x16xbf16>
    %cst_113 = arith.constant dense<0.000000e+00> : vector<16x16xf32>
    %123 = tpu.matmul %120, %122, %cst_113 {dimension_numbers = #tpu.dot_dimension_numbers<[1], [0], [0], [1], [0, 0, 1, 1], [], []>} : vector<16x16xbf16>, vector<16x16xbf16>, vector<16x16xf32> -> vector<16x16xf32>
    %124 = arith.addf %116, %123 : vector<16x16xf32>
    %c3_114 = arith.constant 3 : index
    %c0_115 = arith.constant 0 : index
    %c0_116 = arith.constant 0 : index
    %125 = vector.load %arg8[%c3_114, %c0_115, %c0_116] : memref<9x16x16xbf16, #tpu.memory_space<vmem>>, vector<1x16x16xbf16>
    %126 = vector.shape_cast %125 : vector<1x16x16xbf16> to vector<16x16xbf16>
    %cst_117 = arith.constant dense<0.000000e+00> : vector<16x16xf32>
    %127 = tpu.matmul %126, %101, %cst_117 {dimension_numbers = #tpu.dot_dimension_numbers<[1], [0], [0], [1], [0, 0, 1, 1], [], []>} : vector<16x16xbf16>, vector<16x16xbf16>, vector<16x16xf32> -> vector<16x16xf32>
    %128 = arith.truncf %127 : vector<16x16xf32> to vector<16x16xbf16>
    %c3_118 = arith.constant 3 : index
    %c0_119 = arith.constant 0 : index
    %c0_120 = arith.constant 0 : index
    %129 = vector.load %arg9[%c3_118, %c0_119, %c0_120] : memref<9x16x16xbf16, #tpu.memory_space<vmem>>, vector<1x16x16xbf16>
    %130 = vector.shape_cast %129 : vector<1x16x16xbf16> to vector<16x16xbf16>
    %cst_121 = arith.constant dense<0.000000e+00> : vector<16x16xf32>
    %131 = tpu.matmul %128, %130, %cst_121 {dimension_numbers = #tpu.dot_dimension_numbers<[1], [0], [0], [1], [0, 0, 1, 1], [], []>} : vector<16x16xbf16>, vector<16x16xbf16>, vector<16x16xf32> -> vector<16x16xf32>
    %132 = arith.addf %124, %131 : vector<16x16xf32>
    %c4_122 = arith.constant 4 : index
    %c0_123 = arith.constant 0 : index
    %c0_124 = arith.constant 0 : index
    %133 = vector.load %arg8[%c4_122, %c0_123, %c0_124] : memref<9x16x16xbf16, #tpu.memory_space<vmem>>, vector<1x16x16xbf16>
    %134 = vector.shape_cast %133 : vector<1x16x16xbf16> to vector<16x16xbf16>
    %cst_125 = arith.constant dense<0.000000e+00> : vector<16x16xf32>
    %135 = tpu.matmul %134, %101, %cst_125 {dimension_numbers = #tpu.dot_dimension_numbers<[1], [0], [0], [1], [0, 0, 1, 1], [], []>} : vector<16x16xbf16>, vector<16x16xbf16>, vector<16x16xf32> -> vector<16x16xf32>
    %136 = arith.truncf %135 : vector<16x16xf32> to vector<16x16xbf16>
    %c4_126 = arith.constant 4 : index
    %c0_127 = arith.constant 0 : index
    %c0_128 = arith.constant 0 : index
    %137 = vector.load %arg9[%c4_126, %c0_127, %c0_128] : memref<9x16x16xbf16, #tpu.memory_space<vmem>>, vector<1x16x16xbf16>
    %138 = vector.shape_cast %137 : vector<1x16x16xbf16> to vector<16x16xbf16>
    %cst_129 = arith.constant dense<0.000000e+00> : vector<16x16xf32>
    %139 = tpu.matmul %136, %138, %cst_129 {dimension_numbers = #tpu.dot_dimension_numbers<[1], [0], [0], [1], [0, 0, 1, 1], [], []>} : vector<16x16xbf16>, vector<16x16xbf16>, vector<16x16xf32> -> vector<16x16xf32>
    %140 = arith.addf %132, %139 : vector<16x16xf32>
    %c5_130 = arith.constant 5 : index
    %c0_131 = arith.constant 0 : index
    %c0_132 = arith.constant 0 : index
    %141 = vector.load %arg8[%c5_130, %c0_131, %c0_132] : memref<9x16x16xbf16, #tpu.memory_space<vmem>>, vector<1x16x16xbf16>
    %142 = vector.shape_cast %141 : vector<1x16x16xbf16> to vector<16x16xbf16>
    %cst_133 = arith.constant dense<0.000000e+00> : vector<16x16xf32>
    %143 = tpu.matmul %142, %101, %cst_133 {dimension_numbers = #tpu.dot_dimension_numbers<[1], [0], [0], [1], [0, 0, 1, 1], [], []>} : vector<16x16xbf16>, vector<16x16xbf16>, vector<16x16xf32> -> vector<16x16xf32>
    %144 = arith.truncf %143 : vector<16x16xf32> to vector<16x16xbf16>
    %c5_134 = arith.constant 5 : index
    %c0_135 = arith.constant 0 : index
    %c0_136 = arith.constant 0 : index
    %145 = vector.load %arg9[%c5_134, %c0_135, %c0_136] : memref<9x16x16xbf16, #tpu.memory_space<vmem>>, vector<1x16x16xbf16>
    %146 = vector.shape_cast %145 : vector<1x16x16xbf16> to vector<16x16xbf16>
    %cst_137 = arith.constant dense<0.000000e+00> : vector<16x16xf32>
    %147 = tpu.matmul %144, %146, %cst_137 {dimension_numbers = #tpu.dot_dimension_numbers<[1], [0], [0], [1], [0, 0, 1, 1], [], []>} : vector<16x16xbf16>, vector<16x16xbf16>, vector<16x16xf32> -> vector<16x16xf32>
    %148 = arith.addf %140, %147 : vector<16x16xf32>
    %c6_138 = arith.constant 6 : index
    %c0_139 = arith.constant 0 : index
    %c0_140 = arith.constant 0 : index
    %149 = vector.load %arg8[%c6_138, %c0_139, %c0_140] : memref<9x16x16xbf16, #tpu.memory_space<vmem>>, vector<1x16x16xbf16>
    %150 = vector.shape_cast %149 : vector<1x16x16xbf16> to vector<16x16xbf16>
    %cst_141 = arith.constant dense<0.000000e+00> : vector<16x16xf32>
    %151 = tpu.matmul %150, %101, %cst_141 {dimension_numbers = #tpu.dot_dimension_numbers<[1], [0], [0], [1], [0, 0, 1, 1], [], []>} : vector<16x16xbf16>, vector<16x16xbf16>, vector<16x16xf32> -> vector<16x16xf32>
    %152 = arith.truncf %151 : vector<16x16xf32> to vector<16x16xbf16>
    %c6_142 = arith.constant 6 : index
    %c0_143 = arith.constant 0 : index
    %c0_144 = arith.constant 0 : index
    %153 = vector.load %arg9[%c6_142, %c0_143, %c0_144] : memref<9x16x16xbf16, #tpu.memory_space<vmem>>, vector<1x16x16xbf16>
    %154 = vector.shape_cast %153 : vector<1x16x16xbf16> to vector<16x16xbf16>
    %cst_145 = arith.constant dense<0.000000e+00> : vector<16x16xf32>
    %155 = tpu.matmul %152, %154, %cst_145 {dimension_numbers = #tpu.dot_dimension_numbers<[1], [0], [0], [1], [0, 0, 1, 1], [], []>} : vector<16x16xbf16>, vector<16x16xbf16>, vector<16x16xf32> -> vector<16x16xf32>
    %156 = arith.addf %148, %155 : vector<16x16xf32>
    %c7_146 = arith.constant 7 : index
    %c0_147 = arith.constant 0 : index
    %c0_148 = arith.constant 0 : index
    %157 = vector.load %arg8[%c7_146, %c0_147, %c0_148] : memref<9x16x16xbf16, #tpu.memory_space<vmem>>, vector<1x16x16xbf16>
    %158 = vector.shape_cast %157 : vector<1x16x16xbf16> to vector<16x16xbf16>
    %cst_149 = arith.constant dense<0.000000e+00> : vector<16x16xf32>
    %159 = tpu.matmul %158, %101, %cst_149 {dimension_numbers = #tpu.dot_dimension_numbers<[1], [0], [0], [1], [0, 0, 1, 1], [], []>} : vector<16x16xbf16>, vector<16x16xbf16>, vector<16x16xf32> -> vector<16x16xf32>
    %160 = arith.truncf %159 : vector<16x16xf32> to vector<16x16xbf16>
    %c7_150 = arith.constant 7 : index
    %c0_151 = arith.constant 0 : index
    %c0_152 = arith.constant 0 : index
    %161 = vector.load %arg9[%c7_150, %c0_151, %c0_152] : memref<9x16x16xbf16, #tpu.memory_space<vmem>>, vector<1x16x16xbf16>
    %162 = vector.shape_cast %161 : vector<1x16x16xbf16> to vector<16x16xbf16>
    %cst_153 = arith.constant dense<0.000000e+00> : vector<16x16xf32>
    %163 = tpu.matmul %160, %162, %cst_153 {dimension_numbers = #tpu.dot_dimension_numbers<[1], [0], [0], [1], [0, 0, 1, 1], [], []>} : vector<16x16xbf16>, vector<16x16xbf16>, vector<16x16xf32> -> vector<16x16xf32>
    %164 = arith.addf %156, %163 : vector<16x16xf32>
    %c8_154 = arith.constant 8 : index
    %c0_155 = arith.constant 0 : index
    %c0_156 = arith.constant 0 : index
    %165 = vector.load %arg8[%c8_154, %c0_155, %c0_156] : memref<9x16x16xbf16, #tpu.memory_space<vmem>>, vector<1x16x16xbf16>
    %166 = vector.shape_cast %165 : vector<1x16x16xbf16> to vector<16x16xbf16>
    %cst_157 = arith.constant dense<0.000000e+00> : vector<16x16xf32>
    %167 = tpu.matmul %166, %101, %cst_157 {dimension_numbers = #tpu.dot_dimension_numbers<[1], [0], [0], [1], [0, 0, 1, 1], [], []>} : vector<16x16xbf16>, vector<16x16xbf16>, vector<16x16xf32> -> vector<16x16xf32>
    %168 = arith.truncf %167 : vector<16x16xf32> to vector<16x16xbf16>
    %c8_158 = arith.constant 8 : index
    %c0_159 = arith.constant 0 : index
    %c0_160 = arith.constant 0 : index
    %169 = vector.load %arg9[%c8_158, %c0_159, %c0_160] : memref<9x16x16xbf16, #tpu.memory_space<vmem>>, vector<1x16x16xbf16>
    %170 = vector.shape_cast %169 : vector<1x16x16xbf16> to vector<16x16xbf16>
    %cst_161 = arith.constant dense<0.000000e+00> : vector<16x16xf32>
    %171 = tpu.matmul %168, %170, %cst_161 {dimension_numbers = #tpu.dot_dimension_numbers<[1], [0], [0], [1], [0, 0, 1, 1], [], []>} : vector<16x16xbf16>, vector<16x16xbf16>, vector<16x16xf32> -> vector<16x16xf32>
    %172 = arith.addf %164, %171 : vector<16x16xf32>
    %c0_162 = arith.constant 0 : index
    %c0_163 = arith.constant 0 : index
    %173 = vector.load %arg10[%c0_162, %c0_163] : memref<1x16xf32, #tpu.memory_space<vmem>>, vector<1x16xf32>
    %174 = vector.broadcast %173 : vector<1x16xf32> to vector<16x16xf32>
    %175 = arith.addf %172, %174 : vector<16x16xf32>
    %176 = arith.addf %175, %23 : vector<16x16xf32>
    %cst_164 = arith.constant 0.000000e+00 : f32
    %177 = vector.broadcast %cst_164 : f32 to vector<16x16xf32>
    %178 = arith.maximumf %176, %177 : vector<16x16xf32>
    %179 = arith.truncf %178 : vector<16x16xf32> to vector<16x16xbf16>
    %c0_165 = arith.constant 0 : index
    %c0_166 = arith.constant 0 : index
    %c0_167 = arith.constant 0 : index
    %180 = vector.load %arg11[%c0_165, %c0_166, %c0_167] : memref<9x4x16xbf16, #tpu.memory_space<vmem>>, vector<1x4x16xbf16>
    %181 = vector.shape_cast %180 : vector<1x4x16xbf16> to vector<4x16xbf16>
    %cst_168 = arith.constant dense<0.000000e+00> : vector<4x16xf32>
    %182 = tpu.matmul %181, %179, %cst_168 {dimension_numbers = #tpu.dot_dimension_numbers<[1], [0], [0], [1], [0, 0, 1, 1], [], []>} : vector<4x16xbf16>, vector<16x16xbf16>, vector<4x16xf32> -> vector<4x16xf32>
    %183 = arith.truncf %182 : vector<4x16xf32> to vector<4x16xbf16>
    %c0_169 = arith.constant 0 : index
    %c0_170 = arith.constant 0 : index
    %c0_171 = arith.constant 0 : index
    %184 = vector.load %arg12[%c0_169, %c0_170, %c0_171] : memref<9x16x32xbf16, #tpu.memory_space<vmem>>, vector<1x16x32xbf16>
    %185 = vector.shape_cast %184 : vector<1x16x32xbf16> to vector<16x32xbf16>
    %cst_172 = arith.constant dense<0.000000e+00> : vector<4x32xf32>
    %186 = tpu.matmul %183, %185, %cst_172 {dimension_numbers = #tpu.dot_dimension_numbers<[1], [0], [0], [1], [0, 0, 1, 1], [], []>} : vector<4x16xbf16>, vector<16x32xbf16>, vector<4x32xf32> -> vector<4x32xf32>
    %c1_173 = arith.constant 1 : index
    %c0_174 = arith.constant 0 : index
    %c0_175 = arith.constant 0 : index
    %187 = vector.load %arg11[%c1_173, %c0_174, %c0_175] : memref<9x4x16xbf16, #tpu.memory_space<vmem>>, vector<1x4x16xbf16>
    %188 = vector.shape_cast %187 : vector<1x4x16xbf16> to vector<4x16xbf16>
    %cst_176 = arith.constant dense<0.000000e+00> : vector<4x16xf32>
    %189 = tpu.matmul %188, %179, %cst_176 {dimension_numbers = #tpu.dot_dimension_numbers<[1], [0], [0], [1], [0, 0, 1, 1], [], []>} : vector<4x16xbf16>, vector<16x16xbf16>, vector<4x16xf32> -> vector<4x16xf32>
    %190 = arith.truncf %189 : vector<4x16xf32> to vector<4x16xbf16>
    %c1_177 = arith.constant 1 : index
    %c0_178 = arith.constant 0 : index
    %c0_179 = arith.constant 0 : index
    %191 = vector.load %arg12[%c1_177, %c0_178, %c0_179] : memref<9x16x32xbf16, #tpu.memory_space<vmem>>, vector<1x16x32xbf16>
    %192 = vector.shape_cast %191 : vector<1x16x32xbf16> to vector<16x32xbf16>
    %cst_180 = arith.constant dense<0.000000e+00> : vector<4x32xf32>
    %193 = tpu.matmul %190, %192, %cst_180 {dimension_numbers = #tpu.dot_dimension_numbers<[1], [0], [0], [1], [0, 0, 1, 1], [], []>} : vector<4x16xbf16>, vector<16x32xbf16>, vector<4x32xf32> -> vector<4x32xf32>
    %194 = arith.addf %186, %193 : vector<4x32xf32>
    %c2_181 = arith.constant 2 : index
    %c0_182 = arith.constant 0 : index
    %c0_183 = arith.constant 0 : index
    %195 = vector.load %arg11[%c2_181, %c0_182, %c0_183] : memref<9x4x16xbf16, #tpu.memory_space<vmem>>, vector<1x4x16xbf16>
    %196 = vector.shape_cast %195 : vector<1x4x16xbf16> to vector<4x16xbf16>
    %cst_184 = arith.constant dense<0.000000e+00> : vector<4x16xf32>
    %197 = tpu.matmul %196, %179, %cst_184 {dimension_numbers = #tpu.dot_dimension_numbers<[1], [0], [0], [1], [0, 0, 1, 1], [], []>} : vector<4x16xbf16>, vector<16x16xbf16>, vector<4x16xf32> -> vector<4x16xf32>
    %198 = arith.truncf %197 : vector<4x16xf32> to vector<4x16xbf16>
    %c2_185 = arith.constant 2 : index
    %c0_186 = arith.constant 0 : index
    %c0_187 = arith.constant 0 : index
    %199 = vector.load %arg12[%c2_185, %c0_186, %c0_187] : memref<9x16x32xbf16, #tpu.memory_space<vmem>>, vector<1x16x32xbf16>
    %200 = vector.shape_cast %199 : vector<1x16x32xbf16> to vector<16x32xbf16>
    %cst_188 = arith.constant dense<0.000000e+00> : vector<4x32xf32>
    %201 = tpu.matmul %198, %200, %cst_188 {dimension_numbers = #tpu.dot_dimension_numbers<[1], [0], [0], [1], [0, 0, 1, 1], [], []>} : vector<4x16xbf16>, vector<16x32xbf16>, vector<4x32xf32> -> vector<4x32xf32>
    %202 = arith.addf %194, %201 : vector<4x32xf32>
    %c3_189 = arith.constant 3 : index
    %c0_190 = arith.constant 0 : index
    %c0_191 = arith.constant 0 : index
    %203 = vector.load %arg11[%c3_189, %c0_190, %c0_191] : memref<9x4x16xbf16, #tpu.memory_space<vmem>>, vector<1x4x16xbf16>
    %204 = vector.shape_cast %203 : vector<1x4x16xbf16> to vector<4x16xbf16>
    %cst_192 = arith.constant dense<0.000000e+00> : vector<4x16xf32>
    %205 = tpu.matmul %204, %179, %cst_192 {dimension_numbers = #tpu.dot_dimension_numbers<[1], [0], [0], [1], [0, 0, 1, 1], [], []>} : vector<4x16xbf16>, vector<16x16xbf16>, vector<4x16xf32> -> vector<4x16xf32>
    %206 = arith.truncf %205 : vector<4x16xf32> to vector<4x16xbf16>
    %c3_193 = arith.constant 3 : index
    %c0_194 = arith.constant 0 : index
    %c0_195 = arith.constant 0 : index
    %207 = vector.load %arg12[%c3_193, %c0_194, %c0_195] : memref<9x16x32xbf16, #tpu.memory_space<vmem>>, vector<1x16x32xbf16>
    %208 = vector.shape_cast %207 : vector<1x16x32xbf16> to vector<16x32xbf16>
    %cst_196 = arith.constant dense<0.000000e+00> : vector<4x32xf32>
    %209 = tpu.matmul %206, %208, %cst_196 {dimension_numbers = #tpu.dot_dimension_numbers<[1], [0], [0], [1], [0, 0, 1, 1], [], []>} : vector<4x16xbf16>, vector<16x32xbf16>, vector<4x32xf32> -> vector<4x32xf32>
    %210 = arith.addf %202, %209 : vector<4x32xf32>
    %c4_197 = arith.constant 4 : index
    %c0_198 = arith.constant 0 : index
    %c0_199 = arith.constant 0 : index
    %211 = vector.load %arg11[%c4_197, %c0_198, %c0_199] : memref<9x4x16xbf16, #tpu.memory_space<vmem>>, vector<1x4x16xbf16>
    %212 = vector.shape_cast %211 : vector<1x4x16xbf16> to vector<4x16xbf16>
    %cst_200 = arith.constant dense<0.000000e+00> : vector<4x16xf32>
    %213 = tpu.matmul %212, %179, %cst_200 {dimension_numbers = #tpu.dot_dimension_numbers<[1], [0], [0], [1], [0, 0, 1, 1], [], []>} : vector<4x16xbf16>, vector<16x16xbf16>, vector<4x16xf32> -> vector<4x16xf32>
    %214 = arith.truncf %213 : vector<4x16xf32> to vector<4x16xbf16>
    %c4_201 = arith.constant 4 : index
    %c0_202 = arith.constant 0 : index
    %c0_203 = arith.constant 0 : index
    %215 = vector.load %arg12[%c4_201, %c0_202, %c0_203] : memref<9x16x32xbf16, #tpu.memory_space<vmem>>, vector<1x16x32xbf16>
    %216 = vector.shape_cast %215 : vector<1x16x32xbf16> to vector<16x32xbf16>
    %cst_204 = arith.constant dense<0.000000e+00> : vector<4x32xf32>
    %217 = tpu.matmul %214, %216, %cst_204 {dimension_numbers = #tpu.dot_dimension_numbers<[1], [0], [0], [1], [0, 0, 1, 1], [], []>} : vector<4x16xbf16>, vector<16x32xbf16>, vector<4x32xf32> -> vector<4x32xf32>
    %218 = arith.addf %210, %217 : vector<4x32xf32>
    %c5_205 = arith.constant 5 : index
    %c0_206 = arith.constant 0 : index
    %c0_207 = arith.constant 0 : index
    %219 = vector.load %arg11[%c5_205, %c0_206, %c0_207] : memref<9x4x16xbf16, #tpu.memory_space<vmem>>, vector<1x4x16xbf16>
    %220 = vector.shape_cast %219 : vector<1x4x16xbf16> to vector<4x16xbf16>
    %cst_208 = arith.constant dense<0.000000e+00> : vector<4x16xf32>
    %221 = tpu.matmul %220, %179, %cst_208 {dimension_numbers = #tpu.dot_dimension_numbers<[1], [0], [0], [1], [0, 0, 1, 1], [], []>} : vector<4x16xbf16>, vector<16x16xbf16>, vector<4x16xf32> -> vector<4x16xf32>
    %222 = arith.truncf %221 : vector<4x16xf32> to vector<4x16xbf16>
    %c5_209 = arith.constant 5 : index
    %c0_210 = arith.constant 0 : index
    %c0_211 = arith.constant 0 : index
    %223 = vector.load %arg12[%c5_209, %c0_210, %c0_211] : memref<9x16x32xbf16, #tpu.memory_space<vmem>>, vector<1x16x32xbf16>
    %224 = vector.shape_cast %223 : vector<1x16x32xbf16> to vector<16x32xbf16>
    %cst_212 = arith.constant dense<0.000000e+00> : vector<4x32xf32>
    %225 = tpu.matmul %222, %224, %cst_212 {dimension_numbers = #tpu.dot_dimension_numbers<[1], [0], [0], [1], [0, 0, 1, 1], [], []>} : vector<4x16xbf16>, vector<16x32xbf16>, vector<4x32xf32> -> vector<4x32xf32>
    %226 = arith.addf %218, %225 : vector<4x32xf32>
    %c6_213 = arith.constant 6 : index
    %c0_214 = arith.constant 0 : index
    %c0_215 = arith.constant 0 : index
    %227 = vector.load %arg11[%c6_213, %c0_214, %c0_215] : memref<9x4x16xbf16, #tpu.memory_space<vmem>>, vector<1x4x16xbf16>
    %228 = vector.shape_cast %227 : vector<1x4x16xbf16> to vector<4x16xbf16>
    %cst_216 = arith.constant dense<0.000000e+00> : vector<4x16xf32>
    %229 = tpu.matmul %228, %179, %cst_216 {dimension_numbers = #tpu.dot_dimension_numbers<[1], [0], [0], [1], [0, 0, 1, 1], [], []>} : vector<4x16xbf16>, vector<16x16xbf16>, vector<4x16xf32> -> vector<4x16xf32>
    %230 = arith.truncf %229 : vector<4x16xf32> to vector<4x16xbf16>
    %c6_217 = arith.constant 6 : index
    %c0_218 = arith.constant 0 : index
    %c0_219 = arith.constant 0 : index
    %231 = vector.load %arg12[%c6_217, %c0_218, %c0_219] : memref<9x16x32xbf16, #tpu.memory_space<vmem>>, vector<1x16x32xbf16>
    %232 = vector.shape_cast %231 : vector<1x16x32xbf16> to vector<16x32xbf16>
    %cst_220 = arith.constant dense<0.000000e+00> : vector<4x32xf32>
    %233 = tpu.matmul %230, %232, %cst_220 {dimension_numbers = #tpu.dot_dimension_numbers<[1], [0], [0], [1], [0, 0, 1, 1], [], []>} : vector<4x16xbf16>, vector<16x32xbf16>, vector<4x32xf32> -> vector<4x32xf32>
    %234 = arith.addf %226, %233 : vector<4x32xf32>
    %c7_221 = arith.constant 7 : index
    %c0_222 = arith.constant 0 : index
    %c0_223 = arith.constant 0 : index
    %235 = vector.load %arg11[%c7_221, %c0_222, %c0_223] : memref<9x4x16xbf16, #tpu.memory_space<vmem>>, vector<1x4x16xbf16>
    %236 = vector.shape_cast %235 : vector<1x4x16xbf16> to vector<4x16xbf16>
    %cst_224 = arith.constant dense<0.000000e+00> : vector<4x16xf32>
    %237 = tpu.matmul %236, %179, %cst_224 {dimension_numbers = #tpu.dot_dimension_numbers<[1], [0], [0], [1], [0, 0, 1, 1], [], []>} : vector<4x16xbf16>, vector<16x16xbf16>, vector<4x16xf32> -> vector<4x16xf32>
    %238 = arith.truncf %237 : vector<4x16xf32> to vector<4x16xbf16>
    %c7_225 = arith.constant 7 : index
    %c0_226 = arith.constant 0 : index
    %c0_227 = arith.constant 0 : index
    %239 = vector.load %arg12[%c7_225, %c0_226, %c0_227] : memref<9x16x32xbf16, #tpu.memory_space<vmem>>, vector<1x16x32xbf16>
    %240 = vector.shape_cast %239 : vector<1x16x32xbf16> to vector<16x32xbf16>
    %cst_228 = arith.constant dense<0.000000e+00> : vector<4x32xf32>
    %241 = tpu.matmul %238, %240, %cst_228 {dimension_numbers = #tpu.dot_dimension_numbers<[1], [0], [0], [1], [0, 0, 1, 1], [], []>} : vector<4x16xbf16>, vector<16x32xbf16>, vector<4x32xf32> -> vector<4x32xf32>
    %242 = arith.addf %234, %241 : vector<4x32xf32>
    %c8_229 = arith.constant 8 : index
    %c0_230 = arith.constant 0 : index
    %c0_231 = arith.constant 0 : index
    %243 = vector.load %arg11[%c8_229, %c0_230, %c0_231] : memref<9x4x16xbf16, #tpu.memory_space<vmem>>, vector<1x4x16xbf16>
    %244 = vector.shape_cast %243 : vector<1x4x16xbf16> to vector<4x16xbf16>
    %cst_232 = arith.constant dense<0.000000e+00> : vector<4x16xf32>
    %245 = tpu.matmul %244, %179, %cst_232 {dimension_numbers = #tpu.dot_dimension_numbers<[1], [0], [0], [1], [0, 0, 1, 1], [], []>} : vector<4x16xbf16>, vector<16x16xbf16>, vector<4x16xf32> -> vector<4x16xf32>
    %246 = arith.truncf %245 : vector<4x16xf32> to vector<4x16xbf16>
    %c8_233 = arith.constant 8 : index
    %c0_234 = arith.constant 0 : index
    %c0_235 = arith.constant 0 : index
    %247 = vector.load %arg12[%c8_233, %c0_234, %c0_235] : memref<9x16x32xbf16, #tpu.memory_space<vmem>>, vector<1x16x32xbf16>
    %248 = vector.shape_cast %247 : vector<1x16x32xbf16> to vector<16x32xbf16>
    %cst_236 = arith.constant dense<0.000000e+00> : vector<4x32xf32>
    %249 = tpu.matmul %246, %248, %cst_236 {dimension_numbers = #tpu.dot_dimension_numbers<[1], [0], [0], [1], [0, 0, 1, 1], [], []>} : vector<4x16xbf16>, vector<16x32xbf16>, vector<4x32xf32> -> vector<4x32xf32>
    %250 = arith.addf %242, %249 : vector<4x32xf32>
    %c0_237 = arith.constant 0 : index
    %c0_238 = arith.constant 0 : index
    %251 = vector.load %arg13[%c0_237, %c0_238] : memref<1x32xf32, #tpu.memory_space<vmem>>, vector<1x32xf32>
    %252 = vector.broadcast %251 : vector<1x32xf32> to vector<4x32xf32>
    %253 = arith.addf %250, %252 : vector<4x32xf32>
    %cst_239 = arith.constant 0.000000e+00 : f32
    %254 = vector.broadcast %cst_239 : f32 to vector<4x32xf32>
    %255 = arith.maximumf %253, %254 : vector<4x32xf32>
    %256 = arith.truncf %255 : vector<4x32xf32> to vector<4x32xbf16>
    %c0_240 = arith.constant 0 : index
    %c0_241 = arith.constant 0 : index
    %c0_242 = arith.constant 0 : index
    %257 = vector.load %arg14[%c0_240, %c0_241, %c0_242] : memref<9x4x4xbf16, #tpu.memory_space<vmem>>, vector<1x4x4xbf16>
    %258 = vector.shape_cast %257 : vector<1x4x4xbf16> to vector<4x4xbf16>
    %cst_243 = arith.constant dense<0.000000e+00> : vector<4x32xf32>
    %259 = tpu.matmul %258, %256, %cst_243 {dimension_numbers = #tpu.dot_dimension_numbers<[1], [0], [0], [1], [0, 0, 1, 1], [], []>} : vector<4x4xbf16>, vector<4x32xbf16>, vector<4x32xf32> -> vector<4x32xf32>
    %260 = arith.truncf %259 : vector<4x32xf32> to vector<4x32xbf16>
    %c0_244 = arith.constant 0 : index
    %c0_245 = arith.constant 0 : index
    %c0_246 = arith.constant 0 : index
    %261 = vector.load %arg15[%c0_244, %c0_245, %c0_246] : memref<9x32x32xbf16, #tpu.memory_space<vmem>>, vector<1x32x32xbf16>
    %262 = vector.shape_cast %261 : vector<1x32x32xbf16> to vector<32x32xbf16>
    %cst_247 = arith.constant dense<0.000000e+00> : vector<4x32xf32>
    %263 = tpu.matmul %260, %262, %cst_247 {dimension_numbers = #tpu.dot_dimension_numbers<[1], [0], [0], [1], [0, 0, 1, 1], [], []>} : vector<4x32xbf16>, vector<32x32xbf16>, vector<4x32xf32> -> vector<4x32xf32>
    %c1_248 = arith.constant 1 : index
    %c0_249 = arith.constant 0 : index
    %c0_250 = arith.constant 0 : index
    %264 = vector.load %arg14[%c1_248, %c0_249, %c0_250] : memref<9x4x4xbf16, #tpu.memory_space<vmem>>, vector<1x4x4xbf16>
    %265 = vector.shape_cast %264 : vector<1x4x4xbf16> to vector<4x4xbf16>
    %cst_251 = arith.constant dense<0.000000e+00> : vector<4x32xf32>
    %266 = tpu.matmul %265, %256, %cst_251 {dimension_numbers = #tpu.dot_dimension_numbers<[1], [0], [0], [1], [0, 0, 1, 1], [], []>} : vector<4x4xbf16>, vector<4x32xbf16>, vector<4x32xf32> -> vector<4x32xf32>
    %267 = arith.truncf %266 : vector<4x32xf32> to vector<4x32xbf16>
    %c1_252 = arith.constant 1 : index
    %c0_253 = arith.constant 0 : index
    %c0_254 = arith.constant 0 : index
    %268 = vector.load %arg15[%c1_252, %c0_253, %c0_254] : memref<9x32x32xbf16, #tpu.memory_space<vmem>>, vector<1x32x32xbf16>
    %269 = vector.shape_cast %268 : vector<1x32x32xbf16> to vector<32x32xbf16>
    %cst_255 = arith.constant dense<0.000000e+00> : vector<4x32xf32>
    %270 = tpu.matmul %267, %269, %cst_255 {dimension_numbers = #tpu.dot_dimension_numbers<[1], [0], [0], [1], [0, 0, 1, 1], [], []>} : vector<4x32xbf16>, vector<32x32xbf16>, vector<4x32xf32> -> vector<4x32xf32>
    %271 = arith.addf %263, %270 : vector<4x32xf32>
    %c2_256 = arith.constant 2 : index
    %c0_257 = arith.constant 0 : index
    %c0_258 = arith.constant 0 : index
    %272 = vector.load %arg14[%c2_256, %c0_257, %c0_258] : memref<9x4x4xbf16, #tpu.memory_space<vmem>>, vector<1x4x4xbf16>
    %273 = vector.shape_cast %272 : vector<1x4x4xbf16> to vector<4x4xbf16>
    %cst_259 = arith.constant dense<0.000000e+00> : vector<4x32xf32>
    %274 = tpu.matmul %273, %256, %cst_259 {dimension_numbers = #tpu.dot_dimension_numbers<[1], [0], [0], [1], [0, 0, 1, 1], [], []>} : vector<4x4xbf16>, vector<4x32xbf16>, vector<4x32xf32> -> vector<4x32xf32>
    %275 = arith.truncf %274 : vector<4x32xf32> to vector<4x32xbf16>
    %c2_260 = arith.constant 2 : index
    %c0_261 = arith.constant 0 : index
    %c0_262 = arith.constant 0 : index
    %276 = vector.load %arg15[%c2_260, %c0_261, %c0_262] : memref<9x32x32xbf16, #tpu.memory_space<vmem>>, vector<1x32x32xbf16>
    %277 = vector.shape_cast %276 : vector<1x32x32xbf16> to vector<32x32xbf16>
    %cst_263 = arith.constant dense<0.000000e+00> : vector<4x32xf32>
    %278 = tpu.matmul %275, %277, %cst_263 {dimension_numbers = #tpu.dot_dimension_numbers<[1], [0], [0], [1], [0, 0, 1, 1], [], []>} : vector<4x32xbf16>, vector<32x32xbf16>, vector<4x32xf32> -> vector<4x32xf32>
    %279 = arith.addf %271, %278 : vector<4x32xf32>
    %c3_264 = arith.constant 3 : index
    %c0_265 = arith.constant 0 : index
    %c0_266 = arith.constant 0 : index
    %280 = vector.load %arg14[%c3_264, %c0_265, %c0_266] : memref<9x4x4xbf16, #tpu.memory_space<vmem>>, vector<1x4x4xbf16>
    %281 = vector.shape_cast %280 : vector<1x4x4xbf16> to vector<4x4xbf16>
    %cst_267 = arith.constant dense<0.000000e+00> : vector<4x32xf32>
    %282 = tpu.matmul %281, %256, %cst_267 {dimension_numbers = #tpu.dot_dimension_numbers<[1], [0], [0], [1], [0, 0, 1, 1], [], []>} : vector<4x4xbf16>, vector<4x32xbf16>, vector<4x32xf32> -> vector<4x32xf32>
    %283 = arith.truncf %282 : vector<4x32xf32> to vector<4x32xbf16>
    %c3_268 = arith.constant 3 : index
    %c0_269 = arith.constant 0 : index
    %c0_270 = arith.constant 0 : index
    %284 = vector.load %arg15[%c3_268, %c0_269, %c0_270] : memref<9x32x32xbf16, #tpu.memory_space<vmem>>, vector<1x32x32xbf16>
    %285 = vector.shape_cast %284 : vector<1x32x32xbf16> to vector<32x32xbf16>
    %cst_271 = arith.constant dense<0.000000e+00> : vector<4x32xf32>
    %286 = tpu.matmul %283, %285, %cst_271 {dimension_numbers = #tpu.dot_dimension_numbers<[1], [0], [0], [1], [0, 0, 1, 1], [], []>} : vector<4x32xbf16>, vector<32x32xbf16>, vector<4x32xf32> -> vector<4x32xf32>
    %287 = arith.addf %279, %286 : vector<4x32xf32>
    %c4_272 = arith.constant 4 : index
    %c0_273 = arith.constant 0 : index
    %c0_274 = arith.constant 0 : index
    %288 = vector.load %arg14[%c4_272, %c0_273, %c0_274] : memref<9x4x4xbf16, #tpu.memory_space<vmem>>, vector<1x4x4xbf16>
    %289 = vector.shape_cast %288 : vector<1x4x4xbf16> to vector<4x4xbf16>
    %cst_275 = arith.constant dense<0.000000e+00> : vector<4x32xf32>
    %290 = tpu.matmul %289, %256, %cst_275 {dimension_numbers = #tpu.dot_dimension_numbers<[1], [0], [0], [1], [0, 0, 1, 1], [], []>} : vector<4x4xbf16>, vector<4x32xbf16>, vector<4x32xf32> -> vector<4x32xf32>
    %291 = arith.truncf %290 : vector<4x32xf32> to vector<4x32xbf16>
    %c4_276 = arith.constant 4 : index
    %c0_277 = arith.constant 0 : index
    %c0_278 = arith.constant 0 : index
    %292 = vector.load %arg15[%c4_276, %c0_277, %c0_278] : memref<9x32x32xbf16, #tpu.memory_space<vmem>>, vector<1x32x32xbf16>
    %293 = vector.shape_cast %292 : vector<1x32x32xbf16> to vector<32x32xbf16>
    %cst_279 = arith.constant dense<0.000000e+00> : vector<4x32xf32>
    %294 = tpu.matmul %291, %293, %cst_279 {dimension_numbers = #tpu.dot_dimension_numbers<[1], [0], [0], [1], [0, 0, 1, 1], [], []>} : vector<4x32xbf16>, vector<32x32xbf16>, vector<4x32xf32> -> vector<4x32xf32>
    %295 = arith.addf %287, %294 : vector<4x32xf32>
    %c5_280 = arith.constant 5 : index
    %c0_281 = arith.constant 0 : index
    %c0_282 = arith.constant 0 : index
    %296 = vector.load %arg14[%c5_280, %c0_281, %c0_282] : memref<9x4x4xbf16, #tpu.memory_space<vmem>>, vector<1x4x4xbf16>
    %297 = vector.shape_cast %296 : vector<1x4x4xbf16> to vector<4x4xbf16>
    %cst_283 = arith.constant dense<0.000000e+00> : vector<4x32xf32>
    %298 = tpu.matmul %297, %256, %cst_283 {dimension_numbers = #tpu.dot_dimension_numbers<[1], [0], [0], [1], [0, 0, 1, 1], [], []>} : vector<4x4xbf16>, vector<4x32xbf16>, vector<4x32xf32> -> vector<4x32xf32>
    %299 = arith.truncf %298 : vector<4x32xf32> to vector<4x32xbf16>
    %c5_284 = arith.constant 5 : index
    %c0_285 = arith.constant 0 : index
    %c0_286 = arith.constant 0 : index
    %300 = vector.load %arg15[%c5_284, %c0_285, %c0_286] : memref<9x32x32xbf16, #tpu.memory_space<vmem>>, vector<1x32x32xbf16>
    %301 = vector.shape_cast %300 : vector<1x32x32xbf16> to vector<32x32xbf16>
    %cst_287 = arith.constant dense<0.000000e+00> : vector<4x32xf32>
    %302 = tpu.matmul %299, %301, %cst_287 {dimension_numbers = #tpu.dot_dimension_numbers<[1], [0], [0], [1], [0, 0, 1, 1], [], []>} : vector<4x32xbf16>, vector<32x32xbf16>, vector<4x32xf32> -> vector<4x32xf32>
    %303 = arith.addf %295, %302 : vector<4x32xf32>
    %c6_288 = arith.constant 6 : index
    %c0_289 = arith.constant 0 : index
    %c0_290 = arith.constant 0 : index
    %304 = vector.load %arg14[%c6_288, %c0_289, %c0_290] : memref<9x4x4xbf16, #tpu.memory_space<vmem>>, vector<1x4x4xbf16>
    %305 = vector.shape_cast %304 : vector<1x4x4xbf16> to vector<4x4xbf16>
    %cst_291 = arith.constant dense<0.000000e+00> : vector<4x32xf32>
    %306 = tpu.matmul %305, %256, %cst_291 {dimension_numbers = #tpu.dot_dimension_numbers<[1], [0], [0], [1], [0, 0, 1, 1], [], []>} : vector<4x4xbf16>, vector<4x32xbf16>, vector<4x32xf32> -> vector<4x32xf32>
    %307 = arith.truncf %306 : vector<4x32xf32> to vector<4x32xbf16>
    %c6_292 = arith.constant 6 : index
    %c0_293 = arith.constant 0 : index
    %c0_294 = arith.constant 0 : index
    %308 = vector.load %arg15[%c6_292, %c0_293, %c0_294] : memref<9x32x32xbf16, #tpu.memory_space<vmem>>, vector<1x32x32xbf16>
    %309 = vector.shape_cast %308 : vector<1x32x32xbf16> to vector<32x32xbf16>
    %cst_295 = arith.constant dense<0.000000e+00> : vector<4x32xf32>
    %310 = tpu.matmul %307, %309, %cst_295 {dimension_numbers = #tpu.dot_dimension_numbers<[1], [0], [0], [1], [0, 0, 1, 1], [], []>} : vector<4x32xbf16>, vector<32x32xbf16>, vector<4x32xf32> -> vector<4x32xf32>
    %311 = arith.addf %303, %310 : vector<4x32xf32>
    %c7_296 = arith.constant 7 : index
    %c0_297 = arith.constant 0 : index
    %c0_298 = arith.constant 0 : index
    %312 = vector.load %arg14[%c7_296, %c0_297, %c0_298] : memref<9x4x4xbf16, #tpu.memory_space<vmem>>, vector<1x4x4xbf16>
    %313 = vector.shape_cast %312 : vector<1x4x4xbf16> to vector<4x4xbf16>
    %cst_299 = arith.constant dense<0.000000e+00> : vector<4x32xf32>
    %314 = tpu.matmul %313, %256, %cst_299 {dimension_numbers = #tpu.dot_dimension_numbers<[1], [0], [0], [1], [0, 0, 1, 1], [], []>} : vector<4x4xbf16>, vector<4x32xbf16>, vector<4x32xf32> -> vector<4x32xf32>
    %315 = arith.truncf %314 : vector<4x32xf32> to vector<4x32xbf16>
    %c7_300 = arith.constant 7 : index
    %c0_301 = arith.constant 0 : index
    %c0_302 = arith.constant 0 : index
    %316 = vector.load %arg15[%c7_300, %c0_301, %c0_302] : memref<9x32x32xbf16, #tpu.memory_space<vmem>>, vector<1x32x32xbf16>
    %317 = vector.shape_cast %316 : vector<1x32x32xbf16> to vector<32x32xbf16>
    %cst_303 = arith.constant dense<0.000000e+00> : vector<4x32xf32>
    %318 = tpu.matmul %315, %317, %cst_303 {dimension_numbers = #tpu.dot_dimension_numbers<[1], [0], [0], [1], [0, 0, 1, 1], [], []>} : vector<4x32xbf16>, vector<32x32xbf16>, vector<4x32xf32> -> vector<4x32xf32>
    %319 = arith.addf %311, %318 : vector<4x32xf32>
    %c8_304 = arith.constant 8 : index
    %c0_305 = arith.constant 0 : index
    %c0_306 = arith.constant 0 : index
    %320 = vector.load %arg14[%c8_304, %c0_305, %c0_306] : memref<9x4x4xbf16, #tpu.memory_space<vmem>>, vector<1x4x4xbf16>
    %321 = vector.shape_cast %320 : vector<1x4x4xbf16> to vector<4x4xbf16>
    %cst_307 = arith.constant dense<0.000000e+00> : vector<4x32xf32>
    %322 = tpu.matmul %321, %256, %cst_307 {dimension_numbers = #tpu.dot_dimension_numbers<[1], [0], [0], [1], [0, 0, 1, 1], [], []>} : vector<4x4xbf16>, vector<4x32xbf16>, vector<4x32xf32> -> vector<4x32xf32>
    %323 = arith.truncf %322 : vector<4x32xf32> to vector<4x32xbf16>
    %c8_308 = arith.constant 8 : index
    %c0_309 = arith.constant 0 : index
    %c0_310 = arith.constant 0 : index
    %324 = vector.load %arg15[%c8_308, %c0_309, %c0_310] : memref<9x32x32xbf16, #tpu.memory_space<vmem>>, vector<1x32x32xbf16>
    %325 = vector.shape_cast %324 : vector<1x32x32xbf16> to vector<32x32xbf16>
    %cst_311 = arith.constant dense<0.000000e+00> : vector<4x32xf32>
    %326 = tpu.matmul %323, %325, %cst_311 {dimension_numbers = #tpu.dot_dimension_numbers<[1], [0], [0], [1], [0, 0, 1, 1], [], []>} : vector<4x32xbf16>, vector<32x32xbf16>, vector<4x32xf32> -> vector<4x32xf32>
    %327 = arith.addf %319, %326 : vector<4x32xf32>
    %c0_312 = arith.constant 0 : index
    %c0_313 = arith.constant 0 : index
    %328 = vector.load %arg16[%c0_312, %c0_313] : memref<1x32xf32, #tpu.memory_space<vmem>>, vector<1x32xf32>
    %329 = vector.broadcast %328 : vector<1x32xf32> to vector<4x32xf32>
    %330 = arith.addf %327, %329 : vector<4x32xf32>
    %c0_314 = arith.constant 0 : index
    %c0_315 = arith.constant 0 : index
    %331 = vector.load %arg17[%c0_314, %c0_315] : memref<4x16xbf16, #tpu.memory_space<vmem>>, vector<4x16xbf16>
    %332 = arith.truncf %178 : vector<16x16xf32> to vector<16x16xbf16>
    %cst_316 = arith.constant dense<0.000000e+00> : vector<4x16xf32>
    %333 = tpu.matmul %331, %332, %cst_316 {dimension_numbers = #tpu.dot_dimension_numbers<[1], [0], [0], [1], [0, 0, 1, 1], [], []>} : vector<4x16xbf16>, vector<16x16xbf16>, vector<4x16xf32> -> vector<4x16xf32>
    %334 = arith.truncf %333 : vector<4x16xf32> to vector<4x16xbf16>
    %c0_317 = arith.constant 0 : index
    %c0_318 = arith.constant 0 : index
    %335 = vector.load %arg18[%c0_317, %c0_318] : memref<16x32xbf16, #tpu.memory_space<vmem>>, vector<16x32xbf16>
    %cst_319 = arith.constant dense<0.000000e+00> : vector<4x32xf32>
    %336 = tpu.matmul %334, %335, %cst_319 {dimension_numbers = #tpu.dot_dimension_numbers<[1], [0], [0], [1], [0, 0, 1, 1], [], []>} : vector<4x16xbf16>, vector<16x32xbf16>, vector<4x32xf32> -> vector<4x32xf32>
    %c0_320 = arith.constant 0 : index
    %c0_321 = arith.constant 0 : index
    %337 = vector.load %arg19[%c0_320, %c0_321] : memref<1x32xf32, #tpu.memory_space<vmem>>, vector<1x32xf32>
    %338 = vector.broadcast %337 : vector<1x32xf32> to vector<4x32xf32>
    %339 = arith.addf %336, %338 : vector<4x32xf32>
    %340 = arith.addf %330, %339 : vector<4x32xf32>
    %cst_322 = arith.constant 0.000000e+00 : f32
    %341 = vector.broadcast %cst_322 : f32 to vector<4x32xf32>
    %342 = arith.maximumf %340, %341 : vector<4x32xf32>
    %cst_323 = arith.constant dense<0.000000e+00> : vector<32xf32>
    %343 = vector.multi_reduction <add>, %342, %cst_323 [0] : vector<4x32xf32> to vector<32xf32>
    %344 = vector.shape_cast %343 : vector<32xf32> to vector<1x32xf32>
    %cst_324 = arith.constant 2.500000e-01 : f32
    %345 = vector.broadcast %cst_324 : f32 to vector<1x32xf32>
    %346 = arith.mulf %344, %345 : vector<1x32xf32>
    %c0_325 = arith.constant 0 : index
    %c0_326 = arith.constant 0 : index
    %347 = vector.load %arg20[%c0_325, %c0_326] : memref<32x128xf32, #tpu.memory_space<vmem>>, vector<32x128xf32>
    %cst_327 = arith.constant dense<0.000000e+00> : vector<1x128xf32>
    %348 = tpu.matmul %346, %347, %cst_327 {dimension_numbers = #tpu.dot_dimension_numbers<[1], [0], [0], [1], [0, 0, 1, 1], [], []>} : vector<1x32xf32>, vector<32x128xf32>, vector<1x128xf32> -> vector<1x128xf32>
    %c0_328 = arith.constant 0 : index
    %c0_329 = arith.constant 0 : index
    %349 = vector.load %arg21[%c0_328, %c0_329] : memref<1x128xf32, #tpu.memory_space<vmem>>, vector<1x128xf32>
    %350 = arith.addf %348, %349 : vector<1x128xf32>
    %c0_330 = arith.constant 0 : index
    %c0_331 = arith.constant 0 : index
    %c0_332 = arith.constant 0 : index
    %351 = vector.load %arg22[%c0_330, %c0_331, %c0_332] : memref<1x1x128xf32, #tpu.memory_space<vmem>>, vector<1x1x128xf32>
    %352 = vector.shape_cast %351 : vector<1x1x128xf32> to vector<1x128xf32>
    %353 = vector.shape_cast %350 : vector<1x128xf32> to vector<1x1x128xf32>
    tpu.vector_store %arg22[%c0_330, %c0_331, %c0_332], %353 {strides = array<i32>} : memref<1x1x128xf32, #tpu.memory_space<vmem>>, vector<1x1x128xf32>,
    return
  }
  func.func @transform_0(%arg0: i32) -> (i32, i32, i32) {
    %c0_i32 = arith.constant 0 : i32
    %c0_i32_0 = arith.constant 0 : i32
    %c0_i32_1 = arith.constant 0 : i32
    return %arg0, %c0_i32, %c0_i32_0 : i32, i32, i32
  }
  func.func @transform_1(%arg0: i32) -> (i32, i32) {
    %c0_i32 = arith.constant 0 : i32
    %c0_i32_0 = arith.constant 0 : i32
    %c0_i32_1 = arith.constant 0 : i32
    return %c0_i32, %c0_i32_0 : i32, i32
  }
  func.func @transform_2(%arg0: i32) -> (i32, i32) {
    %c0_i32 = arith.constant 0 : i32
    %c0_i32_0 = arith.constant 0 : i32
    %c0_i32_1 = arith.constant 0 : i32
    return %c0_i32, %c0_i32_0 : i32, i32
  }
  func.func @transform_3(%arg0: i32) -> (i32, i32, i32) {
    %c0_i32 = arith.constant 0 : i32
    %c0_i32_0 = arith.constant 0 : i32
    %c0_i32_1 = arith.constant 0 : i32
    %c0_i32_2 = arith.constant 0 : i32
    return %c0_i32, %c0_i32_0, %c0_i32_1 : i32, i32, i32
  }
  func.func @transform_4(%arg0: i32) -> (i32, i32, i32) {
    %c0_i32 = arith.constant 0 : i32
    %c0_i32_0 = arith.constant 0 : i32
    %c0_i32_1 = arith.constant 0 : i32
    %c0_i32_2 = arith.constant 0 : i32
    return %c0_i32, %c0_i32_0, %c0_i32_1 : i32, i32, i32
  }
  func.func @transform_5(%arg0: i32) -> (i32, i32, i32) {
    %c0_i32 = arith.constant 0 : i32
    %c0_i32_0 = arith.constant 0 : i32
    %c0_i32_1 = arith.constant 0 : i32
    %c0_i32_2 = arith.constant 0 : i32
    return %c0_i32, %c0_i32_0, %c0_i32_1 : i32, i32, i32
  }
  func.func @transform_6(%arg0: i32) -> (i32, i32) {
    %c0_i32 = arith.constant 0 : i32
    %c0_i32_0 = arith.constant 0 : i32
    %c0_i32_1 = arith.constant 0 : i32
    return %c0_i32, %c0_i32_0 : i32, i32
  }
  func.func @transform_7(%arg0: i32) -> (i32, i32, i32) {
    %c0_i32 = arith.constant 0 : i32
    %c0_i32_0 = arith.constant 0 : i32
    %c0_i32_1 = arith.constant 0 : i32
    %c0_i32_2 = arith.constant 0 : i32
    return %c0_i32, %c0_i32_0, %c0_i32_1 : i32, i32, i32
  }
  func.func @transform_8(%arg0: i32) -> (i32, i32, i32) {
    %c0_i32 = arith.constant 0 : i32
    %c0_i32_0 = arith.constant 0 : i32
    %c0_i32_1 = arith.constant 0 : i32
    %c0_i32_2 = arith.constant 0 : i32
    return %c0_i32, %c0_i32_0, %c0_i32_1 : i32, i32, i32
  }
  func.func @transform_9(%arg0: i32) -> (i32, i32) {
    %c0_i32 = arith.constant 0 : i32
    %c0_i32_0 = arith.constant 0 : i32
    %c0_i32_1 = arith.constant 0 : i32
    return %c0_i32, %c0_i32_0 : i32, i32
  }
  func.func @transform_10(%arg0: i32) -> (i32, i32, i32) {
    %c0_i32 = arith.constant 0 : i32
    %c0_i32_0 = arith.constant 0 : i32
    %c0_i32_1 = arith.constant 0 : i32
    %c0_i32_2 = arith.constant 0 : i32
    return %c0_i32, %c0_i32_0, %c0_i32_1 : i32, i32, i32
  }
  func.func @transform_11(%arg0: i32) -> (i32, i32, i32) {
    %c0_i32 = arith.constant 0 : i32
    %c0_i32_0 = arith.constant 0 : i32
    %c0_i32_1 = arith.constant 0 : i32
    %c0_i32_2 = arith.constant 0 : i32
    return %c0_i32, %c0_i32_0, %c0_i32_1 : i32, i32, i32
  }
  func.func @transform_12(%arg0: i32) -> (i32, i32) {
    %c0_i32 = arith.constant 0 : i32
    %c0_i32_0 = arith.constant 0 : i32
    %c0_i32_1 = arith.constant 0 : i32
    return %c0_i32, %c0_i32_0 : i32, i32
  }
  func.func @transform_13(%arg0: i32) -> (i32, i32, i32) {
    %c0_i32 = arith.constant 0 : i32
    %c0_i32_0 = arith.constant 0 : i32
    %c0_i32_1 = arith.constant 0 : i32
    %c0_i32_2 = arith.constant 0 : i32
    return %c0_i32, %c0_i32_0, %c0_i32_1 : i32, i32, i32
  }
  func.func @transform_14(%arg0: i32) -> (i32, i32, i32) {
    %c0_i32 = arith.constant 0 : i32
    %c0_i32_0 = arith.constant 0 : i32
    %c0_i32_1 = arith.constant 0 : i32
    %c0_i32_2 = arith.constant 0 : i32
    return %c0_i32, %c0_i32_0, %c0_i32_1 : i32, i32, i32
  }
  func.func @transform_15(%arg0: i32) -> (i32, i32) {
    %c0_i32 = arith.constant 0 : i32
    %c0_i32_0 = arith.constant 0 : i32
    %c0_i32_1 = arith.constant 0 : i32
    return %c0_i32, %c0_i32_0 : i32, i32
  }
  func.func @transform_16(%arg0: i32) -> (i32, i32) {
    %c0_i32 = arith.constant 0 : i32
    %c0_i32_0 = arith.constant 0 : i32
    %c0_i32_1 = arith.constant 0 : i32
    return %c0_i32, %c0_i32_0 : i32, i32
  }
  func.func @transform_17(%arg0: i32) -> (i32, i32) {
    %c0_i32 = arith.constant 0 : i32
    %c0_i32_0 = arith.constant 0 : i32
    %c0_i32_1 = arith.constant 0 : i32
    return %c0_i32, %c0_i32_0 : i32, i32
  }
  func.func @transform_18(%arg0: i32) -> (i32, i32) {
    %c0_i32 = arith.constant 0 : i32
    %c0_i32_0 = arith.constant 0 : i32
    %c0_i32_1 = arith.constant 0 : i32
    return %c0_i32, %c0_i32_0 : i32, i32
  }
  func.func @transform_19(%arg0: i32) -> (i32, i32) {
    %c0_i32 = arith.constant 0 : i32
    %c0_i32_0 = arith.constant 0 : i32
    %c0_i32_1 = arith.constant 0 : i32
    return %c0_i32, %c0_i32_0 : i32, i32
  }
  func.func @transform_20(%arg0: i32) -> (i32, i32) {
    %c0_i32 = arith.constant 0 : i32
    %c0_i32_0 = arith.constant 0 : i32
    %c0_i32_1 = arith.constant 0 : i32
    return %c0_i32, %c0_i32_0 : i32, i32
  }
  func.func @transform_21(%arg0: i32) -> (i32, i32, i32) {
    %c0_i32 = arith.constant 0 : i32
    %c0_i32_0 = arith.constant 0 : i32
    %c0_i32_1 = arith.constant 0 : i32
    return %arg0, %c0_i32, %c0_i32_0 : i32, i32, i32
  }
}

</mosaic_0001>

<bundles_post_ra>
// kernel: forward.1
= control target key start
LH: loop header
LB: loop body
LE: loop exit
PB: predicated region body
PF: predicated region fallthrough
CT: control target
= control target key end

     0   :  { %s7695_s0 = inlined_call_operand.vmem [shape: bf16[2,64,256], index: 0, kind: input, shape index: {}]   ;;  %s7696_s1 = inlined_call_operand.vmem [shape: bf16[256,16], index: 1, kind: input, shape index: {}]   ;;  %s7697_s2 = inlined_call_operand.vmem [shape: f32[1,16], index: 2, kind: input, shape index: {}]   ;;  %s7698_s3 = inlined_call_operand.vmem [shape: f32[4,16,64], index: 3, kind: input, shape index: {}]   ;;  %s7699_s4 = inlined_call_operand.vmem [shape: bf16[9,16,16], index: 4, kind: input, shape index: {}, may-alias: {4,7}]   ;;  %s7700_s5 = inlined_call_operand.vmem [shape: bf16[9,16,16], index: 5, kind: input, shape index: {}]   ;;  %s7701_s6 = inlined_call_operand.vmem [shape: f32[1,16], index: 6, kind: input, shape index: {}]   ;;  %s7702_s7 = inlined_call_operand.vmem [shape: bf16[9,16,16], index: 7, kind: input, shape index: {}, may-alias: {4,7}]   ;;  %s7703_s8 = inlined_call_operand.vmem [shape: bf16[9,16,16], index: 8, kind: input, shape index: {}]   ;;  %s7704_s9 = inlined_call_operand.vmem [shape: f32[1,16], index: 9, kind: input, shape index: {}]   ;;  %s7705_s10 = inlined_call_operand.vmem [shape: bf16[9,4,16], index: 10, kind: input, shape index: {}]   ;;  %s7706_s11 = inlined_call_operand.vmem [shape: bf16[9,16,32], index: 11, kind: input, shape index: {}]   ;;  %s7707_s12 = inlined_call_operand.vmem [shape: f32[1,32], index: 12, kind: input, shape index: {}]   ;;  %s7708_s13 = inlined_call_operand.vmem [shape: bf16[9,4,4], index: 13, kind: input, shape index: {}]   ;;  %s7709_s14 = inlined_call_operand.vmem [shape: bf16[9,32,32], index: 14, kind: input, shape index: {}]   ;;  %s7710_s15 = inlined_call_operand.vmem [shape: f32[1,32], index: 15, kind: input, shape index: {}]   ;;  %s7711_s16 = inlined_call_operand.vmem [shape: bf16[4,16], index: 16, kind: input, shape index: {}]   ;;  %s7712_s17 = inlined_call_operand.vmem [shape: bf16[16,32], index: 17, kind: input, shape index: {}]   ;;  %s7713_s18 = inlined_call_operand.vmem [shape: f32[1,32], index: 18, kind: input, shape index: {}]   ;;  %s7714_s19 = inlined_call_operand.vmem [shape: f32[32,128], index: 19, kind: input, shape index: {}]   ;;  %s7715_s20 = inlined_call_operand.vmem [shape: f32[1,128], index: 20, kind: input, shape index: {}]   ;;  %s7716_s21 = inlined_call_operand.hbm [shape: f32[2,1,128], index: 21, kind: output, shape index: {}]  }
   0x1   :  { %7730 = sst [smem:[#allocation11_spill]] %s7695_s0 }
   0x2   :  { %7731 = sst [smem:[#allocation12_spill]] %s7696_s1 }
   0x3   :  { %7732 = sst [smem:[#allocation13_spill]] %s7697_s2 }
   0x4   :  { %7733 = sst [smem:[#allocation14_spill]] %s7698_s3 }
   0x5   :  { %7734 = sst [smem:[#allocation15_spill]] %s7699_s4 }
   0x6   :  { %7735 = sst [smem:[#allocation16_spill]] %s7700_s5 }
   0x7   :  { %7736 = sst [smem:[#allocation17_spill]] %s7701_s6 }
   0x8   :  { %7737 = sst [smem:[#allocation18_spill]] %s7716_s21 }
   0x9   :  { %26 = vsyncpa [#allocation3], 0 }
   0xa   :  { %28 = vsyncpa [#allocation3 + $0x1], 0  ;;  %s6876_s2 = smov 0   ;;  %s6878_s25 = smov 0  }
   0xb   :  { %s6880_s26 = smov 0   ;;  %s6882_s27 = smov 0  }
   0xc LB: > { %7738 = sst [smem:[#allocation5_spill]] %s6748_s2  ;;  %s6897_s3 = sadd.s32 4294967295, %s6760_s27   ;;  %s6760_s27 = sphi %s6882_s27, %s7758_s27   ;;  %s6756_s26 = sphi %s6880_s26, %s7760_s26   ;;  %s6752_s25 = sphi %s6878_s25, %s7762_s25   ;;  %s6748_s2 = sphi %s6876_s2, %s7761_s2  }
   0xd   : > { %7739 = sst [smem:[#allocation6_spill]] %s6756_s26  ;;  %s5344_s28 = sadd.s32 4294967294, %s6760_s27  }
   0xe   : > { %7740 = sst [smem:[#allocation7_spill]] %s6760_s27  ;;  %s6901_s29 = sadd.s32 1, %s6760_s27  }
   0xf   : > { %7741 = sst [smem:[#allocation8_spill]] %s6901_s29  ;;  %s487_s0 = sadd.s32 1, %s6756_s26 }
  0x10   : > { %s484_s4 = ssub.s32 %s6760_s27, %s6901_s29  ;;  %p497_p0 = scmp.ne.s32.totalorder %s6756_s26, %s6752_s25 }
  0x11   : > { %p485_p1 = scmp.eq.s32.totalorder %s484_s4, 0  ;;  %p498_p2 = scmp.eq.s32.totalorder %s6897_s3, 1 }
  0x12   : > { %p503_p3 = scmp.ne.s32.totalorder %s6752_s25, %s6748_s2  ;;  %p504_p4 = scmp.eq.s32.totalorder %s5344_s28, 1 }
  0x13   : > { %s6912_s30 = scalar_select %p485_p1, %s6756_s26, %s487_s0  }
  0x14   : > { %p6914_p5 = por %p498_p2, %p497_p0  ;;  %p6918_p6 = por %p504_p4, %p503_p3 }
  0x15   : > { %7742 = sst [smem:[#allocation9_spill]] %s6912_s30  ;;  %p5347_p7 = scmp.ge.s32.totalorder %s6760_s27, 1 }
  0x16   : > { %s7744_s22 = scalar_select %p6918_p6, 1, 0 }
  0x17   : > { %p590_p8 = scmp.lt.s32.totalorder %s6760_s27, 3 }
  0x18   : > { %7745 = sst [smem:[#allocation10_spill]] %s7744_s22 }
  0x19   : > { %p591_p9 = pnand %p5347_p7, %p590_p8 }
  0x1a   : > { %s7746_s24 = sld [smem:[#allocation12_spill]] (!%p591_p9)  ;;  %p649_p10 = scmp.lt.s32.totalorder (!%p591_p9), %s6897_s3, 1  ;;  %vm913_vm0 = vcmask (!%p591_p9), 523264   ;;  %vm6763_vm1 = vmmov (!%p591_p9), 0   ;;  %vm1261_vm2 = vcmask (!%p591_p9), 130048   ;;  %vm4115_vm3 = vcmask (!%p591_p9), 1041408  }
  0x1b   : > { %594 = sbr.rel (%p591_p9) target bundleno = 3287 (0xcd7), region = 104  ;;  %s7747_s28 = sld [smem:[#allocation11_spill]] (!%p591_p9)  ;;  %vm4111_vm4 = vcmask (!%p591_p9), 31744   ;;  %vm4227_vm5 = vcmask (!%p591_p9), 261120   ;;  %vm5188_vm6 = vcmask (!%p591_p9), 257024  }
  0x1c   : > { %s7748_s23 = sld [smem:[#allocation14_spill]] (!%p591_p9)  ;;  %s7750_s26 = sld [smem:[#allocation15_spill]] (!%p591_p9) }
  0x1d   : > { %s7752_s4 = sld [smem:[#allocation16_spill]] (!%p591_p9)  ;;  %s7753_s6 = sld [smem:[#allocation17_spill]] (!%p591_p9) }
  0x1e   : > { %s5661_s22 = sshll.u32 (!%p591_p9), %s6897_s3, 4  ;;  %s7754_s29 = sld [smem:[#allocation18_spill]] (!%p591_p9) }
  0x20   : > { %v6606_v0 = vld [vmem:[%s7746_s24 + $0x40] sm:$0xff] (!%p591_p9)   ;;  %v6608_v2 = vld [vmem:[%s7746_s24 + $0x48] sm:$0xff] (!%p591_p9)   ;;  %v6610_v4 = vld [vmem:[%s7746_s24 + $0x50] sm:$0xff] (!%p591_p9)  }
  0x21   : > { %v6607_v1 = vld [vmem:[%s7746_s24] sm:$0xff] (!%p591_p9)   ;;  %5665 = vmatprep.subr.bf16.mxu0 (!%p591_p9), %v6606_v0  ;;  %v6609_v3 = vld [vmem:[%s7746_s24 + $0x8] sm:$0xff] (!%p591_p9)   ;;  %v6611_v5 = vld [vmem:[%s7746_s24 + $0x10] sm:$0xff] (!%p591_p9)  }
  0x22   : > { %5666 = vmatpush3.bf16.msra.mxu0 %v6607_v1  ;;  %s650_s0 = scalar_select %p649_p10, %s6897_s3, 1  ;;  %v6612_v6 = vld [vmem:[%s7746_s24 + $0x58] sm:$0xff]   ;;  %v6614_v8 = vld [vmem:[%s7746_s24 + $0x60] sm:$0xff]   ;;  %v6616_v10 = vld [vmem:[%s7746_s24 + $0x68] sm:$0xff]  }
  0x23   : > { %5667 = vmatprep.subr.bf16.mxu0 %v6608_v2  ;;  %v6613_v7 = vld [vmem:[%s7746_s24 + $0x18] sm:$0xff]   ;;  %v6615_v9 = vld [vmem:[%s7746_s24 + $0x20] sm:$0xff]   ;;  %v6617_v12 = vld [vmem:[%s7746_s24 + $0x28] sm:$0xff]   ;;  %s6765_s3 = smov [#allocation2]  }
  0x24   : > { %s5664_s2 = sshll.u32 %s650_s0, 6  ;;  %v6618_v13 = vld [vmem:[%s7746_s24 + $0x70] sm:$0xff]   ;;  %v6620_v15 = vld [vmem:[%s7746_s24 + $0x78] sm:$0xff]   ;;  %v911_v24 = vld [vmem:[%s7748_s23] sm:$0xff]  ;;  %s7751_s0 = smov %s7750_s26 }
  0x25   : > { %s6956_s21 = scalar_lea.vmem %s7747_s28, %s5664_s2  ;;  %v6619_v14 = vld [vmem:[%s7746_s24 + $0x30] sm:$0xff]   ;;  %v6621_v16 = vld [vmem:[%s7746_s24 + $0x38] sm:$0xff]   ;;  %5923 = vmatprep.mubr.msk.f32.mxu1 %vm913_vm0, %v911_v24  ;;  %s7749_s28 = sld [smem:[#allocation13_spill]] }
  0x26   : > { %5668 = vmatpush3.bf16.msra.mxu0 %v6609_v3  ;;  %v6624_v11 = vld [vmem:[%s6956_s21 + $0x4] ss:$8 sps:$4 sm:$0xff]   ;;  %v6622_v17 = vld [vmem:[%s6956_s21] ss:$8 sps:$4 sm:$0xff]   ;;  %v6625_v18 = vld [vmem:[%s6956_s21 + $0x14] ss:$8 sps:$4 sm:$0xff]  }
  0x27   : > { %5669 = vmatprep.subr.bf16.mxu0 %v6610_v4  ;;  %870 = vmatprep.mubr.bf16.mxu0 %v6624_v11  ;;  %v6627_v19 = vld [vmem:[%s6956_s21 + $0x10] ss:$8 sps:$4 sm:$0xff]   ;;  %v6628_v20 = vld [vmem:[%s6956_s21 + $0x24] ss:$8 sps:$4 sm:$0xff]   ;;  %v6630_v21 = vld [vmem:[%s6956_s21 + $0x20] ss:$8 sps:$4 sm:$0xff]  }
  0x28   : > { %v6631_v22 = vld [vmem:[%s6956_s21 + $0x34] ss:$8 sps:$4 sm:$0xff]   ;;  %v6633_v23 = vld [vmem:[%s6956_s21 + $0x30] ss:$8 sps:$4 sm:$0xff]   ;;  %v5381_v11 = vld [vmem:[%s7748_s23 + $0x20] sm:$0xff]  ;;  %s647_s2 = sand.u32 1, %s6752_s25  }
  0x29   : > { %v5385_v25 = vld [vmem:[%s7748_s23 + $0x30] sm:$0xff]  ;;  %s6702_s1 = sshll.u32 %s6765_s3, 4  ;;  %s6703_s1 = int_to_ptr.vmem [resolvable:$false] %s6702_s1 }
  0x2a   : > { %5670 = vmatpush3.bf16.msra.mxu0 %v6611_v5 }
  0x2b   : > { %5671 = vmatprep.subr.bf16.mxu0 %v6612_v6  ;;  %v5350_v27 = vld [vmem:[%s7749_s28] ss:$0 sm:$0xff]  ;;  %s648_s28 = scalar_lea.vmem [#allocation2], %s647_s2 }
  0x2c   : > { %s5289_s21 = sshll.u32 %s648_s28, 4  ;;  %s7655_s21 = int_to_ptr.vmem [resolvable:$true] %s5289_s21 }
  0x2d   : > { %s6698_s27 = scalar_lea.vmem %s7655_s21, 16  ;;  %p6705_p0 = scmp.lt.s32.totalorder %s7655_s21, %s6703_s1 }
  0x2e   : > { %5672 = vmatpush3.bf16.msra.mxu0 %v6613_v7  ;;  %v912_v7 = vld [vmem:[%s7748_s23 + $0x8] sm:$0xff]  ;;  %p6699_p11 = scmp.ne.s32.totalorder %s7655_s21, %s6698_s27 }
  0x2f   : > { %5673 = vmatprep.subr.bf16.mxu0 %v6614_v8  ;;  %v5386_v8 = vld [vmem:[%s7748_s23 + $0x38] sm:$0xff] }
  0x30   : > { %p6700_p12 = pnand %p6699_p11, %p6914_p5 }
  0x32   : > { %5674 = vmatpush3.bf16.msra.mxu0 %v6615_v9  ;;  %v5377_v9 = vld [vmem:[%s7748_s23 + $0x10] sm:$0xff]  ;;  %p6701_p13 = pneg %p6700_p12 }
  0x33   : > { %5675 = vmatprep.subr.bf16.mxu0 %v6616_v10  ;;  %v5378_v10 = vld [vmem:[%s7748_s23 + $0x18] sm:$0xff] }
  0x36   : > { %5676 = vmatpush3.bf16.msra.mxu0 %v6617_v12  ;;  %v5382_v12 = vld [vmem:[%s7748_s23 + $0x28] sm:$0xff] }
  0x37   : > { %5677 = vmatprep.subr.bf16.mxu0 %v6618_v13  ;;  %v6762_v13 = vmov 0.0  }
  0x3a   : > { %5678 = vmatpush3.bf16.msra.mxu0 %v6619_v14 }
  0x3b   : > { %5679 = vmatprep.subr.bf16.mxu0 %v6620_v15 }
  0x3e   : > { %5680 = vmatpush3.bf16.msra.mxu0 %v6621_v16 }
  0x41   : > { %871 = vmatmul.mubr.bf16.vlgmr.msra.gmra.mrb[0].mxu0 %v6622_v17 }
  0x42   : > { %878 = vmatprep.mubr.bf16.mxu0 %v6625_v18 }
  0x49   : > { %879 = vmatmul.mubr.bf16.gmra.mrb[4].mxu0 %v6627_v19 }
  0x4a   : > { %886 = vmatprep.mubr.bf16.mxu0 %v6628_v20 }
  0x51   : > { %887 = vmatmul.mubr.bf16.gmra.mrb[8].mxu0 %v6630_v21 }
  0x52   : > { %894 = vmatprep.mubr.bf16.mxu0 %v6631_v22 }
  0x59   : > { %895 = vmatmul.mubr.bf16.gmra.mrb[12].mxu0 %v6633_v23 }
  0x5a   : > { %5980 = vmatprep.mubr.msk.f32.mxu0 %vm913_vm0, %v5385_v25 }
 0x114   : > { %v5681_v26 = vpop.f32.mrb[0].mxu0 }
 0x115   : > { %v5682_v28 = vpop.f32.mrb[1].mxu0 }
 0x116   : > { %v5683_v29 = vadd.f32 %v5682_v28, %v5681_v26  ;;  %v5684_v30 = vpop.f32.mrb[2].mxu0 }
 0x117   : > { %v5685_v31 = vpop.f32.mrb[3].mxu0 }
 0x118   : > { %v873_v32 = vadd.f32 %v5683_v29, %v5350_v27  ;;  %v5686_v33 = vadd.f32 %v5685_v31, %v5684_v30  ;;  %v6634_v29 = vld [vmem:[%s7750_s26] sm:$0xff]   ;;  %v6635_v30 = vld [vmem:[%s7751_s0 + $0x10] sm:$0xff]   ;;  %v6636_v31 = vld [vmem:[%s7751_s0 + $0x8] sm:$0xff]  }
 0x11a   : > { %v876_v34 = vadd.f32 %v5686_v33, %v5350_v27  ;;  %v903_v35 = vmax.f32 %v873_v32, 0.0  ;;  %v6637_v32 = vld [vmem:[%s7751_s0 + $0x18] sm:$0xff]   ;;  %v6638_v33 = vld [vmem:[%s7751_s0 + $0x20] sm:$0xff]  }
 0x11c   : > { %v904_v36 = vmax.f32 %v876_v34, 0.0  ;;  %v5687_v37 = vpop.f32.mrb[4].mxu0  ;;  %v6639_v34 = vld [vmem:[%s7751_s0 + $0x28] sm:$0xff]  }
 0x11d   : > { %v5688_v38 = vpop.f32.mrb[5].mxu0 }
 0x11e   : > { %v6998_v39 = vpack.c.bf16 %v904_v36, %v903_v35  ;;  %v5689_v40 = vadd.f32 %v5688_v38, %v5687_v37  ;;  %v5690_v41 = vpop.f32.mrb[6].mxu0  ;;  %v6640_v35 = vld [vmem:[%s7751_s0 + $0x30] sm:$0xff]   ;;  %v6641_v36 = vld [vmem:[%s7751_s0 + $0x38] sm:$0xff]   ;;  %v6642_v37 = vld [vmem:[%s7751_s0 + $0x40] sm:$0xff]   ;;  %s7653_s0 = scalar_lea.hbm %s7754_s29, %s5661_s22 }
 0x11f   : > { %v5691_v42 = vpop.f32.mrb[7].mxu0  ;;  %v6643_v38 = vld [vmem:[%s7752_s4 + $0x8] sm:$0xff]  }
 0x120   : > { %v881_v43 = vadd.f32 %v5689_v40, %v5350_v27  ;;  %v5692_v44 = vadd.f32 %v5691_v42, %v5690_v41  ;;  %6457 = vmatprep.subr.bf16.mxu1 %v6998_v39  ;;  %6505 = vmatprep.subr.bf16.mxu0 %v6998_v39 }
 0x121   : > { %6459 = vmatpush3.bf16.msra.mxu1 %v6998_v39  ;;  %6507 = vmatpush3.bf16.msra.mxu0 %v6998_v39 }
 0x122   : > { %v884_v45 = vadd.f32 %v5692_v44, %v5350_v27  ;;  %v905_v46 = vmax.f32 %v881_v43, 0.0 }
 0x124   : > { %v906_v47 = vmax.f32 %v884_v45, 0.0  ;;  %v5693_v48 = vpop.f32.mrb[8].mxu0 }
 0x125   : > { %v5694_v49 = vpop.f32.mrb[9].mxu0 }
 0x126   : > { %v6460_v50 = vpack.c.bf16 %v906_v47, %v905_v46  ;;  %v5695_v51 = vadd.f32 %v5694_v49, %v5693_v48  ;;  %v5696_v52 = vpop.f32.mrb[10].mxu0 }
 0x127   : > { %v5697_v53 = vpop.f32.mrb[11].mxu0 }
 0x128   : > { %v889_v54 = vadd.f32 %v5695_v51, %v5350_v27  ;;  %v5698_v55 = vadd.f32 %v5697_v53, %v5696_v52  ;;  %6461 = vmatprep.subr.bf16.mxu1 %v6460_v50  ;;  %6509 = vmatprep.subr.bf16.mxu0 %v6460_v50 }
 0x129   : > { %6463 = vmatpush3.bf16.msra.mxu1 %v6460_v50  ;;  %6511 = vmatpush3.bf16.msra.mxu0 %v6460_v50 }
 0x12a   : > { %v892_v56 = vadd.f32 %v5698_v55, %v5350_v27  ;;  %v907_v57 = vmax.f32 %v889_v54, 0.0  ;;  %v6644_v54 = vld [vmem:[%s7752_s4] sm:$0xff]  }
 0x12c   : > { %v908_v58 = vmax.f32 %v892_v56, 0.0  ;;  %v5699_v59 = vpop.f32.mrb[12].mxu0 }
 0x12d   : > { %v5700_v60 = vpop.f32.mrb[13].mxu0 }
 0x12e   : > { %v6464_v61 = vpack.c.bf16 %v908_v58, %v907_v57  ;;  %v5701_v62 = vadd.f32 %v5700_v60, %v5699_v59  ;;  %v5702_v63 = vpop.f32.mrb[14].mxu0 }
 0x12f   : > { %v5703_v0 = vpop.f32.mrb[15].mxu0 }
 0x130   : > { %v897_v1 = vadd.f32 %v5701_v62, %v5350_v27  ;;  %v5704_v2 = vadd.f32 %v5703_v0, %v5702_v63  ;;  %6465 = vmatprep.subr.bf16.mxu1 %v6464_v61  ;;  %6513 = vmatprep.subr.bf16.mxu0 %v6464_v61  ;;  %v6645_v62 = vld [vmem:[%s7752_s4 + $0x10] sm:$0xff]  }
 0x131   : > { %6467 = vmatpush3.bf16.msra.mxu1 %v6464_v61  ;;  %6515 = vmatpush3.bf16.msra.mxu0 %v6464_v61 }
 0x132   : > { %v900_v3 = vadd.f32 %v5704_v2, %v5350_v27  ;;  %v909_v4 = vmax.f32 %v897_v1, 0.0 }
 0x134   : > { %v910_v5 = vmax.f32 %v900_v3, 0.0 }
 0x136   : > { %v6468_v6 = vpack.c.bf16 %v910_v5, %v909_v4  ;;  %v6646_v4 = vld [vmem:[%s7752_s4 + $0x18] sm:$0xff]  }
 0x138   : > { %6469 = vmatprep.subr.bf16.mxu1 %v6468_v6  ;;  %6517 = vmatprep.subr.bf16.mxu0 %v6468_v6 }
 0x139   : > { %6471 = vmatpush3.bf16.msra.mxu1 %v6468_v6  ;;  %6519 = vmatpush3.bf16.msra.mxu0 %v6468_v6 }
 0x13a   : > { %6473 = vmatprep.subr.bf16.mxu1 %v6998_v39  ;;  %6007 = vmatprep.subr.bf16.mxu0 %v6762_v13 }
 0x13c   : > { %5924 = vmatmul.mubr.msk.f32.vlgmr.msra.gmra.mrb[0].mxu1 %vm913_vm0, %v912_v7  ;;  %5981 = vmatmul.mubr.msk.f32.vlgmr.msra.gmra.mrb[16].mxu0 %vm913_vm0, %v5386_v8 }
 0x13d   : > { %6475 = vmatpush3.bf16.msra.mxu1 %v6998_v39  ;;  %5942 = vmatprep.mubr.msk.f32.mxu1 %vm913_vm0, %v5377_v9 }
 0x13e   : > { %6477 = vmatprep.subr.bf16.mxu1 %v6460_v50  ;;  %6009 = vmatprep.mubr.msk.bf16.mxu0 %vm6763_vm1, %v6762_v13 }
 0x141   : > { %6479 = vmatpush3.bf16.msra.mxu1 %v6460_v50 }
 0x142   : > { %6481 = vmatprep.subr.bf16.mxu1 %v6464_v61 }
 0x145   : > { %6483 = vmatpush3.bf16.msra.mxu1 %v6464_v61 }
 0x146   : > { %6485 = vmatprep.subr.bf16.mxu1 %v6468_v6 }
 0x149   : > { %6487 = vmatpush3.bf16.msra.mxu1 %v6468_v6 }
 0x14a   : > { %6489 = vmatprep.subr.bf16.mxu1 %v6998_v39 }
 0x14c   : > { %5943 = vmatmul.mubr.msk.f32.vlgmr.msra.gmra.mrb[2].mxu1 %vm913_vm0, %v5378_v10  ;;  %v6647_v10 = vld [vmem:[%s7752_s4 + $0x20] sm:$0xff]  }
 0x14d   : > { %6491 = vmatpush3.bf16.msra.mxu1 %v6998_v39  ;;  %5961 = vmatprep.mubr.msk.f32.mxu1 %vm913_vm0, %v5381_v11 }
 0x14e   : > { %6493 = vmatprep.subr.bf16.mxu1 %v6460_v50 }
 0x151   : > { %6495 = vmatpush3.bf16.msra.mxu1 %v6460_v50 }
 0x152   : > { %6497 = vmatprep.subr.bf16.mxu1 %v6464_v61 }
 0x155   : > { %6499 = vmatpush3.bf16.msra.mxu1 %v6464_v61 }
 0x156   : > { %6501 = vmatprep.subr.bf16.mxu1 %v6468_v6 }
 0x159   : > { %6503 = vmatpush3.bf16.msra.mxu1 %v6468_v6 }
 0x15a   : > { %5983 = vmatprep.subr.bf16.mxu1 %v6762_v13 }
 0x15c   : > { %5962 = vmatmul.mubr.msk.f32.vlgmr.msra.gmra.mrb[4].mxu1 %vm913_vm0, %v5382_v12 }
 0x15d   : > { %5985 = vmatprep.mubr.msk.bf16.mxu1 %vm6763_vm1, %v6762_v13 }
 0x20f   : > { %v5925_v14 = vpop.f32.mrb[0].mxu1  ;;  %v5982_v15 = vpop.f32.mrb[16].mxu0 }
 0x210   : > { %v986_v16 = vpop.f32.mrb[1].mxu1  ;;  %v1238_v17 = vpop.f32.mrb[17].mxu0 }
 0x21f   : > { %v5944_v18 = vpop.f32.mrb[2].mxu1 }
 0x220   : > { %v1248_v19 = vmax.f32 %v5925_v14, %v5944_v18  ;;  %v1070_v20 = vpop.f32.mrb[3].mxu1 }
 0x221   : > { %v1247_v21 = vmax.f32 %v986_v16, %v1070_v20 }
 0x22f   : > { %v5963_v22 = vpop.f32.mrb[4].mxu1 }
 0x230   : > { %v1250_v23 = vmax.f32 %v1248_v19, %v5963_v22  ;;  %v1154_v24 = vpop.f32.mrb[5].mxu1 }
 0x231   : > { %v1249_v25 = vmax.f32 %v1247_v21, %v1154_v24 }
 0x232   : > { %v7038_v26 = vmax.f32 %v1250_v23, %v5982_v15  ;;  %v6649_v23 = vld [vmem:[%s7752_s4 + $0x30] sm:$0xff]  }
 0x233   : > { %v7040_v27 = vmax.f32 %v1249_v25, %v1238_v17  ;;  %v6648_v17 = vld [vmem:[%s7752_s4 + $0x28] sm:$0xff]  }
 0x235   : > { %v1253_v28 = vpack.c.bf16 %v7038_v26, %v7040_v27 }
 0x237   : > { %5984 = vmatpush3.bf16.msra.mxu1 %v1253_v28  ;;  %6008 = vmatpush3.bf16.msra.mxu0 %v1253_v28 }
 0x238   : > { %5989 = vmatprep.subr.bf16.mxu1 %v6762_v13  ;;  %6019 = vmatprep.subr.bf16.mxu0 %v6762_v13 }
 0x23a   : > { %5986 = vmatmul.mubr.msk.bf16.vlgmr.msra.gmra.mrb[8].mxu1 %vm1261_vm2, %v6634_v29  ;;  %6010 = vmatmul.mubr.msk.bf16.vlgmr.msra.gmra.mrb[20].mxu0 %vm1261_vm2, %v6635_v30  ;;  %v6650_v29 = vld [vmem:[%s7752_s4 + $0x38] sm:$0xff]   ;;  %v6651_v30 = vld [vmem:[%s7752_s4 + $0x40] sm:$0xff]   ;;  %s5277_s4 = scalar_lea.sflag [#allocation3], %s647_s2 }
 0x23b   : > { %5990 = vmatpush3.bf16.msra.mxu1 %v1253_v28  ;;  %6020 = vmatpush3.bf16.msra.mxu0 %v1253_v28 }
 0x23c   : > { %5991 = vmatprep.mubr.msk.bf16.mxu1 %vm6763_vm1, %v6762_v13  ;;  %6021 = vmatprep.mubr.msk.bf16.mxu0 %vm6763_vm1, %v6762_v13 }
 0x23d   : > { %6031 = vmatprep.subr.bf16.mxu0 %v6762_v13  ;;  %5995 = vmatprep.subr.bf16.mxu1 %v6762_v13 }
 0x242   : > { %5992 = vmatmul.mubr.msk.bf16.vlgmr.msra.gmra.mrb[12].mxu1 %vm1261_vm2, %v6636_v31  ;;  %6022 = vmatmul.mubr.msk.bf16.vlgmr.msra.gmra.mrb[24].mxu0 %vm1261_vm2, %v6637_v32 }
 0x243   : > { %6032 = vmatpush3.bf16.msra.mxu0 %v1253_v28  ;;  %6033 = vmatprep.mubr.msk.bf16.mxu0 %vm6763_vm1, %v6762_v13 }
 0x244   : > { %6043 = vmatprep.subr.bf16.mxu0 %v6762_v13  ;;  %5997 = vmatprep.mubr.msk.bf16.mxu1 %vm6763_vm1, %v6762_v13 }
 0x245   : > { %5996 = vmatpush3.bf16.msra.mxu1 %v6643_v38 }
 0x246   : > { %6001 = vmatprep.subr.bf16.mxu1 %v6762_v13 }
 0x24a   : > { %6034 = vmatmul.mubr.msk.bf16.vlgmr.msra.gmra.mrb[28].mxu0 %vm1261_vm2, %v6638_v33 }
 0x24b   : > { %6044 = vmatpush3.bf16.msra.mxu0 %v1253_v28  ;;  %6045 = vmatprep.mubr.msk.bf16.mxu0 %vm6763_vm1, %v6762_v13 }
 0x24c   : > { %6055 = vmatprep.subr.bf16.mxu0 %v6762_v13 }
 0x252   : > { %6046 = vmatmul.mubr.msk.bf16.vlgmr.msra.gmra.mrb[32].mxu0 %vm1261_vm2, %v6639_v34 }
 0x253   : > { %6056 = vmatpush3.bf16.msra.mxu0 %v1253_v28  ;;  %6057 = vmatprep.mubr.msk.bf16.mxu0 %vm6763_vm1, %v6762_v13 }
 0x254   : > { %6067 = vmatprep.subr.bf16.mxu0 %v6762_v13 }
 0x25a   : > { %6058 = vmatmul.mubr.msk.bf16.vlgmr.msra.gmra.mrb[36].mxu0 %vm1261_vm2, %v6640_v35 }
 0x25b   : > { %6068 = vmatpush3.bf16.msra.mxu0 %v1253_v28  ;;  %6069 = vmatprep.mubr.msk.bf16.mxu0 %vm6763_vm1, %v6762_v13 }
 0x25c   : > { %6079 = vmatprep.subr.bf16.mxu0 %v6762_v13 }
 0x262   : > { %6070 = vmatmul.mubr.msk.bf16.vlgmr.msra.gmra.mrb[40].mxu0 %vm1261_vm2, %v6641_v36 }
 0x263   : > { %6080 = vmatpush3.bf16.msra.mxu0 %v1253_v28  ;;  %6081 = vmatprep.mubr.msk.bf16.mxu0 %vm6763_vm1, %v6762_v13 }
 0x264   : > { %6091 = vmatprep.subr.bf16.mxu0 %v6762_v13 }
 0x26a   : > { %6082 = vmatmul.mubr.msk.bf16.vlgmr.msra.gmra.mrb[44].mxu0 %vm1261_vm2, %v6642_v37 }
 0x26b   : > { %6093 = vmatprep.mubr.msk.bf16.mxu0 %vm6763_vm1, %v6762_v13 }
 0x30d   : > { %v1299_v39 = vpop.f32.mrb[8].mxu1  ;;  %v1510_v40 = vpop.f32.mrb[20].mxu0 }
 0x30e   : > { %v5987_v41 = vpop.f32.mrb[9].mxu1  ;;  %v6011_v42 = vpop.f32.mrb[21].mxu0 }
 0x30f   : > { %v1302_v43 = vpop.f32.mrb[10].mxu1  ;;  %v1513_v44 = vpop.f32.mrb[22].mxu0 }
 0x310   : > { %v1306_v45 = vpack.c.bf16 %v1302_v43, %v1299_v39  ;;  %v5988_v46 = vpop.f32.mrb[11].mxu1  ;;  %v1517_v47 = vpack.c.bf16 %v1513_v44, %v1510_v40  ;;  %v6012_v48 = vpop.f32.mrb[23].mxu0 }
 0x315   : > { %v1354_v49 = vpop.f32.mrb[12].mxu1  ;;  %v1618_v50 = vpop.f32.mrb[24].mxu0 }
 0x316   : > { %v5993_v51 = vpop.f32.mrb[13].mxu1  ;;  %v6023_v52 = vpop.f32.mrb[25].mxu0 }
 0x317   : > { %v1357_v53 = vpop.f32.mrb[14].mxu1  ;;  %v1621_v55 = vpop.f32.mrb[26].mxu0 }
 0x318   : > { %v1361_v56 = vpack.c.bf16 %v1357_v53, %v1354_v49  ;;  %v5994_v57 = vpop.f32.mrb[15].mxu1  ;;  %v1625_v58 = vpack.c.bf16 %v1621_v55, %v1618_v50  ;;  %v6024_v59 = vpop.f32.mrb[27].mxu0 }
 0x31a   : > { %5998 = vmatmul.mubr.msk.bf16.vlgmr.msra.gmra.mrb[16].mxu1 %vm1261_vm2, %v1361_v56 }
 0x31b   : > { %6002 = vmatpush3.bf16.msra.mxu1 %v6644_v54  ;;  %6003 = vmatprep.mubr.msk.bf16.mxu1 %vm6763_vm1, %v6762_v13 }
 0x31c   : > { %6013 = vmatprep.subr.bf16.mxu1 %v6762_v13 }
 0x31d   : > { %v1726_v60 = vpop.f32.mrb[28].mxu0 }
 0x31e   : > { %v6035_v61 = vpop.f32.mrb[29].mxu0 }
 0x31f   : > { %v1729_v63 = vpop.f32.mrb[30].mxu0 }
 0x320   : > { %v1733_v0 = vpack.c.bf16 %v1729_v63, %v1726_v60  ;;  %v6036_v1 = vpop.f32.mrb[31].mxu0 }
 0x322   : > { %6004 = vmatmul.mubr.msk.bf16.vlgmr.msra.gmra.mrb[20].mxu1 %vm1261_vm2, %v1306_v45 }
 0x323   : > { %6014 = vmatpush3.bf16.msra.mxu1 %v6645_v62  ;;  %6015 = vmatprep.mubr.msk.bf16.mxu1 %vm6763_vm1, %v6762_v13 }
 0x324   : > { %6025 = vmatprep.subr.bf16.mxu1 %v6762_v13 }
 0x325   : > { %v1834_v2 = vpop.f32.mrb[32].mxu0 }
 0x326   : > { %v6047_v3 = vpop.f32.mrb[33].mxu0 }
 0x327   : > { %v1837_v5 = vpop.f32.mrb[34].mxu0 }
 0x328   : > { %v1841_v6 = vpack.c.bf16 %v1837_v5, %v1834_v2  ;;  %v6048_v7 = vpop.f32.mrb[35].mxu0 }
 0x32a   : > { %6016 = vmatmul.mubr.msk.bf16.vlgmr.msra.gmra.mrb[24].mxu1 %vm1261_vm2, %v1517_v47 }
 0x32b   : > { %6026 = vmatpush3.bf16.msra.mxu1 %v6646_v4  ;;  %6027 = vmatprep.mubr.msk.bf16.mxu1 %vm6763_vm1, %v6762_v13 }
 0x32c   : > { %6037 = vmatprep.subr.bf16.mxu1 %v6762_v13 }
 0x32d   : > { %v1942_v8 = vpop.f32.mrb[36].mxu0 }
 0x32e   : > { %v6059_v9 = vpop.f32.mrb[37].mxu0 }
 0x32f   : > { %v1945_v11 = vpop.f32.mrb[38].mxu0 }
 0x330   : > { %v1949_v12 = vpack.c.bf16 %v1945_v11, %v1942_v8  ;;  %v6060_v14 = vpop.f32.mrb[39].mxu0 }
 0x332   : > { %6028 = vmatmul.mubr.msk.bf16.vlgmr.msra.gmra.mrb[28].mxu1 %vm1261_vm2, %v1625_v58 }
 0x333   : > { %6038 = vmatpush3.bf16.msra.mxu1 %v6647_v10  ;;  %6039 = vmatprep.mubr.msk.bf16.mxu1 %vm6763_vm1, %v6762_v13 }
 0x334   : > { %6049 = vmatprep.subr.bf16.mxu1 %v6762_v13 }
 0x335   : > { %v2050_v15 = vpop.f32.mrb[40].mxu0 }
 0x336   : > { %v6071_v16 = vpop.f32.mrb[41].mxu0 }
 0x337   : > { %v2053_v18 = vpop.f32.mrb[42].mxu0 }
 0x338   : > { %v2057_v19 = vpack.c.bf16 %v2053_v18, %v2050_v15  ;;  %v6072_v20 = vpop.f32.mrb[43].mxu0  ;;  %v5457_v15 = vld [vmem:[%s7753_s6] ss:$0 sm:$0xff]  ;;  %s6704_s6 = scalar_lea.vmem %s6703_s1, 32 }
 0x339   : > { %p6706_p1 = scmp.lt.s32.totalorder %s6704_s6, %s6698_s27 }
 0x33a   : > { %6040 = vmatmul.mubr.msk.bf16.vlgmr.msra.gmra.mrb[32].mxu1 %vm1261_vm2, %v1733_v0 }
 0x33b   : > { %6050 = vmatpush3.bf16.msra.mxu1 %v6648_v17  ;;  %6051 = vmatprep.mubr.msk.bf16.mxu1 %vm6763_vm1, %v6762_v13  ;;  %p6707_p2 = por %p6706_p1, %p6705_p0 }
 0x33c   : > { %6061 = vmatprep.subr.bf16.mxu1 %v6762_v13 }
 0x33d   : > { %v2158_v21 = vpop.f32.mrb[44].mxu0  ;;  %p6708_p3 = pnand %p6707_p2, %p6701_p13 }
 0x33e   : > { %v6083_v22 = vpop.f32.mrb[45].mxu0 }
 0x33f   : > { %v2161_v24 = vpop.f32.mrb[46].mxu0 }
 0x340   : > { %v2165_v25 = vpack.c.bf16 %v2161_v24, %v2158_v21  ;;  %v6084_v28 = vpop.f32.mrb[47].mxu0 }
 0x341   : > { %v6652_v28 = vld [vmem:[%s7702_s7] sm:$0xff]  }
 0x342   : > { %6052 = vmatmul.mubr.msk.bf16.vlgmr.msra.gmra.mrb[36].mxu1 %vm1261_vm2, %v1841_v6 }
 0x343   : > { %6062 = vmatpush3.bf16.msra.mxu1 %v6649_v23  ;;  %6063 = vmatprep.mubr.msk.bf16.mxu1 %vm6763_vm1, %v6762_v13 }
 0x344   : > { %6073 = vmatprep.subr.bf16.mxu1 %v6762_v13 }
 0x34a   : > { %6064 = vmatmul.mubr.msk.bf16.vlgmr.msra.gmra.mrb[40].mxu1 %vm1261_vm2, %v1949_v12 }
 0x34b   : > { %6074 = vmatpush3.bf16.msra.mxu1 %v6650_v29  ;;  %6075 = vmatprep.mubr.msk.bf16.mxu1 %vm6763_vm1, %v6762_v13  ;;  %v6653_v29 = vld [vmem:[%s7702_s7 + $0x8] sm:$0xff]  }
 0x34c   : > { %6085 = vmatprep.subr.bf16.mxu1 %v6762_v13 }
 0x352   : > { %6076 = vmatmul.mubr.msk.bf16.vlgmr.msra.gmra.mrb[44].mxu1 %vm1261_vm2, %v2057_v19 }
 0x353   : > { %6086 = vmatpush3.bf16.msra.mxu1 %v6651_v30  ;;  %6087 = vmatprep.mubr.msk.bf16.mxu1 %vm6763_vm1, %v6762_v13  ;;  %v6654_v30 = vld [vmem:[%s7703_s8 + $0x8] sm:$0xff]  }
 0x354   : > { %6097 = vmatprep.subr.bf16.mxu1 %v6762_v13 }
 0x35a   : > { %6088 = vmatmul.mubr.msk.bf16.vlgmr.msra.gmra.mrb[48].mxu1 %vm1261_vm2, %v2165_v25 }
 0x35b   : > { %6099 = vmatprep.mubr.msk.bf16.mxu1 %vm6763_vm1, %v6762_v13 }
 0x3ed   : > { %v1408_v31 = vpop.f32.mrb[16].mxu1 }
 0x3ee   : > { %v5999_v32 = vpop.f32.mrb[17].mxu1 }
 0x3ef   : > { %v1411_v33 = vpop.f32.mrb[18].mxu1 }
 0x3f0   : > { %v6000_v34 = vpop.f32.mrb[19].mxu1 }
 0x3f5   : > { %v1458_v35 = vpop.f32.mrb[20].mxu1 }
 0x3f6   : > { %v1459_v36 = vadd.f32 %v1458_v35, %v1408_v31  ;;  %v6005_v37 = vpop.f32.mrb[21].mxu1  ;;  %v6655_v31 = vld [vmem:[%s7703_s8] sm:$0xff]  }
 0x3f7   : > { %v1461_v38 = vpop.f32.mrb[22].mxu1 }
 0x3f8   : > { %v1462_v39 = vadd.f32 %v1461_v38, %v1411_v33  ;;  %v6006_v40 = vpop.f32.mrb[23].mxu1 }
 0x3fd   : > { %v1564_v41 = vpop.f32.mrb[24].mxu1 }
 0x3fe   : > { %v1571_v42 = vadd.f32 %v1564_v41, %v1459_v36  ;;  %v6017_v43 = vpop.f32.mrb[25].mxu1 }
 0x3ff   : > { %v1567_v44 = vpop.f32.mrb[26].mxu1  ;;  %v6657_v43 = vld [vmem:[%s7702_s7 + $0x18] sm:$0xff]  }
 0x400   : > { %v1572_v45 = vadd.f32 %v1567_v44, %v1462_v39  ;;  %v6018_v46 = vpop.f32.mrb[27].mxu1  ;;  %v6658_v44 = vld [vmem:[%s7702_s7 + $0x20] sm:$0xff]  }
 0x401   : > { %v6660_v46 = vld [vmem:[%s7702_s7 + $0x30] sm:$0xff]  }
 0x405   : > { %v1672_v47 = vpop.f32.mrb[28].mxu1 }
 0x406   : > { %v1679_v48 = vadd.f32 %v1672_v47, %v1571_v42  ;;  %v6029_v49 = vpop.f32.mrb[29].mxu1  ;;  %v6656_v42 = vld [vmem:[%s7702_s7 + $0x10] sm:$0xff]   ;;  %v6661_v47 = vld [vmem:[%s7702_s7 + $0x38] sm:$0xff]  }
 0x407   : > { %v1675_v50 = vpop.f32.mrb[30].mxu1  ;;  %v6663_v49 = vld [vmem:[%s7703_s8 + $0x10] sm:$0xff]  }
 0x408   : > { %v1680_v51 = vadd.f32 %v1675_v50, %v1572_v45  ;;  %v6030_v52 = vpop.f32.mrb[31].mxu1  ;;  %v6659_v45 = vld [vmem:[%s7702_s7 + $0x28] sm:$0xff]  }
 0x40d   : > { %v1780_v53 = vpop.f32.mrb[32].mxu1 }
 0x40e   : > { %v1787_v54 = vadd.f32 %v1780_v53, %v1679_v48  ;;  %v6041_v55 = vpop.f32.mrb[33].mxu1  ;;  %v6662_v48 = vld [vmem:[%s7702_s7 + $0x40] sm:$0xff]  }
 0x40f   : > { %v1783_v56 = vpop.f32.mrb[34].mxu1 }
 0x410   : > { %v1788_v57 = vadd.f32 %v1783_v56, %v1680_v51  ;;  %v6042_v58 = vpop.f32.mrb[35].mxu1 }
 0x415   : > { %v1888_v59 = vpop.f32.mrb[36].mxu1 }
 0x416   : > { %v1895_v60 = vadd.f32 %v1888_v59, %v1787_v54  ;;  %v6053_v61 = vpop.f32.mrb[37].mxu1 }
 0x417   : > { %v1891_v62 = vpop.f32.mrb[38].mxu1 }
 0x418   : > { %v1896_v63 = vadd.f32 %v1891_v62, %v1788_v57  ;;  %v6054_v0 = vpop.f32.mrb[39].mxu1 }
 0x41d   : > { %v1996_v1 = vpop.f32.mrb[40].mxu1 }
 0x41e   : > { %v2003_v2 = vadd.f32 %v1996_v1, %v1895_v60  ;;  %v6065_v3 = vpop.f32.mrb[41].mxu1 }
 0x41f   : > { %v1999_v4 = vpop.f32.mrb[42].mxu1 }
 0x420   : > { %v2004_v5 = vadd.f32 %v1999_v4, %v1896_v63  ;;  %v6066_v6 = vpop.f32.mrb[43].mxu1  ;;  %v6664_v63 = vld [vmem:[%s7703_s8 + $0x18] sm:$0xff]  }
 0x425   : > { %v2104_v7 = vpop.f32.mrb[44].mxu1 }
 0x426   : > { %v2111_v8 = vadd.f32 %v2104_v7, %v2003_v2  ;;  %v6077_v9 = vpop.f32.mrb[45].mxu1 }
 0x427   : > { %v2107_v10 = vpop.f32.mrb[46].mxu1 }
 0x428   : > { %v2112_v11 = vadd.f32 %v2107_v10, %v2004_v5  ;;  %v6078_v12 = vpop.f32.mrb[47].mxu1  ;;  %v6665_v5 = vld [vmem:[%s7703_s8 + $0x20] sm:$0xff]  }
 0x42d   : > { %v2212_v14 = vpop.f32.mrb[48].mxu1 }
 0x42e   : > { %v2219_v16 = vadd.f32 %v2212_v14, %v2111_v8  ;;  %v6089_v17 = vpop.f32.mrb[49].mxu1 }
 0x42f   : > { %v2215_v18 = vpop.f32.mrb[50].mxu1 }
 0x430   : > { %v2228_v19 = vadd.f32 %v5457_v15, %v2219_v16  ;;  %v2220_v20 = vadd.f32 %v2215_v18, %v2112_v11  ;;  %v6090_v21 = vpop.f32.mrb[51].mxu1  ;;  %v6666_v11 = vld [vmem:[%s7703_s8 + $0x28] sm:$0xff]   ;;  %v6667_v18 = vld [vmem:[%s7703_s8 + $0x30] sm:$0xff]  }
 0x432   : > { %v2229_v22 = vadd.f32 %v5457_v15, %v2220_v20  ;;  %v2230_v23 = vmax.f32 %v2228_v19, 0.0 }
 0x434   : > { %v2231_v24 = vmax.f32 %v2229_v22, 0.0 }
 0x436   : > { %v2232_v25 = vpack.c.bf16 %v2231_v24, %v2230_v23  ;;  %v6668_v24 = vld [vmem:[%s7703_s8 + $0x38] sm:$0xff]  }
 0x438   : > { %6092 = vmatpush3.bf16.msra.mxu0 %v2232_v25  ;;  %6098 = vmatpush3.bf16.msra.mxu1 %v2232_v25 }
 0x439   : > { %6103 = vmatprep.subr.bf16.mxu0 %v6762_v13  ;;  %6109 = vmatprep.subr.bf16.mxu1 %v6762_v13 }
 0x43b   : > { %6094 = vmatmul.mubr.msk.bf16.vlgmr.msra.gmra.mrb[48].mxu0 %vm1261_vm2, %v6652_v28  ;;  %6100 = vmatmul.mubr.msk.bf16.vlgmr.msra.gmra.mrb[52].mxu1 %vm1261_vm2, %v6653_v29 }
 0x43c   : > { %6105 = vmatprep.mubr.msk.bf16.mxu0 %vm6763_vm1, %v6762_v13  ;;  %6111 = vmatprep.mubr.msk.bf16.mxu1 %vm6763_vm1, %v6762_v13 }
 0x43d   : > { %6104 = vmatpush3.bf16.msra.mxu0 %v6654_v30  ;;  %6110 = vmatpush3.bf16.msra.mxu1 %v6655_v31 }
 0x43e   : > { %6115 = vmatprep.subr.bf16.mxu0 %v6762_v13  ;;  %6121 = vmatprep.subr.bf16.mxu1 %v6762_v13 }
 0x50e   : > { %v2277_v32 = vpop.f32.mrb[48].mxu0  ;;  %v2332_v33 = vpop.f32.mrb[52].mxu1 }
 0x50f   : > { %v6095_v34 = vpop.f32.mrb[49].mxu0  ;;  %v6101_v35 = vpop.f32.mrb[53].mxu1 }
 0x510   : > { %v2280_v36 = vpop.f32.mrb[50].mxu0  ;;  %v2335_v37 = vpop.f32.mrb[54].mxu1 }
 0x511   : > { %v2284_v38 = vpack.c.bf16 %v2280_v36, %v2277_v32  ;;  %v2339_v39 = vpack.c.bf16 %v2335_v37, %v2332_v33  ;;  %v6102_v40 = vpop.f32.mrb[55].mxu1  ;;  %v6096_v41 = vpop.f32.mrb[51].mxu0  ;;  %v6669_v32 = vld [vmem:[%s7703_s8 + $0x40] sm:$0xff]  }
 0x513   : > { %6106 = vmatmul.mubr.msk.bf16.vlgmr.msra.gmra.mrb[52].mxu0 %vm1261_vm2, %v2339_v39  ;;  %6112 = vmatmul.mubr.msk.bf16.vlgmr.msra.gmra.mrb[56].mxu1 %vm1261_vm2, %v2284_v38 }
 0x514   : > { %6116 = vmatpush3.bf16.msra.mxu0 %v2232_v25  ;;  %6117 = vmatprep.mubr.msk.bf16.mxu0 %vm6763_vm1, %v6762_v13 }
 0x515   : > { %6127 = vmatprep.subr.bf16.mxu0 %v6762_v13  ;;  %6123 = vmatprep.mubr.msk.bf16.mxu1 %vm6763_vm1, %v6762_v13 }
 0x516   : > { %6122 = vmatpush3.bf16.msra.mxu1 %v6663_v49 }
 0x517   : > { %6133 = vmatprep.subr.bf16.mxu1 %v6762_v13 }
 0x51b   : > { %6118 = vmatmul.mubr.msk.bf16.vlgmr.msra.gmra.mrb[56].mxu0 %vm1261_vm2, %v6656_v42 }
 0x51c   : > { %6128 = vmatpush3.bf16.msra.mxu0 %v2232_v25  ;;  %6129 = vmatprep.mubr.msk.bf16.mxu0 %vm6763_vm1, %v6762_v13 }
 0x51d   : > { %6139 = vmatprep.subr.bf16.mxu0 %v6762_v13 }
 0x523   : > { %6130 = vmatmul.mubr.msk.bf16.vlgmr.msra.gmra.mrb[60].mxu0 %vm1261_vm2, %v6657_v43 }
 0x524   : > { %6140 = vmatpush3.bf16.msra.mxu0 %v2232_v25  ;;  %6141 = vmatprep.mubr.msk.bf16.mxu0 %vm6763_vm1, %v6762_v13 }
 0x525   : > { %6151 = vmatprep.subr.bf16.mxu0 %v6762_v13 }
 0x52b   : > { %6142 = vmatmul.mubr.msk.bf16.vlgmr.msra.gmra.mrb[64].mxu0 %vm1261_vm2, %v6658_v44 }
 0x52c   : > { %6152 = vmatpush3.bf16.msra.mxu0 %v2232_v25  ;;  %6153 = vmatprep.mubr.msk.bf16.mxu0 %vm6763_vm1, %v6762_v13 }
 0x52d   : > { %6163 = vmatprep.subr.bf16.mxu0 %v6762_v13 }
 0x533   : > { %6154 = vmatmul.mubr.msk.bf16.vlgmr.msra.gmra.mrb[68].mxu0 %vm1261_vm2, %v6659_v45 }
 0x534   : > { %6164 = vmatpush3.bf16.msra.mxu0 %v2232_v25  ;;  %6165 = vmatprep.mubr.msk.bf16.mxu0 %vm6763_vm1, %v6762_v13 }
 0x535   : > { %6175 = vmatprep.subr.bf16.mxu0 %v6762_v13 }
 0x53b   : > { %6166 = vmatmul.mubr.msk.bf16.vlgmr.msra.gmra.mrb[72].mxu0 %vm1261_vm2, %v6660_v46 }
 0x53c   : > { %6176 = vmatpush3.bf16.msra.mxu0 %v2232_v25  ;;  %6177 = vmatprep.mubr.msk.bf16.mxu0 %vm6763_vm1, %v6762_v13 }
 0x53d   : > { %6187 = vmatprep.subr.bf16.mxu0 %v6762_v13 }
 0x543   : > { %6178 = vmatmul.mubr.msk.bf16.vlgmr.msra.gmra.mrb[76].mxu0 %vm1261_vm2, %v6661_v47 }
 0x544   : > { %6188 = vmatpush3.bf16.msra.mxu0 %v2232_v25  ;;  %6189 = vmatprep.mubr.msk.bf16.mxu0 %vm6763_vm1, %v6762_v13 }
 0x545   : > { %6199 = vmatprep.subr.bf16.mxu0 %v6762_v13 }
 0x54b   : > { %6190 = vmatmul.mubr.msk.bf16.vlgmr.msra.gmra.mrb[80].mxu0 %vm1261_vm2, %v6662_v48 }
 0x54c   : > { %6201 = vmatprep.mubr.msk.bf16.mxu0 %vm6763_vm1, %v6762_v13 }
 0x5e6   : > { %v2386_v50 = vpop.f32.mrb[52].mxu0  ;;  %v2436_v51 = vpop.f32.mrb[56].mxu1 }
 0x5e7   : > { %v7254_v52 = vadd.f32 %v2436_v51, %v2386_v50  ;;  %v6107_v53 = vpop.f32.mrb[53].mxu0  ;;  %v6113_v54 = vpop.f32.mrb[57].mxu1 }
 0x5e8   : > { %v2389_v55 = vpop.f32.mrb[54].mxu0  ;;  %v2439_v56 = vpop.f32.mrb[58].mxu1 }
 0x5e9   : > { %v7256_v57 = vadd.f32 %v2439_v56, %v2389_v55  ;;  %v6108_v58 = vpop.f32.mrb[55].mxu0  ;;  %v6114_v59 = vpop.f32.mrb[59].mxu1 }
 0x5ee   : > { %v2488_v60 = vpop.f32.mrb[56].mxu0 }
 0x5ef   : > { %v6119_v61 = vpop.f32.mrb[57].mxu0 }
 0x5f0   : > { %v2491_v62 = vpop.f32.mrb[58].mxu0 }
 0x5f1   : > { %v2495_v0 = vpack.c.bf16 %v2491_v62, %v2488_v60  ;;  %v6120_v1 = vpop.f32.mrb[59].mxu0 }
 0x5f3   : > { %6124 = vmatmul.mubr.msk.bf16.vlgmr.msra.gmra.mrb[60].mxu1 %vm1261_vm2, %v2495_v0 }
 0x5f4   : > { %6134 = vmatpush3.bf16.msra.mxu1 %v6664_v63  ;;  %6135 = vmatprep.mubr.msk.bf16.mxu1 %vm6763_vm1, %v6762_v13 }
 0x5f5   : > { %6145 = vmatprep.subr.bf16.mxu1 %v6762_v13 }
 0x5f6   : > { %v2596_v2 = vpop.f32.mrb[60].mxu0 }
 0x5f7   : > { %v6131_v3 = vpop.f32.mrb[61].mxu0 }
 0x5f8   : > { %v2599_v4 = vpop.f32.mrb[62].mxu0 }
 0x5f9   : > { %v2603_v6 = vpack.c.bf16 %v2599_v4, %v2596_v2  ;;  %v6132_v7 = vpop.f32.mrb[63].mxu0 }
 0x5fb   : > { %6136 = vmatmul.mubr.msk.bf16.vlgmr.msra.gmra.mrb[64].mxu1 %vm1261_vm2, %v2603_v6 }
 0x5fc   : > { %6146 = vmatpush3.bf16.msra.mxu1 %v6665_v5  ;;  %6147 = vmatprep.mubr.msk.bf16.mxu1 %vm6763_vm1, %v6762_v13 }
 0x5fd   : > { %6157 = vmatprep.subr.bf16.mxu1 %v6762_v13 }
 0x5fe   : > { %v2704_v8 = vpop.f32.mrb[64].mxu0 }
 0x5ff   : > { %v6143_v9 = vpop.f32.mrb[65].mxu0 }
 0x600   : > { %v2707_v10 = vpop.f32.mrb[66].mxu0 }
 0x601   : > { %v2711_v12 = vpack.c.bf16 %v2707_v10, %v2704_v8  ;;  %v6144_v14 = vpop.f32.mrb[67].mxu0 }
 0x602   : > { %v5526_v14 = vld [vmem:[%s7704_s9] ss:$0 sm:$0xff] }
 0x603   : > { %6148 = vmatmul.mubr.msk.bf16.vlgmr.msra.gmra.mrb[68].mxu1 %vm1261_vm2, %v2711_v12 }
 0x604   : > { %6158 = vmatpush3.bf16.msra.mxu1 %v6666_v11  ;;  %6159 = vmatprep.mubr.msk.bf16.mxu1 %vm6763_vm1, %v6762_v13 }
 0x605   : > { %6169 = vmatprep.subr.bf16.mxu1 %v6762_v13 }
 0x606   : > { %v2812_v15 = vpop.f32.mrb[68].mxu0 }
 0x607   : > { %v6155_v16 = vpop.f32.mrb[69].mxu0 }
 0x608   : > { %v2815_v17 = vpop.f32.mrb[70].mxu0 }
 0x609   : > { %v2819_v19 = vpack.c.bf16 %v2815_v17, %v2812_v15  ;;  %v6156_v20 = vpop.f32.mrb[71].mxu0 }
 0x60b   : > { %6160 = vmatmul.mubr.msk.bf16.vlgmr.msra.gmra.mrb[72].mxu1 %vm1261_vm2, %v2819_v19 }
 0x60c   : > { %6170 = vmatpush3.bf16.msra.mxu1 %v6667_v18  ;;  %6171 = vmatprep.mubr.msk.bf16.mxu1 %vm6763_vm1, %v6762_v13 }
 0x60d   : > { %6181 = vmatprep.subr.bf16.mxu1 %v6762_v13 }
 0x60e   : > { %v2920_v21 = vpop.f32.mrb[72].mxu0 }
 0x60f   : > { %v6167_v22 = vpop.f32.mrb[73].mxu0 }
 0x610   : > { %v2923_v23 = vpop.f32.mrb[74].mxu0 }
 0x611   : > { %v2927_v25 = vpack.c.bf16 %v2923_v23, %v2920_v21  ;;  %v6168_v28 = vpop.f32.mrb[75].mxu0 }
 0x613   : > { %6172 = vmatmul.mubr.msk.bf16.vlgmr.msra.gmra.mrb[76].mxu1 %vm1261_vm2, %v2927_v25 }
 0x614   : > { %6182 = vmatpush3.bf16.msra.mxu1 %v6668_v24  ;;  %6183 = vmatprep.mubr.msk.bf16.mxu1 %vm6763_vm1, %v6762_v13 }
 0x615   : > { %6193 = vmatprep.subr.bf16.mxu1 %v6762_v13 }
 0x616   : > { %v3028_v29 = vpop.f32.mrb[76].mxu0 }
 0x617   : > { %v6179_v30 = vpop.f32.mrb[77].mxu0 }
 0x618   : > { %v3031_v31 = vpop.f32.mrb[78].mxu0  ;;  %v5528_v30 = vld [vmem:[%s7705_s10 + $0x2] sm:$0x3] }
 0x619   : > { %v3035_v33 = vpack.c.bf16 %v3031_v31, %v3028_v29  ;;  %v6180_v34 = vpop.f32.mrb[79].mxu0  ;;  %v3213_v29 = vld [vmem:[%s7705_s10] sm:$0x3] }
 0x61b   : > { %6184 = vmatmul.mubr.msk.bf16.vlgmr.msra.gmra.mrb[80].mxu1 %vm1261_vm2, %v3035_v33 }
 0x61c   : > { %6194 = vmatpush3.bf16.msra.mxu1 %v6669_v32  ;;  %6195 = vmatprep.mubr.msk.bf16.mxu1 %vm6763_vm1, %v6762_v13 }
 0x61d   : > { %6205 = vmatprep.subr.bf16.mxu1 %v6762_v13 }
 0x61e   : > { %v3136_v35 = vpop.f32.mrb[80].mxu0 }
 0x61f   : > { %v6191_v36 = vpop.f32.mrb[81].mxu0 }
 0x620   : > { %v3139_v37 = vpop.f32.mrb[82].mxu0 }
 0x621   : > { %v3143_v38 = vpack.c.bf16 %v3139_v37, %v3136_v35  ;;  %v6192_v39 = vpop.f32.mrb[83].mxu0 }
 0x623   : > { %6196 = vmatmul.mubr.msk.bf16.vlgmr.msra.gmra.mrb[84].mxu1 %vm1261_vm2, %v3143_v38 }
 0x624   : > { %6207 = vmatprep.mubr.msk.bf16.mxu1 %vm6763_vm1, %v6762_v13 }
 0x6c6   : > { %v2542_v40 = vpop.f32.mrb[60].mxu1 }
 0x6c7   : > { %v2549_v41 = vadd.f32 %v2542_v40, %v7254_v52  ;;  %v6125_v42 = vpop.f32.mrb[61].mxu1 }
 0x6c8   : > { %v2545_v43 = vpop.f32.mrb[62].mxu1  ;;  %v5542_v42 = vld [vmem:[%s7705_s10 + $0x6] sm:$0x3] }
 0x6c9   : > { %v2550_v44 = vadd.f32 %v2545_v43, %v7256_v57  ;;  %v6126_v45 = vpop.f32.mrb[63].mxu1  ;;  %v5548_v43 = vld [vmem:[%s7705_s10 + $0x8] sm:$0x3] }
 0x6ca   : > { %v5560_v45 = vld [vmem:[%s7705_s10 + $0xc] sm:$0x3] }
 0x6ce   : > { %v2650_v46 = vpop.f32.mrb[64].mxu1 }
 0x6cf   : > { %v2657_v47 = vadd.f32 %v2650_v46, %v2549_v41  ;;  %v6137_v48 = vpop.f32.mrb[65].mxu1  ;;  %v5536_v41 = vld [vmem:[%s7705_s10 + $0x4] sm:$0x3]  ;;  %v5566_v46 = vld [vmem:[%s7705_s10 + $0xe] sm:$0x3] }
 0x6d0   : > { %v2653_v49 = vpop.f32.mrb[66].mxu1  ;;  %v6672_v48 = vld [vmem:[%s7706_s11 + $0x10] sm:$0xff]  }
 0x6d1   : > { %v2658_v50 = vadd.f32 %v2653_v49, %v2550_v44  ;;  %v6138_v51 = vpop.f32.mrb[67].mxu1  ;;  %v5554_v44 = vld [vmem:[%s7705_s10 + $0xa] sm:$0x3] }
 0x6d6   : > { %v2758_v53 = vpop.f32.mrb[68].mxu1 }
 0x6d7   : > { %v2765_v54 = vadd.f32 %v2758_v53, %v2657_v47  ;;  %v6149_v55 = vpop.f32.mrb[69].mxu1  ;;  %v5572_v47 = vld [vmem:[%s7705_s10 + $0x10] sm:$0x3] }
 0x6d8   : > { %v2761_v56 = vpop.f32.mrb[70].mxu1 }
 0x6d9   : > { %v2766_v58 = vadd.f32 %v2761_v56, %v2658_v50  ;;  %v6150_v59 = vpop.f32.mrb[71].mxu1 }
 0x6de   : > { %v2866_v60 = vpop.f32.mrb[72].mxu1 }
 0x6df   : > { %v2873_v61 = vadd.f32 %v2866_v60, %v2765_v54  ;;  %v6161_v52 = vpop.f32.mrb[73].mxu1 }
 0x6e0   : > { %v2869_v62 = vpop.f32.mrb[74].mxu1 }
 0x6e1   : > { %v2874_v63 = vadd.f32 %v2869_v62, %v2766_v58  ;;  %v6162_v0 = vpop.f32.mrb[75].mxu1 }
 0x6e6   : > { %v2974_v57 = vpop.f32.mrb[76].mxu1 }
 0x6e7   : > { %v2981_v1 = vadd.f32 %v2974_v57, %v2873_v61  ;;  %v6173_v2 = vpop.f32.mrb[77].mxu1  ;;  %v6673_v61 = vld [vmem:[%s7706_s11 + $0x18] sm:$0xff]  }
 0x6e8   : > { %v2977_v3 = vpop.f32.mrb[78].mxu1 }
 0x6e9   : > { %v2982_v4 = vadd.f32 %v2977_v3, %v2874_v63  ;;  %v6174_v5 = vpop.f32.mrb[79].mxu1 }
 0x6ee   : > { %v3082_v6 = vpop.f32.mrb[80].mxu1 }
 0x6ef   : > { %v3089_v7 = vadd.f32 %v3082_v6, %v2981_v1  ;;  %v6185_v8 = vpop.f32.mrb[81].mxu1  ;;  %v6674_v1 = vld [vmem:[%s7706_s11 + $0x20] sm:$0xff]  }
 0x6f0   : > { %v3085_v9 = vpop.f32.mrb[82].mxu1 }
 0x6f1   : > { %v3090_v10 = vadd.f32 %v3085_v9, %v2982_v4  ;;  %v6186_v11 = vpop.f32.mrb[83].mxu1 }
 0x6f6   : > { %v3190_v12 = vpop.f32.mrb[84].mxu1 }
 0x6f7   : > { %v3197_v15 = vadd.f32 %v3190_v12, %v3089_v7  ;;  %v6197_v16 = vpop.f32.mrb[85].mxu1  ;;  %v6675_v7 = vld [vmem:[%s7706_s11 + $0x28] sm:$0xff]  }
 0x6f8   : > { %v3193_v17 = vpop.f32.mrb[86].mxu1 }
 0x6f9   : > { %v3206_v18 = vadd.f32 %v5526_v14, %v3197_v15  ;;  %v3198_v19 = vadd.f32 %v3193_v17, %v3090_v10  ;;  %v6198_v20 = vpop.f32.mrb[87].mxu1 }
 0x6fa   : > { %v6677_v20 = vld [vmem:[%s7706_s11 + $0x38] sm:$0xff]  }
 0x6fb   : > { %v3208_v21 = vadd.f32 %v3206_v18, %v7040_v27  ;;  %v3207_v22 = vadd.f32 %v5526_v14, %v3198_v19  ;;  %v6671_v27 = vld [vmem:[%s7706_s11] sm:$0xff]   ;;  %v6676_v14 = vld [vmem:[%s7706_s11 + $0x30] sm:$0xff]  }
 0x6fd   : > { %v3209_v23 = vadd.f32 %v3207_v22, %v7038_v26  ;;  %v3210_v24 = vmax.f32 %v3208_v21, 0.0  ;;  %v6670_v26 = vld [vmem:[%s7706_s11 + $0x8] sm:$0xff]  }
 0x6ff   : > { %v3211_v25 = vmax.f32 %v3209_v23, 0.0 }
 0x701   : > { %v7310_v28 = vpack.c.bf16 %v3211_v25, %v3210_v24 }
 0x703   : > { %6200 = vmatpush3.bf16.msra.mxu0 %v7310_v28  ;;  %6206 = vmatpush3.bf16.msra.mxu1 %v7310_v28 }
 0x704   : > { %6211 = vmatprep.subr.bf16.mxu0 %v6762_v13  ;;  %6217 = vmatprep.subr.bf16.mxu1 %v6762_v13 }
 0x706   : > { %6202 = vmatmul.mubr.msk.bf16.vlgmr.msra.gmra.mrb[84].mxu0 %vm1261_vm2, %v3213_v29  ;;  %6208 = vmatmul.mubr.msk.bf16.vlgmr.msra.gmra.mrb[88].mxu1 %vm1261_vm2, %v5528_v30  ;;  %v6678_v29 = vld [vmem:[%s7706_s11 + $0x40] sm:$0xff]  }
 0x707   : > { %6212 = vmatpush3.bf16.msra.mxu0 %v6670_v26  ;;  %6213 = vmatprep.mubr.msk.bf16.mxu0 %vm6763_vm1, %v6762_v13 }
 0x708   : > { %6219 = vmatprep.mubr.msk.bf16.mxu1 %vm6763_vm1, %v6762_v13  ;;  %6223 = vmatprep.subr.bf16.mxu0 %v6762_v13 }
 0x709   : > { %6218 = vmatpush3.bf16.msra.mxu1 %v6671_v27 }
 0x70a   : > { %6229 = vmatprep.subr.bf16.mxu1 %v6762_v13 }
 0x7d9   : > { %v3251_v31 = vpop.f32.mrb[84].mxu0  ;;  %v3299_v32 = vpop.f32.mrb[88].mxu1 }
 0x7da   : > { %v3257_v33 = vpack.c.bf16 %v3251_v31, %v3251_v31  ;;  %v3305_v34 = vpack.c.bf16 %v3299_v32, %v3299_v32  ;;  %v6209_v35 = vpop.f32.mrb[89].mxu1  ;;  %v6203_v36 = vpop.f32.mrb[85].mxu0 }
 0x7db   : > { %v3302_v37 = vpop.f32.mrb[90].mxu1  ;;  %v3254_v38 = vpop.f32.mrb[86].mxu0 }
 0x7dc   : > { %v6210_v39 = vpop.f32.mrb[91].mxu1  ;;  %6214 = vmatmul.mubr.msk.bf16.vlgmr.msra.gmra.mrb[88].mxu0 %vm1261_vm2, %v3305_v34  ;;  %6220 = vmatmul.mubr.msk.bf16.vlgmr.msra.gmra.mrb[92].mxu1 %vm1261_vm2, %v3257_v33  ;;  %v6204_v40 = vpop.f32.mrb[87].mxu0 }
 0x7dd   : > { %6224 = vmatpush3.bf16.msra.mxu0 %v7310_v28  ;;  %6225 = vmatprep.mubr.msk.bf16.mxu0 %vm6763_vm1, %v6762_v13 }
 0x7de   : > { %6235 = vmatprep.subr.bf16.mxu0 %v6762_v13  ;;  %6231 = vmatprep.mubr.msk.bf16.mxu1 %vm6763_vm1, %v6762_v13 }
 0x7df   : > { %6230 = vmatpush3.bf16.msra.mxu1 %v6672_v48 }
 0x7e0   : > { %6241 = vmatprep.subr.bf16.mxu1 %v6762_v13 }
 0x7e4   : > { %6226 = vmatmul.mubr.msk.bf16.vlgmr.msra.gmra.mrb[92].mxu0 %vm1261_vm2, %v5536_v41 }
 0x7e5   : > { %6236 = vmatpush3.bf16.msra.mxu0 %v7310_v28  ;;  %6237 = vmatprep.mubr.msk.bf16.mxu0 %vm6763_vm1, %v6762_v13 }
 0x7e6   : > { %6247 = vmatprep.subr.bf16.mxu0 %v6762_v13 }
 0x7ec   : > { %6238 = vmatmul.mubr.msk.bf16.vlgmr.msra.gmra.mrb[96].mxu0 %vm1261_vm2, %v5542_v42 }
 0x7ed   : > { %6248 = vmatpush3.bf16.msra.mxu0 %v7310_v28  ;;  %6249 = vmatprep.mubr.msk.bf16.mxu0 %vm6763_vm1, %v6762_v13 }
 0x7ee   : > { %6259 = vmatprep.subr.bf16.mxu0 %v6762_v13 }
 0x7f4   : > { %6250 = vmatmul.mubr.msk.bf16.vlgmr.msra.gmra.mrb[100].mxu0 %vm1261_vm2, %v5548_v43 }
 0x7f5   : > { %6260 = vmatpush3.bf16.msra.mxu0 %v7310_v28  ;;  %6261 = vmatprep.mubr.msk.bf16.mxu0 %vm6763_vm1, %v6762_v13 }
 0x7f6   : > { %6271 = vmatprep.subr.bf16.mxu0 %v6762_v13 }
 0x7fc   : > { %6262 = vmatmul.mubr.msk.bf16.vlgmr.msra.gmra.mrb[104].mxu0 %vm1261_vm2, %v5554_v44 }
 0x7fd   : > { %6272 = vmatpush3.bf16.msra.mxu0 %v7310_v28  ;;  %6273 = vmatprep.mubr.msk.bf16.mxu0 %vm6763_vm1, %v6762_v13 }
 0x7fe   : > { %6283 = vmatprep.subr.bf16.mxu0 %v6762_v13 }
 0x804   : > { %6274 = vmatmul.mubr.msk.bf16.vlgmr.msra.gmra.mrb[108].mxu0 %vm1261_vm2, %v5560_v45 }
 0x805   : > { %6284 = vmatpush3.bf16.msra.mxu0 %v7310_v28  ;;  %6285 = vmatprep.mubr.msk.bf16.mxu0 %vm6763_vm1, %v6762_v13 }
 0x806   : > { %6295 = vmatprep.subr.bf16.mxu0 %v6762_v13 }
 0x80c   : > { %6286 = vmatmul.mubr.msk.bf16.vlgmr.msra.gmra.mrb[112].mxu0 %vm1261_vm2, %v5566_v46 }
 0x80d   : > { %6296 = vmatpush3.bf16.msra.mxu0 %v7310_v28  ;;  %6297 = vmatprep.mubr.msk.bf16.mxu0 %vm6763_vm1, %v6762_v13 }
 0x80e   : > { %6307 = vmatprep.subr.bf16.mxu0 %v6762_v13 }
 0x814   : > { %6298 = vmatmul.mubr.msk.bf16.vlgmr.msra.gmra.mrb[116].mxu0 %vm1261_vm2, %v5572_v47 }
 0x815   : > { %6309 = vmatprep.mubr.msk.bf16.mxu0 %vm6763_vm1, %v6762_v13 }
 0x8af   : > { %v3352_v49 = vpop.f32.mrb[88].mxu0  ;;  %v3401_v50 = vpop.f32.mrb[92].mxu1 }
 0x8b0   : > { %v7402_v51 = vadd.f32 %v3401_v50, %v3352_v49  ;;  %v6215_v53 = vpop.f32.mrb[89].mxu0  ;;  %v6221_v54 = vpop.f32.mrb[93].mxu1 }
 0x8b1   : > { %v3355_v55 = vpop.f32.mrb[90].mxu0  ;;  %v3404_v56 = vpop.f32.mrb[94].mxu1 }
 0x8b2   : > { %v6216_v58 = vpop.f32.mrb[91].mxu0  ;;  %v6222_v59 = vpop.f32.mrb[95].mxu1 }
 0x8b7   : > { %v3446_v60 = vpop.f32.mrb[92].mxu0 }
 0x8b8   : > { %v3452_v52 = vpack.c.bf16 %v3446_v60, %v3446_v60  ;;  %v6227_v62 = vpop.f32.mrb[93].mxu0 }
 0x8b9   : > { %v3449_v63 = vpop.f32.mrb[94].mxu0 }
 0x8ba   : > { %v6228_v0 = vpop.f32.mrb[95].mxu0  ;;  %6232 = vmatmul.mubr.msk.bf16.vlgmr.msra.gmra.mrb[96].mxu1 %vm1261_vm2, %v3452_v52 }
 0x8bb   : > { %6242 = vmatpush3.bf16.msra.mxu1 %v6673_v61  ;;  %6243 = vmatprep.mubr.msk.bf16.mxu1 %vm6763_vm1, %v6762_v13 }
 0x8bc   : > { %6253 = vmatprep.subr.bf16.mxu1 %v6762_v13 }
 0x8bf   : > { %v3545_v57 = vpop.f32.mrb[96].mxu0 }
 0x8c0   : > { %v3551_v2 = vpack.c.bf16 %v3545_v57, %v3545_v57  ;;  %v6239_v3 = vpop.f32.mrb[97].mxu0 }
 0x8c1   : > { %v3548_v4 = vpop.f32.mrb[98].mxu0 }
 0x8c2   : > { %v6240_v5 = vpop.f32.mrb[99].mxu0  ;;  %6244 = vmatmul.mubr.msk.bf16.vlgmr.msra.gmra.mrb[100].mxu1 %vm1261_vm2, %v3551_v2  ;;  %v5578_v4 = vld [vmem:[%s7707_s12] ss:$0 sm:$0xff] }
 0x8c3   : > { %6254 = vmatpush3.bf16.msra.mxu1 %v6674_v1  ;;  %6255 = vmatprep.mubr.msk.bf16.mxu1 %vm6763_vm1, %v6762_v13 }
 0x8c4   : > { %6265 = vmatprep.subr.bf16.mxu1 %v6762_v13 }
 0x8c7   : > { %v3644_v6 = vpop.f32.mrb[100].mxu0 }
 0x8c8   : > { %v3650_v8 = vpack.c.bf16 %v3644_v6, %v3644_v6  ;;  %v6251_v9 = vpop.f32.mrb[101].mxu0 }
 0x8c9   : > { %v3647_v10 = vpop.f32.mrb[102].mxu0 }
 0x8ca   : > { %v6252_v11 = vpop.f32.mrb[103].mxu0  ;;  %6256 = vmatmul.mubr.msk.bf16.vlgmr.msra.gmra.mrb[104].mxu1 %vm1261_vm2, %v3650_v8 }
 0x8cb   : > { %6266 = vmatpush3.bf16.msra.mxu1 %v6675_v7  ;;  %6267 = vmatprep.mubr.msk.bf16.mxu1 %vm6763_vm1, %v6762_v13 }
 0x8cc   : > { %6277 = vmatprep.subr.bf16.mxu1 %v6762_v13 }
 0x8cf   : > { %v3743_v12 = vpop.f32.mrb[104].mxu0 }
 0x8d0   : > { %v3749_v15 = vpack.c.bf16 %v3743_v12, %v3743_v12  ;;  %v6263_v16 = vpop.f32.mrb[105].mxu0 }
 0x8d1   : > { %v3746_v17 = vpop.f32.mrb[106].mxu0  ;;  %v6679_v16 = vld [vmem:[%s7709_s14 + $0x10] sm:$0xff]  }
 0x8d2   : > { %v6264_v18 = vpop.f32.mrb[107].mxu0  ;;  %6268 = vmatmul.mubr.msk.bf16.vlgmr.msra.gmra.mrb[108].mxu1 %vm1261_vm2, %v3749_v15  ;;  %v4110_v15 = vld [vmem:[%s7708_s13] sm:$0x3]  ;;  %v5592_v17 = vld [vmem:[%s7708_s13 + $0x4] sm:$0x3] }
 0x8d3   : > { %6278 = vmatpush3.bf16.msra.mxu1 %v6676_v14  ;;  %6279 = vmatprep.mubr.msk.bf16.mxu1 %vm6763_vm1, %v6762_v13  ;;  %v5580_v14 = vld [vmem:[%s7708_s13 + $0x2] sm:$0x3]  ;;  %v5601_v18 = vld [vmem:[%s7708_s13 + $0x6] sm:$0x3] }
 0x8d4   : > { %6289 = vmatprep.subr.bf16.mxu1 %v6762_v13 }
 0x8d7   : > { %v3842_v19 = vpop.f32.mrb[108].mxu0 }
 0x8d8   : > { %v3848_v21 = vpack.c.bf16 %v3842_v19, %v3842_v19  ;;  %v6275_v22 = vpop.f32.mrb[109].mxu0  ;;  %v5610_v19 = vld [vmem:[%s7708_s13 + $0x8] sm:$0x3] }
 0x8d9   : > { %v3845_v23 = vpop.f32.mrb[110].mxu0  ;;  %v5637_v22 = vld [vmem:[%s7708_s13 + $0xe] sm:$0x3] }
 0x8da   : > { %v6276_v24 = vpop.f32.mrb[111].mxu0  ;;  %6280 = vmatmul.mubr.msk.bf16.vlgmr.msra.gmra.mrb[112].mxu1 %vm1261_vm2, %v3848_v21  ;;  %v5628_v21 = vld [vmem:[%s7708_s13 + $0xc] sm:$0x3]  ;;  %v5646_v23 = vld [vmem:[%s7708_s13 + $0x10] sm:$0x3] }
 0x8db   : > { %6290 = vmatpush3.bf16.msra.mxu1 %v6677_v20  ;;  %6291 = vmatprep.mubr.msk.bf16.mxu1 %vm6763_vm1, %v6762_v13  ;;  %v5619_v20 = vld [vmem:[%s7708_s13 + $0xa] sm:$0x3]  ;;  %v5083_v24 = vld [vmem:[%s7711_s16] sm:$0x3] }
 0x8dc   : > { %6301 = vmatprep.subr.bf16.mxu1 %v6762_v13 }
 0x8df   : > { %v3941_v25 = vpop.f32.mrb[112].mxu0 }
 0x8e0   : > { %v3947_v30 = vpack.c.bf16 %v3941_v25, %v3941_v25  ;;  %v6287_v26 = vpop.f32.mrb[113].mxu0  ;;  %v6680_v25 = vld [vmem:[%s7709_s14 + $0x18] sm:$0xff]  }
 0x8e1   : > { %v3944_v27 = vpop.f32.mrb[114].mxu0 }
 0x8e2   : > { %v6288_v31 = vpop.f32.mrb[115].mxu0  ;;  %6292 = vmatmul.mubr.msk.bf16.vlgmr.msra.gmra.mrb[116].mxu1 %vm1261_vm2, %v3947_v30 }
 0x8e3   : > { %6302 = vmatpush3.bf16.msra.mxu1 %v6678_v29  ;;  %6303 = vmatprep.mubr.msk.bf16.mxu1 %vm6763_vm1, %v6762_v13  ;;  %v6681_v29 = vld [vmem:[%s7709_s14] sm:$0xff]  }
 0x8e4   : > { %6313 = vmatprep.subr.bf16.mxu1 %v6762_v13 }
 0x8e7   : > { %v4040_v32 = vpop.f32.mrb[116].mxu0 }
 0x8e8   : > { %v4046_v33 = vpack.c.bf16 %v4040_v32, %v4040_v32  ;;  %v6299_v34 = vpop.f32.mrb[117].mxu0 }
 0x8e9   : > { %v4043_v35 = vpop.f32.mrb[118].mxu0 }
 0x8ea   : > { %v6300_v36 = vpop.f32.mrb[119].mxu0  ;;  %6304 = vmatmul.mubr.msk.bf16.vlgmr.msra.gmra.mrb[120].mxu1 %vm1261_vm2, %v4046_v33 }
 0x8eb   : > { %6315 = vmatprep.mubr.msk.bf16.mxu1 %vm6763_vm1, %v6762_v13  ;;  %v6682_v36 = vld [vmem:[%s7709_s14 + $0x8] sm:$0xff]  }
 0x98d   : > { %v3499_v37 = vpop.f32.mrb[96].mxu1 }
 0x98e   : > { %v3505_v38 = vadd.f32 %v3499_v37, %v7402_v51  ;;  %v6233_v39 = vpop.f32.mrb[97].mxu1 }
 0x98f   : > { %v3502_v40 = vpop.f32.mrb[98].mxu1 }
 0x990   : > { %v6234_v41 = vpop.f32.mrb[99].mxu1 }
 0x995   : > { %v3598_v42 = vpop.f32.mrb[100].mxu1 }
 0x996   : > { %v3604_v43 = vadd.f32 %v3598_v42, %v3505_v38  ;;  %v6245_v44 = vpop.f32.mrb[101].mxu1  ;;  %v6683_v42 = vld [vmem:[%s7709_s14 + $0x20] sm:$0xff]  }
 0x997   : > { %v3601_v45 = vpop.f32.mrb[102].mxu1 }
 0x998   : > { %v6246_v46 = vpop.f32.mrb[103].mxu1 }
 0x99d   : > { %v3697_v47 = vpop.f32.mrb[104].mxu1 }
 0x99e   : > { %v3703_v48 = vadd.f32 %v3697_v47, %v3604_v43  ;;  %v6257_v49 = vpop.f32.mrb[105].mxu1  ;;  %v6684_v43 = vld [vmem:[%s7709_s14 + $0x28] sm:$0xff]  }
 0x99f   : > { %v3700_v50 = vpop.f32.mrb[106].mxu1  ;;  %v6685_v49 = vld [vmem:[%s7709_s14 + $0x30] sm:$0xff]  }
 0x9a0   : > { %v6258_v53 = vpop.f32.mrb[107].mxu1 }
 0x9a5   : > { %v3796_v54 = vpop.f32.mrb[108].mxu1 }
 0x9a6   : > { %v3802_v55 = vadd.f32 %v3796_v54, %v3703_v48  ;;  %v6269_v56 = vpop.f32.mrb[109].mxu1 }
 0x9a7   : > { %v3799_v58 = vpop.f32.mrb[110].mxu1  ;;  %v6686_v56 = vld [vmem:[%s7709_s14 + $0x38] sm:$0xff]  }
 0x9a8   : > { %v6270_v59 = vpop.f32.mrb[111].mxu1 }
 0x9ad   : > { %v3895_v60 = vpop.f32.mrb[112].mxu1 }
 0x9ae   : > { %v3901_v51 = vadd.f32 %v3895_v60, %v3802_v55  ;;  %v6281_v61 = vpop.f32.mrb[113].mxu1 }
 0x9af   : > { %v3898_v52 = vpop.f32.mrb[114].mxu1 }
 0x9b0   : > { %v6282_v62 = vpop.f32.mrb[115].mxu1  ;;  %v6687_v52 = vld [vmem:[%s7709_s14 + $0x40] sm:$0xff]  }
 0x9b1   : > { %v6688_v62 = vld [vmem:[%s7709_s14 + $0x48] sm:$0xff]  }
 0x9b5   : > { %v3994_v63 = vpop.f32.mrb[116].mxu1 }
 0x9b6   : > { %v4000_v0 = vadd.f32 %v3994_v63, %v3901_v51  ;;  %v6293_v57 = vpop.f32.mrb[117].mxu1 }
 0x9b7   : > { %v3997_v1 = vpop.f32.mrb[118].mxu1 }
 0x9b8   : > { %v6294_v2 = vpop.f32.mrb[119].mxu1 }
 0x9bd   : > { %v4093_v3 = vpop.f32.mrb[120].mxu1 }
 0x9be   : > { %v4099_v5 = vadd.f32 %v4093_v3, %v4000_v0  ;;  %v6305_v6 = vpop.f32.mrb[121].mxu1  ;;  %v6689_v3 = vld [vmem:[%s7709_s14 + $0x50] sm:$0xff]  }
 0x9bf   : > { %v4096_v7 = vpop.f32.mrb[122].mxu1 }
 0x9c0   : > { %v4107_v8 = vadd.f32 %v5578_v4, %v4099_v5  ;;  %v6306_v9 = vpop.f32.mrb[123].mxu1 }
 0x9c2   : > { %v4108_v10 = vmax.f32 %v4107_v8, 0.0  ;;  %v6690_v8 = vld [vmem:[%s7709_s14 + $0x58] sm:$0xff]  }
 0x9c4   : > { %v4109_v11 = vpack.c.bf16 %v4108_v10, %v4108_v10 }
 0x9c6   : > { %v4117_v12 = vsel %vm4115_vm3, %v4109_v11, 0 }
 0x9c7   : > { %6308 = vmatpush3.bf16.msra.mxu0 %v4117_v12  ;;  %6314 = vmatpush3.bf16.msra.mxu1 %v4117_v12 }
 0x9c8   : > { %6335 = vmatprep.subr.bf16.mxu1 %v6762_v13  ;;  %6319 = vmatprep.subr.bf16.mxu0 %v6762_v13 }
 0x9ca   : > { %6316 = vmatmul.mubr.msk.bf16.vlgmr.msra.gmra.mrb[124].mxu1 %vm4111_vm4, %v5580_v14  ;;  %6310 = vmatmul.mubr.msk.bf16.vlgmr.msra.gmra.mrb[120].mxu0 %vm4111_vm4, %v4110_v15  ;;  %v6691_v15 = vld [vmem:[%s7709_s14 + $0x60] sm:$0xff]  }
 0x9cb   : > { %6336 = vmatpush3.bf16.msra.mxu1 %v4117_v12  ;;  %6337 = vmatprep.mubr.msk.bf16.mxu1 %vm6763_vm1, %v6762_v13 }
 0x9cc   : > { %6349 = vmatprep.subr.bf16.mxu1 %v6762_v13  ;;  %6320 = vmatpush3.bf16.msra.mxu0 %v6679_v16  ;;  %v6692_v16 = vld [vmem:[%s7709_s14 + $0x68] sm:$0xff]  }
 0x9cd   : > { %6321 = vmatprep.subr.bf16.mxu0 %v6762_v13  ;;  %6323 = vmatprep.mubr.msk.bf16.mxu0 %vm6763_vm1, %v6762_v13 }
 0x9d0   : > { %6322 = vmatpush3.bf16.msra.mxu0 %v6680_v25  ;;  %v6695_v25 = vld [vmem:[%s7709_s14 + $0x80] sm:$0xff]  }
 0x9d1   : > { %6327 = vmatprep.subr.bf16.mxu0 %v6762_v13 }
 0x9d2   : > { %6338 = vmatmul.mubr.msk.bf16.vlgmr.msra.gmra.mrb[128].mxu1 %vm4111_vm4, %v5592_v17 }
 0x9d3   : > { %6350 = vmatpush3.bf16.msra.mxu1 %v4117_v12  ;;  %6351 = vmatprep.mubr.msk.bf16.mxu1 %vm6763_vm1, %v6762_v13 }
 0x9d4   : > { %6363 = vmatprep.subr.bf16.mxu1 %v6762_v13 }
 0x9da   : > { %6352 = vmatmul.mubr.msk.bf16.vlgmr.msra.gmra.mrb[132].mxu1 %vm4111_vm4, %v5601_v18 }
 0x9db   : > { %6364 = vmatpush3.bf16.msra.mxu1 %v4117_v12  ;;  %6365 = vmatprep.mubr.msk.bf16.mxu1 %vm6763_vm1, %v6762_v13 }
 0x9dc   : > { %6377 = vmatprep.subr.bf16.mxu1 %v6762_v13 }
 0x9e2   : > { %6366 = vmatmul.mubr.msk.bf16.vlgmr.msra.gmra.mrb[136].mxu1 %vm4111_vm4, %v5610_v19 }
 0x9e3   : > { %6378 = vmatpush3.bf16.msra.mxu1 %v4117_v12  ;;  %6379 = vmatprep.mubr.msk.bf16.mxu1 %vm6763_vm1, %v6762_v13 }
 0x9e4   : > { %6391 = vmatprep.subr.bf16.mxu1 %v6762_v13 }
 0x9ea   : > { %6380 = vmatmul.mubr.msk.bf16.vlgmr.msra.gmra.mrb[140].mxu1 %vm4111_vm4, %v5619_v20 }
 0x9eb   : > { %6392 = vmatpush3.bf16.msra.mxu1 %v4117_v12  ;;  %6393 = vmatprep.mubr.msk.bf16.mxu1 %vm6763_vm1, %v6762_v13 }
 0x9ec   : > { %6405 = vmatprep.subr.bf16.mxu1 %v6762_v13 }
 0x9f2   : > { %6394 = vmatmul.mubr.msk.bf16.vlgmr.msra.gmra.mrb[144].mxu1 %vm4111_vm4, %v5628_v21 }
 0x9f3   : > { %6406 = vmatpush3.bf16.msra.mxu1 %v4117_v12  ;;  %6407 = vmatprep.mubr.msk.bf16.mxu1 %vm6763_vm1, %v6762_v13 }
 0x9f4   : > { %6419 = vmatprep.subr.bf16.mxu1 %v6762_v13 }
 0x9fa   : > { %6408 = vmatmul.mubr.msk.bf16.vlgmr.msra.gmra.mrb[148].mxu1 %vm4111_vm4, %v5637_v22  ;;  %v6693_v22 = vld [vmem:[%s7709_s14 + $0x70] sm:$0xff]  }
 0x9fb   : > { %6420 = vmatpush3.bf16.msra.mxu1 %v4117_v12  ;;  %6421 = vmatprep.mubr.msk.bf16.mxu1 %vm6763_vm1, %v6762_v13 }
 0x9fc   : > { %6433 = vmatprep.subr.bf16.mxu1 %v6762_v13 }
 0xa02   : > { %6422 = vmatmul.mubr.msk.bf16.vlgmr.msra.gmra.mrb[152].mxu1 %vm4111_vm4, %v5646_v23  ;;  %v6694_v23 = vld [vmem:[%s7709_s14 + $0x78] sm:$0xff]  }
 0xa03   : > { %6434 = vmatpush3.bf16.msra.mxu1 %v7310_v28  ;;  %6435 = vmatprep.mubr.msk.bf16.mxu1 %vm6763_vm1, %v6762_v13 }
 0xa0a   : > { %6436 = vmatmul.mubr.msk.bf16.vlgmr.msra.gmra.mrb[156].mxu1 %vm1261_vm2, %v5083_v24 }
 0xa0b   : > { %6453 = vmatprep.mubr.msk.f32.mxu1 %vm6763_vm1, %v6762_v13 }
 0xa9d   : > { %v4203_v28 = vpop.f32.mrb[124].mxu1  ;;  %v4153_v30 = vpop.f32.mrb[120].mxu0 }
 0xa9e   : > { %v4209_v26 = vpack.c.bf16 %v4203_v28, %v4203_v28  ;;  %v6317_v27 = vpop.f32.mrb[125].mxu1  ;;  %v6311_v31 = vpop.f32.mrb[121].mxu0  ;;  %v4159_v40 = vpack.c.bf16 %v4153_v30, %v4153_v30  ;;  %v6696_v28 = vld [vmem:[%s7709_s14 + $0x88] sm:$0xff]   ;;  %v6697_v30 = vld [vmem:[%s7712_s17] sm:$0xff]  }
 0xa9f   : > { %v4206_v32 = vpop.f32.mrb[126].mxu1  ;;  %v4156_v33 = vpop.f32.mrb[122].mxu0  ;;  %v5197_v27 = vld [vmem:[%s7714_s19] sm:$0xff]  ;;  %v5198_v31 = vld [vmem:[%s7714_s19 + $0x8] sm:$0xff] }
 0xaa0   : > { %6324 = vmatmul.mubr.msk.bf16.vlgmr.msra.gmra.mrb[124].mxu0 %vm4227_vm5, %v4209_v26  ;;  %v6318_v34 = vpop.f32.mrb[127].mxu1  ;;  %v6312_v35 = vpop.f32.mrb[123].mxu0  ;;  %v6521_v32 = vpack.c.bf16 %v5198_v31, %v5197_v27  ;;  %v6764_v33 = vmov 0.0|0.0  }
 0xaa1   : > { %6328 = vmatpush3.bf16.msra.mxu0 %v6681_v29  ;;  %6331 = vmatprep.mubr.msk.bf16.mxu0 %vm6763_vm1, %v6762_v13  ;;  %v5200_v34 = vld [vmem:[%s7714_s19 + $0x18] sm:$0xff] }
 0xaa2   : > { %6329 = vmatprep.subr.bf16.mxu0 %v6762_v13  ;;  %6520 = vmatprep.subr.bf16.mxu1 %v6764_v33 }
 0xaa3   : > { %6522 = vmatpush3.bf16.msra.mxu1 %v6521_v32 }
 0xaa4   : > { %6523 = vmatprep.subr.bf16.mxu1 %v6764_v33 }
 0xaa5   : > { %6330 = vmatpush3.bf16.msra.mxu0 %v6682_v36  ;;  %v4365_v37 = vpop.f32.mrb[128].mxu1  ;;  %v5655_v36 = vld [vmem:[%s7710_s15] ss:$0 sm:$0xff] }
 0xaa6   : > { %6341 = vmatprep.subr.bf16.mxu0 %v6762_v13  ;;  %v6339_v38 = vpop.f32.mrb[129].mxu1  ;;  %v4371_v48 = vpack.c.bf16 %v4365_v37, %v4365_v37  ;;  %v5657_v37 = vld [vmem:[%s7713_s18] ss:$0 sm:$0xff] }
 0xaa7   : > { %v4368_v39 = vpop.f32.mrb[130].mxu1  ;;  %v6526_v38 = vadd.f32 %v5657_v37, %v5655_v36 }
 0xaa8   : > { %v6340_v41 = vpop.f32.mrb[131].mxu1 }
 0xaac   : > { %6332 = vmatmul.mubr.msk.bf16.vlgmr.msra.gmra.mrb[124].mxu0 %vm4227_vm5, %v4159_v40 }
 0xaad   : > { %6342 = vmatpush3.bf16.msra.mxu0 %v6683_v42  ;;  %6345 = vmatprep.mubr.msk.bf16.mxu0 %vm6763_vm1, %v6762_v13  ;;  %v4472_v44 = vpop.f32.mrb[132].mxu1 }
 0xaae   : > { %6343 = vmatprep.subr.bf16.mxu0 %v6762_v13  ;;  %v6353_v45 = vpop.f32.mrb[133].mxu1  ;;  %v4478_v51 = vpack.c.bf16 %v4472_v44, %v4472_v44 }
 0xaaf   : > { %v4475_v46 = vpop.f32.mrb[134].mxu1 }
 0xab0   : > { %v6354_v47 = vpop.f32.mrb[135].mxu1 }
 0xab1   : > { %6344 = vmatpush3.bf16.msra.mxu0 %v6684_v43 }
 0xab2   : > { %6355 = vmatprep.subr.bf16.mxu0 %v6762_v13 }
 0xab5   : > { %v4579_v50 = vpop.f32.mrb[136].mxu1 }
 0xab6   : > { %v6367_v53 = vpop.f32.mrb[137].mxu1  ;;  %v4585_v2 = vpack.c.bf16 %v4579_v50, %v4579_v50 }
 0xab7   : > { %v4582_v54 = vpop.f32.mrb[138].mxu1 }
 0xab8   : > { %6346 = vmatmul.mubr.msk.bf16.vlgmr.msra.gmra.mrb[124].mxu0 %vm4227_vm5, %v4371_v48  ;;  %v6368_v55 = vpop.f32.mrb[139].mxu1 }
 0xab9   : > { %6356 = vmatpush3.bf16.msra.mxu0 %v6685_v49  ;;  %6359 = vmatprep.mubr.msk.bf16.mxu0 %vm6763_vm1, %v6762_v13  ;;  %v5201_v55 = vld [vmem:[%s7715_s20] sm:$0x1] }
 0xaba   : > { %6357 = vmatprep.subr.bf16.mxu0 %v6762_v13 }
 0xabd   : > { %6358 = vmatpush3.bf16.msra.mxu0 %v6686_v56  ;;  %v4686_v58 = vpop.f32.mrb[140].mxu1 }
 0xabe   : > { %6369 = vmatprep.subr.bf16.mxu0 %v6762_v13  ;;  %v6381_v59 = vpop.f32.mrb[141].mxu1  ;;  %v4692_v12 = vpack.c.bf16 %v4686_v58, %v4686_v58 }
 0xabf   : > { %v4689_v60 = vpop.f32.mrb[142].mxu1 }
 0xac0   : > { %v6382_v61 = vpop.f32.mrb[143].mxu1 }
 0xac4   : > { %6360 = vmatmul.mubr.msk.bf16.vlgmr.msra.gmra.mrb[124].mxu0 %vm4227_vm5, %v4478_v51 }
 0xac5   : > { %6370 = vmatpush3.bf16.msra.mxu0 %v6687_v52  ;;  %6373 = vmatprep.mubr.msk.bf16.mxu0 %vm6763_vm1, %v6762_v13  ;;  %v4793_v63 = vpop.f32.mrb[144].mxu1 }
 0xac6   : > { %6371 = vmatprep.subr.bf16.mxu0 %v6762_v13  ;;  %v6395_v0 = vpop.f32.mrb[145].mxu1  ;;  %v4799_v21 = vpack.c.bf16 %v4793_v63, %v4793_v63 }
 0xac7   : > { %v4796_v57 = vpop.f32.mrb[146].mxu1 }
 0xac8   : > { %v6396_v1 = vpop.f32.mrb[147].mxu1 }
 0xac9   : > { %6372 = vmatpush3.bf16.msra.mxu0 %v6688_v62 }
 0xaca   : > { %6383 = vmatprep.subr.bf16.mxu0 %v6762_v13 }
 0xacd   : > { %v4900_v4 = vpop.f32.mrb[148].mxu1 }
 0xace   : > { %v6409_v5 = vpop.f32.mrb[149].mxu1  ;;  %v4906_v24 = vpack.c.bf16 %v4900_v4, %v4900_v4 }
 0xacf   : > { %v4903_v6 = vpop.f32.mrb[150].mxu1 }
 0xad0   : > { %6374 = vmatmul.mubr.msk.bf16.vlgmr.msra.gmra.mrb[124].mxu0 %vm4227_vm5, %v4585_v2  ;;  %v6410_v7 = vpop.f32.mrb[151].mxu1 }
 0xad1   : > { %6384 = vmatpush3.bf16.msra.mxu0 %v6689_v3  ;;  %6387 = vmatprep.mubr.msk.bf16.mxu0 %vm6763_vm1, %v6762_v13 }
 0xad2   : > { %6385 = vmatprep.subr.bf16.mxu0 %v6762_v13 }
 0xad5   : > { %6386 = vmatpush3.bf16.msra.mxu0 %v6690_v8  ;;  %v5007_v9 = vpop.f32.mrb[152].mxu1 }
 0xad6   : > { %6397 = vmatprep.subr.bf16.mxu0 %v6762_v13  ;;  %v6423_v10 = vpop.f32.mrb[153].mxu1  ;;  %v5013_v29 = vpack.c.bf16 %v5007_v9, %v5007_v9 }
 0xad7   : > { %v5010_v11 = vpop.f32.mrb[154].mxu1 }
 0xad8   : > { %v6424_v14 = vpop.f32.mrb[155].mxu1 }
 0xadc   : > { %6388 = vmatmul.mubr.msk.bf16.vlgmr.msra.gmra.mrb[124].mxu0 %vm4227_vm5, %v4692_v12 }
 0xadd   : > { %6398 = vmatpush3.bf16.msra.mxu0 %v6691_v15  ;;  %6401 = vmatprep.mubr.msk.bf16.mxu0 %vm6763_vm1, %v6762_v13  ;;  %v5121_v17 = vpop.f32.mrb[156].mxu1 }
 0xade   : > { %6399 = vmatprep.subr.bf16.mxu0 %v6762_v13  ;;  %v6437_v18 = vpop.f32.mrb[157].mxu1  ;;  %v5127_v26 = vpack.c.bf16 %v5121_v17, %v5121_v17 }
 0xadf   : > { %v5124_v19 = vpop.f32.mrb[158].mxu1 }
 0xae0   : > { %v6438_v20 = vpop.f32.mrb[159].mxu1 }
 0xae1   : > { %6400 = vmatpush3.bf16.msra.mxu0 %v6692_v16 }
 0xae2   : > { %6411 = vmatprep.subr.bf16.mxu0 %v6762_v13 }
 0xae8   : > { %6402 = vmatmul.mubr.msk.bf16.vlgmr.msra.gmra.mrb[124].mxu0 %vm4227_vm5, %v4799_v21 }
 0xae9   : > { %6412 = vmatpush3.bf16.msra.mxu0 %v6693_v22  ;;  %6415 = vmatprep.mubr.msk.bf16.mxu0 %vm6763_vm1, %v6762_v13 }
 0xaea   : > { %6413 = vmatprep.subr.bf16.mxu0 %v6762_v13 }
 0xaed   : > { %6414 = vmatpush3.bf16.msra.mxu0 %v6694_v23 }
 0xaee   : > { %6425 = vmatprep.subr.bf16.mxu0 %v6762_v13 }
 0xaf4   : > { %6416 = vmatmul.mubr.msk.bf16.vlgmr.msra.gmra.mrb[124].mxu0 %vm4227_vm5, %v4906_v24 }
 0xaf5   : > { %6426 = vmatpush3.bf16.msra.mxu0 %v6695_v25  ;;  %6429 = vmatprep.mubr.msk.bf16.mxu0 %vm6763_vm1, %v6762_v13 }
 0xaf6   : > { %6427 = vmatprep.subr.bf16.mxu0 %v6762_v13 }
 0xaf9   : > { %6428 = vmatpush3.bf16.msra.mxu0 %v6696_v28 }
 0xafa   : > { %6439 = vmatprep.subr.bf16.mxu0 %v6762_v13 }
 0xb00   : > { %6430 = vmatmul.mubr.msk.bf16.vlgmr.msra.gmra.mrb[124].mxu0 %vm4227_vm5, %v5013_v29 }
 0xb01   : > { %6440 = vmatpush3.bf16.msra.mxu0 %v6697_v30  ;;  %6441 = vmatprep.mubr.msk.bf16.mxu0 %vm6763_vm1, %v6762_v13  ;;  %v5199_v13 = vld [vmem:[%s7714_s19 + $0x10] sm:$0xff] }
 0xb02   : > { %v6524_v35 = vpack.c.bf16 %v5200_v34, %v5199_v13 }
 0xb04   : > { %6525 = vmatpush3.bf16.msra.mxu1 %v6524_v35 }
 0xb0c   : > { %6442 = vmatmul.mubr.msk.bf16.vlgmr.msra.gmra.mrb[124].mxu0 %vm1261_vm2, %v5127_v26 }
 0xbdf   : > { %v5180_v39 = vpop.f32.mrb[124].mxu0 }
 0xbe0   : > { %v6527_v40 = vadd.f32 %v6526_v38, %v5180_v39  ;;  %v6443_v41 = vpop.f32.mrb[125].mxu0 }
 0xbe1   : > { %v5183_v42 = vpop.f32.mrb[126].mxu0 }
 0xbe2   : > { %v5187_v43 = vmax.f32 %v6527_v40, 0.0  ;;  %v6444_v44 = vpop.f32.mrb[127].mxu0 }
 0xbe4   : > { %v5189_v45 = vsel %vm5188_vm6, %v5187_v43, 0.0 }
 0xbe5   : > { %v5190_v46 = vrot.slane %v5189_v45, 4 }
 0xbe7   : > { %v5191_v47 = vadd.f32 %v5190_v46, %v5189_v45 }
 0xbe9   : > { %v5192_v48 = vrot.slane %v5191_v47, 2 }
 0xbeb   : > { %v5193_v49 = vadd.f32 %v5192_v48, %v5191_v47 }
 0xbed   : > { %v5194_v50 = vrot.slane %v5193_v49, 1 }
 0xbef   : > { %v5195_v53 = vadd.f32 %v5194_v50, %v5193_v49 }
 0xbf1   : > { %v5196_v54 = vmul.f32 0.25, %v5195_v53 }
 0xbf3   : > { %6454 = vmatmul.mubr.msk.f32.vlgmr.msra.gmra.mrb[6].mxu1 %vm4227_vm5, %v5196_v54 }
 0xcc6   : > { %v5271_v56 = vpop.f32.mrb[6].mxu1 }
 0xcc7   : > { %v5272_v58 = vadd.f32 %v5271_v56, %v5201_v55  ;;  %v6455_v59 = vpop.f32.mrb[7].mxu1 }
 0xcc9   : > { %5275 = vst [vmem:[%s648_s28] sm:$0x1] %v5272_v58 }
 0xcca   : > { %6711 = shalt.err (!%p6708_p3)
}
 0xccb   : > { %s6712_s2 = scalar_lea.hbm %s7653_s0, 16  ;;  %s6716_s30 = scalar_lea.hbm %s7754_s29, 32 }
 0xccc   : > { %p6713_p4 = scmp.ne.s32.totalorder %s7653_s0, %s6712_s2  ;;  %p6717_p9 = scmp.lt.u32.totalorder %s7653_s0, %s7754_s29 }
 0xccd   : > { %p6718_p10 = scmp.lt.u32.totalorder %s6716_s30, %s6712_s2  ;;  %p6720_p12 = scmp.lt.u32.totalorder %s6712_s2, %s7653_s0 }
 0xcce   : > { %p6714_p7 = pnand %p6713_p4, %p6914_p5 }
 0xccf   : > { %p6719_p11 = por %p6718_p10, %p6717_p9 }
 0xcd0   : > { %p6715_p8 = pneg %p6714_p7 }
 0xcd1   : > { %p6721_p13 = por %p6720_p12, %p6719_p11 }
 0xcd3   : > { %p6722_p0 = pnand %p6721_p13, %p6715_p8 }
 0xcd5   : > { %6725 = shalt.err (!%p6722_p0)
}
 0xcd6   : > { %6564 = dma.vmem_to_hbm [thread:$0]  (%p6914_p5), %s7655_s21, 16, %s7653_s0, %s5277_s4  }
 0xcd7 PF: > { %s7755_s6 = sld [smem:[#allocation7_spill]]  ;;  %s7756_s27 = sld [smem:[#allocation5_spill]] }
 0xcdd   : > { %p6570_p1 = scmp.ge.s32.totalorder %s7755_s6, 2  ;;  %s5301_s22 = sand.u32 1, %s7756_s27  }
 0xcde   : > { %s5302_s28 = scalar_lea.sflag [#allocation3], %s5301_s22 }
 0xcdf   : > { %p6567_p2 = pnand %p6570_p1, %p6918_p6 }
 0xce1   : > { %6743 = dma.done.wait (!%p6567_p2), %s5302_s28, 16  }
 0xce2   : > { %6745 = vsyncadd (!%p6567_p2), %s5302_s28, 4294967280  ;;  %s7758_s27 = sld [smem:[#allocation8_spill]]  ;;  %s7759_s30 = sld [smem:[#allocation6_spill]] }
 0xce3   : > { %s7760_s26 = sld [smem:[#allocation9_spill]]  ;;  %s7761_s2 = smov %s6752_s25 }
 0xce8   : > { %p31_p3 = scmp.ge.s32.totalorder %s7758_s27, 4   ;;  %s7762_s25 = smov %s7759_s30 }
 0xcea   :  { %33 = sbr.rel (!%p31_p3) target bundleno = 12 (0xc), region = 206 }
 0xcf1   :  { %5306 = vsyncpa [#allocation3], 1 }
 0xcf2   :  { %5308 = vsyncpa [#allocation3 + $0x1], 1 }

</bundles_post_ra>
